<compile_context>
chip_gen: v5e
topology: v5e:2x2
jax: 0.10.0
libtpu: 0.0.40
codegen_flags: <defaults>
</compile_context>

<pallas_src>
import functools

import jax
import jax.numpy as jnp
import numpy as np
from jax import lax
from jax.experimental import pallas as pl
from jax.experimental.pallas import tpu as pltpu

NEG_INF = float("-inf")


# ---------------------------------------------------------------------------
# Helpers
# ---------------------------------------------------------------------------
def _round8(v):
    return ((v + 7) // 8) * 8


def _cascade_windows(ks):
    """Express stride-1 max pools of sizes ks as a cascade of smaller pools.

    (5, 9, 13) -> (5, 5, 5): pool9 = pool5 o pool5, pool13 = pool5^3 (exact
    for max pooling with -inf padding)."""
    wins = []
    prev = 1
    for k in ks:
        w = k - prev + 1
        if w < 1 or w % 2 == 0:
            raise ValueError(f"kernel sizes {ks} cannot be expressed as a pool cascade")
        wins.append(w)
        prev = k
    return tuple(wins)


def _slide_max(v, k):
    """Valid (no-pad) separable k x k sliding max, stride 1. Shrinks dims 0,1 by k-1."""
    h = v.shape[0] - (k - 1)
    w = v.shape[1] - (k - 1)
    t = v[0:h, :, :]
    for d in range(1, k):
        t = jnp.maximum(t, v[d:d + h, :, :])
    u = t[:, 0:w, :]
    for d in range(1, k):
        u = jnp.maximum(u, t[:, d:d + w, :])
    return u


def _choose_tile_h(H, W, c_, c2, pad, pool_itemsize, budget_bytes=12 << 20):
    """Pick a row-tile height TH dividing H.

    Prefer >= 2 tiles (megacore parallelism / small VMEM footprint) as long as
    TH >= pad (so the 2*pad halo recompute stays bounded); shrink further if
    the per-tile footprint exceeds `budget_bytes`."""
    pad_w = _round8(pad)

    def tile_bytes(th):
        f = th + 2 * pad
        wp = W + 2 * pad_w
        return (3 * f * wp * c_ * pool_itemsize   # pad scratch + cascade temps
                + f * W * c_ * 4                  # cv1 result (f32)
                + th * W * c2 * 4                 # f32 accumulator
                + 2 * th * W * c2 * 4)            # double-buffered out block

    divisors = [d for d in range(1, H + 1) if H % d == 0]
    cands = sorted([d for d in divisors if d != H and d >= pad], reverse=True) or [H]
    for th in cands:
        if tile_bytes(th) <= budget_bytes:
            return th
    return cands[-1]


# ---------------------------------------------------------------------------
# Fused SPP kernel (one (n, h) row-tile per grid step)
# ---------------------------------------------------------------------------
def _spp_kernel(x_ref, w1_ref, b1_ref, w2_ref, b2_ref, o_ref, pad_ref, *,
                TH, W, pad, pad_w, stage_ks, pool_dtype):
    # x_ref  : ((H + 2*pad) * W, C1)  H-padded image rows, VMEM-resident
    # w1_ref : (C1, C_)    b1_ref: (1, C_)
    # w2_ref : (4*C_, C2)  b2_ref: (1, C2)
    # o_ref  : (TH * W, C2)
    # pad_ref: (TH + 2*pad, W + 2*pad_w, C_)  pool-dtype scratch, -inf W border
    h = pl.program_id(1)
    n_h = pl.num_programs(1)
    C_ = w1_ref.shape[1]
    F = TH + 2 * pad
    w_dt = w2_ref.dtype

    # --- cv1 on TH + 2*pad rows (halo recomputed per tile), folded BN + act ---
    start = pl.multiple_of(h * (TH * W), TH * W)          # sublane-aligned (W%8==0)
    x_rows = x_ref[pl.ds(start, F * W), :].astype(w1_ref.dtype)
    y = jnp.dot(x_rows, w1_ref[...], preferred_element_type=jnp.float32)
    y = y + b1_ref[...]
    y = jnp.where(y >= 0.0, y, 0.1 * y)                   # (F*W, C_) f32

    # --- scratch: border-only -inf fill + interior store (aligned at pad_w) ---
    inf_col = jnp.full((F, pad_w, C_), NEG_INF, pool_dtype)
    pad_ref[:, 0:pad_w, :] = inf_col
    pad_ref[:, pad_w + W:pad_w + W + pad_w, :] = inf_col
    pad_ref[:, pad_w:pad_w + W, :] = y.reshape(F, W, C_).astype(pool_dtype)

    # out-of-image halo rows exist only on the first / last row tile
    inf_row = jnp.full((pad, W, C_), NEG_INF, pool_dtype)

    @pl.when(h == 0)
    def _():
        pad_ref[0:pad, pad_w:pad_w + W, :] = inf_row

    @pl.when(h == n_h - 1)
    def _():
        pad_ref[F - pad:F, pad_w:pad_w + W, :] = inf_row

    # --- cv2 accumulation: identity branch (rows [pad, pad+TH) of the tile) ---
    ident = y[pad * W:pad * W + TH * W, :]
    acc = jnp.dot(ident.astype(w_dt), w2_ref[0:C_, :],
                  preferred_element_type=jnp.float32)     # (TH*W, C2) f32

    # --- cascaded separable max pools; each branch feeds its w2 row-slice -----
    # MXU dots interleave with the VPU max passes (different VLIW slots).
    cur = pad_ref[...]                                    # (F, W + 2*pad_w, C_)
    off = 0
    for i, kw in enumerate(stage_ks):
        cur = _slide_max(cur, kw)
        off += kw // 2
        br = cur[pad - off:pad - off + TH, pad_w - off:pad_w - off + W, :]
        acc = acc + jnp.dot(br.reshape(TH * W, C_).astype(w_dt),
                            w2_ref[(i + 1) * C_:(i + 2) * C_, :],
                            preferred_element_type=jnp.float32)

    # --- cv2 epilogue: folded-BN shift + LeakyReLU(0.1) ---
    acc = acc + b2_ref[...]
    out = jnp.where(acc >= 0.0, acc, 0.1 * acc)
    o_ref[...] = out.astype(o_ref.dtype)


def spp_fused(x_nhwc, w1, b1, w2, b2, ks=(5, 9, 13), pool_dtype=None, tile_h=None):
    N, H, W, C1 = x_nhwc.shape
    C_ = w1.shape[1]
    C2 = w2.shape[1]
    assert w2.shape[0] == (len(ks) + 1) * C_
    if W % 8 != 0:
        # TODO(synk): pad W to a multiple of 8 in the wrapper for odd widths.
        raise ValueError("spp_fused requires W % 8 == 0 (sublane alignment)")

    stage_ks = _cascade_windows(ks)
    pad = sum(k // 2 for k in stage_ks)                   # == max(ks) // 2
    pad_w = _round8(pad)                                  # aligned left/right pad

    if pool_dtype is None:
        # bf16 pooling only when weights are bf16 (v6e/v7x); pass f32 on v5e.
        pool_dtype = jnp.bfloat16 if w2.dtype == jnp.dtype(jnp.bfloat16) else jnp.float32
    pool_dtype = jnp.dtype(pool_dtype)

    if tile_h is None:
        tile_h = _choose_tile_h(H, W, C_, C2, pad, pool_dtype.itemsize)
    TH = int(tile_h)
    assert H % TH == 0, (H, TH)
    T = H // TH
    F = TH + 2 * pad
    Wp = W + 2 * pad_w
    HpW = (H + 2 * pad) * W

    # One extra (cheap) HBM pass over x to add the H halo rows; x is the
    # smallest tensor in SPP.  Flattening to (N, rows*W, C) is a free metadata
    # reshape and keeps all in-kernel matmul operands 2-D and aligned.
    x_flat = jnp.pad(x_nhwc, ((0, 0), (pad, pad), (0, 0), (0, 0))).reshape(N, HpW, C1)

    xi = x_flat.dtype.itemsize
    wi = w2.dtype.itemsize
    oi = x_nhwc.dtype.itemsize
    n_weight_elems = C1 * C_ + C_ + (len(ks) + 1) * C_ * C2 + C2
    vmem_bytes = (
        2 * HpW * C1 * xi                       # resident padded image (dbl-buffered)
        + 2 * TH * W * C2 * oi                  # output block (dbl-buffered)
        + 2 * n_weight_elems * wi               # weights/biases (dbl-buffered)
        + 3 * F * Wp * C_ * pool_dtype.itemsize # pad scratch + cascade temporaries
        + F * W * C_ * 4                        # cv1 result (f32)
        + 2 * TH * W * C2 * 4                   # f32 accumulator (+slack)
    )
    vmem_limit = int(min(max(int(vmem_bytes * 1.5) + (2 << 20), 32 << 20), 96 << 20))

    flops = 2 * N * T * F * W * C1 * C_ + 2 * N * H * W * len(ks + (0,)) * C_ * C2
    bytes_accessed = (N * HpW * C1 * xi + N * H * W * C2 * oi + n_weight_elems * wi)

    kern = functools.partial(_spp_kernel, TH=TH, W=W, pad=pad, pad_w=pad_w,
                             stage_ks=stage_ks, pool_dtype=pool_dtype)
    out_flat = pl.pallas_call(
        kern,
        out_shape=jax.ShapeDtypeStruct((N, H * W, C2), x_nhwc.dtype),
        grid_spec=pltpu.PrefetchScalarGridSpec(
            num_scalar_prefetch=0,
            grid=(N, T),
            in_specs=[
                # padded image: resident across the h axis (index_map ignores h)
                pl.BlockSpec((None, HpW, C1), lambda n, h: (n, 0, 0)),
                pl.BlockSpec((C1, C_), lambda n, h: (0, 0)),
                pl.BlockSpec((1, C_), lambda n, h: (0, 0)),
                pl.BlockSpec(((len(ks) + 1) * C_, C2), lambda n, h: (0, 0)),
                pl.BlockSpec((1, C2), lambda n, h: (0, 0)),
            ],
            out_specs=pl.BlockSpec((None, TH * W, C2), lambda n, h: (n, h, 0)),
            scratch_shapes=[pltpu.VMEM((F, Wp, C_), pool_dtype)],
        ),
        compiler_params=pltpu.CompilerParams(
            dimension_semantics=("parallel", "parallel"),
            vmem_limit_bytes=vmem_limit,
        ),
        cost_estimate=pl.CostEstimate(flops=int(flops), transcendentals=0,
                                      bytes_accessed=int(bytes_accessed)),
    )(x_flat, w1, b1, w2, b2)
    return out_flat.reshape(N, H, W, C2)


# ---------------------------------------------------------------------------
# Forward wrappers and parameter setup
# ---------------------------------------------------------------------------
def spp_forward_nhwc(x_nhwc, folded, ks=(5, 9, 13), pool_dtype=None, tile_h=None):
    """Preferred entry point: NHWC end-to-end, no transposes."""
    return spp_fused(x_nhwc, folded["w1"], folded["b1"], folded["w2"], folded["b2"],
                     ks=ks, pool_dtype=pool_dtype, tile_h=tile_h)


def spp_forward(x_nchw, folded, ks=(5, 9, 13)):
    """NCHW interface mirroring the PyTorch module.  If the surrounding model
    is NHWC, drop these two transposes (each is a full HBM round trip)."""
    x = jnp.transpose(x_nchw, (0, 2, 3, 1))               # NCHW -> NHWC
    out = spp_forward_nhwc(x, folded, ks=ks)
    return jnp.transpose(out, (0, 3, 1, 2))               # NHWC -> NCHW


def make_params(key, c1, c2, ks=(5, 9, 13), eps=1e-5):
    c_ = c1 // 2
    cc = c_ * (len(ks) + 1)
    k1, k2, k3, k4 = jax.random.split(key, 4)
    # conv weights stored as (Cin, Cout) for the NHWC matmul formulation
    w1 = jax.random.normal(k1, (c1, c_), jnp.float32) / jnp.sqrt(float(c1))
    w2 = jax.random.normal(k2, (cc, c2), jnp.float32) / jnp.sqrt(float(cc))

    def bn_fold(k, c):
        kg, kb, km, kv = jax.random.split(k, 4)
        gamma = 1.0 + 0.1 * jax.random.normal(kg, (c,), jnp.float32)
        beta = 0.1 * jax.random.normal(kb, (c,), jnp.float32)
        mean = 0.1 * jax.random.normal(km, (c,), jnp.float32)
        var = jax.random.uniform(kv, (c,), jnp.float32, minval=0.5, maxval=1.5)
        scale = gamma / jnp.sqrt(var + eps)
        shift = beta - mean * scale
        return scale.reshape(1, c), shift.reshape(1, c)

    s1, b1 = bn_fold(k3, c_)
    s2, b2 = bn_fold(k4, c2)
    return dict(w1=w1, scale1=s1, shift1=b1, w2=w2, scale2=s2, shift2=b2)


def fold_bn_params(params):
    """Fold the BN scale into the conv weight columns (offline, exact)."""
    return dict(
        w1=params["w1"] * params["scale1"], b1=params["shift1"],
        w2=params["w2"] * params["scale2"], b2=params["shift2"],
    )


# ---------------------------------------------------------------------------
# Pure-JAX reference (literal module semantics: BN scale/shift, independent
# k=5/9/13 max pools, channel concat) for verification
# ---------------------------------------------------------------------------
def spp_reference(x_nchw, params, ks=(5, 9, 13)):
    x = jnp.transpose(x_nchw, (0, 2, 3, 1))

    def cba(z, w, s, b):
        y = jnp.einsum("nhwc,cd->nhwd", z, w)
        y = y * s.reshape(1, 1, 1, -1) + b.reshape(1, 1, 1, -1)
        return jnp.where(y >= 0.0, y, 0.1 * y)

    y = cba(x, params["w1"], params["scale1"], params["shift1"])
    pools = [y]
    for k in ks:
        p = k // 2
        pools.append(
            lax.reduce_window(
                y, -jnp.inf, lax.max,
                window_dimensions=(1, k, k, 1),
                window_strides=(1, 1, 1, 1),
                padding=[(0, 0), (p, p), (p, p), (0, 0)],
            )
        )
    cat = jnp.concatenate(pools, axis=-1)
    out = cba(cat, params["w2"], params["scale2"], params["shift2"])
    return jnp.transpose(out, (0, 3, 1, 2))


if __name__ == "__main__":
    key = jax.random.PRNGKey(0)
    kx, kp = jax.random.split(key)

    N, c1, H, W = 2, 4, 16, 16
    c2 = 8
    x = jax.random.normal(kx, (N, c1, H, W), jnp.float32)   # NCHW, like PyTorch
    params = make_params(kp, c1, c2)
    folded = fold_bn_params(params)

    fwd = jax.jit(spp_forward)
    out = jax.block_until_ready(fwd(x, folded))
    ref = jax.block_until_ready(spp_reference(x, params))

    assert out.shape == (N, c2, H, W), out.shape
    np.testing.assert_allclose(np.asarray(out), np.asarray(ref), rtol=1e-4, atol=1e-4)
    print("KERNEL_OK")
</pallas_src>

<mosaic_0001>
module attributes {stable_mosaic.version = 11 : i64} {
  func.func @_spp_kernel(%arg0: i32, %arg1: i32, %arg2: memref<1x448x4xf32, #tpu.memory_space<vmem>>, %arg3: memref<4x2xf32, #tpu.memory_space<vmem>>, %arg4: memref<1x2xf32, #tpu.memory_space<vmem>>, %arg5: memref<8x8xf32, #tpu.memory_space<vmem>>, %arg6: memref<1x8xf32, #tpu.memory_space<vmem>>, %arg7: memref<1x128x8xf32, #tpu.memory_space<vmem>>, %arg8: memref<20x32x2xf32, #tpu.memory_space<vmem>>) attributes {dimension_semantics = [#tpu.dimension_semantics<parallel>, #tpu.dimension_semantics<parallel>], iteration_bounds = array<i64: 2, 2>, scalar_prefetch = 0 : i64, scratch_operands = 1 : i64, tpu.core_type = #tpu.core_type<tc>, window_params = [{transform_indices = @transform_0, window_bounds = array<i64: 1, 448, 4>}, {pipeline_mode = #tpu.pipeline_mode<synchronous>, transform_indices = @transform_1, window_bounds = array<i64: 4, 2>}, {pipeline_mode = #tpu.pipeline_mode<synchronous>, transform_indices = @transform_2, window_bounds = array<i64: 1, 2>}, {pipeline_mode = #tpu.pipeline_mode<synchronous>, transform_indices = @transform_3, window_bounds = array<i64: 8, 8>}, {pipeline_mode = #tpu.pipeline_mode<synchronous>, transform_indices = @transform_4, window_bounds = array<i64: 1, 8>}, {transform_indices = @transform_5, window_bounds = array<i64: 1, 128, 8>}]} {
    %c128_i32 = arith.constant 128 : i32
    %0 = arith.muli %arg1, %c128_i32 : i32
    %1 = tpu.assume_multiple %0, 128 : i32
    %c0 = arith.constant 0 : index
    %2 = arith.index_cast %1 : i32 to index
    %c0_0 = arith.constant 0 : index
    %3 = vector.load %arg2[%c0, %2, %c0_0] : memref<1x448x4xf32, #tpu.memory_space<vmem>>, vector<1x320x4xf32>
    %4 = vector.shape_cast %3 : vector<1x320x4xf32> to vector<320x4xf32>
    %c0_1 = arith.constant 0 : index
    %c0_2 = arith.constant 0 : index
    %5 = vector.load %arg3[%c0_1, %c0_2] : memref<4x2xf32, #tpu.memory_space<vmem>>, vector<4x2xf32>
    %cst = arith.constant dense<0.000000e+00> : vector<320x2xf32>
    %6 = tpu.matmul %4, %5, %cst {dimension_numbers = #tpu.dot_dimension_numbers<[1], [0], [0], [1], [0, 0, 1, 1], [], []>} : vector<320x4xf32>, vector<4x2xf32>, vector<320x2xf32> -> vector<320x2xf32>
    %c0_3 = arith.constant 0 : index
    %c0_4 = arith.constant 0 : index
    %7 = vector.load %arg4[%c0_3, %c0_4] : memref<1x2xf32, #tpu.memory_space<vmem>>, vector<1x2xf32>
    %8 = vector.broadcast %7 : vector<1x2xf32> to vector<320x2xf32>
    %9 = arith.addf %6, %8 : vector<320x2xf32>
    %cst_5 = arith.constant 0.000000e+00 : f32
    %10 = vector.broadcast %cst_5 : f32 to vector<320x2xf32>
    %11 = arith.cmpf oge, %9, %10 : vector<320x2xf32>
    %cst_6 = arith.constant 1.000000e-01 : f32
    %12 = vector.broadcast %cst_6 : f32 to vector<320x2xf32>
    %13 = arith.mulf %12, %9 : vector<320x2xf32>
    %14 = arith.select %11, %9, %13 : vector<320x2xi1>, vector<320x2xf32>
    %cst_7 = arith.constant 0xFF800000 : f32
    %15 = vector.broadcast %cst_7 : f32 to vector<20x8x2xf32>
    %c0_8 = arith.constant 0 : index
    %c0_9 = arith.constant 0 : index
    %c0_10 = arith.constant 0 : index
    %16 = vector.load %arg8[%c0_8, %c0_9, %c0_10] : memref<20x32x2xf32, #tpu.memory_space<vmem>>, vector<20x8x2xf32>
    tpu.vector_store %arg8[%c0_8, %c0_9, %c0_10], %15 {strides = array<i32>} : memref<20x32x2xf32, #tpu.memory_space<vmem>>, vector<20x8x2xf32>,
    %c0_11 = arith.constant 0 : index
    %c24 = arith.constant 24 : index
    %c0_12 = arith.constant 0 : index
    %17 = vector.load %arg8[%c0_11, %c24, %c0_12] : memref<20x32x2xf32, #tpu.memory_space<vmem>>, vector<20x8x2xf32>
    tpu.vector_store %arg8[%c0_11, %c24, %c0_12], %15 {strides = array<i32>} : memref<20x32x2xf32, #tpu.memory_space<vmem>>, vector<20x8x2xf32>,
    %18 = vector.shape_cast %14 : vector<320x2xf32> to vector<20x16x2xf32>
    %c0_13 = arith.constant 0 : index
    %c8 = arith.constant 8 : index
    %c0_14 = arith.constant 0 : index
    %19 = vector.load %arg8[%c0_13, %c8, %c0_14] : memref<20x32x2xf32, #tpu.memory_space<vmem>>, vector<20x16x2xf32>
    tpu.vector_store %arg8[%c0_13, %c8, %c0_14], %18 {strides = array<i32>} : memref<20x32x2xf32, #tpu.memory_space<vmem>>, vector<20x16x2xf32>,
    %cst_15 = arith.constant 0xFF800000 : f32
    %20 = vector.broadcast %cst_15 : f32 to vector<6x16x2xf32>
    %c0_i32 = arith.constant 0 : i32
    %21 = arith.cmpi eq, %arg1, %c0_i32 : i32
    %22 = arith.extui %21 : i1 to i32
    %c0_i32_16 = arith.constant 0 : i32
    %23 = arith.cmpi ne, %22, %c0_i32_16 : i32
    scf.if %23 {
      %c0_37 = arith.constant 0 : index
      %c8_38 = arith.constant 8 : index
      %c0_39 = arith.constant 0 : index
      %111 = vector.load %arg8[%c0_37, %c8_38, %c0_39] : memref<20x32x2xf32, #tpu.memory_space<vmem>>, vector<6x16x2xf32>
      tpu.vector_store %arg8[%c0_37, %c8_38, %c0_39], %20 {strides = array<i32>} : memref<20x32x2xf32, #tpu.memory_space<vmem>>, vector<6x16x2xf32>,
    } else {
    }
    %c1_i32 = arith.constant 1 : i32
    %24 = arith.cmpi eq, %arg1, %c1_i32 : i32
    %25 = arith.extui %24 : i1 to i32
    %c0_i32_17 = arith.constant 0 : i32
    %26 = arith.cmpi ne, %25, %c0_i32_17 : i32
    scf.if %26 {
      %c14 = arith.constant 14 : index
      %c8_37 = arith.constant 8 : index
      %c0_38 = arith.constant 0 : index
      %111 = vector.load %arg8[%c14, %c8_37, %c0_38] : memref<20x32x2xf32, #tpu.memory_space<vmem>>, vector<6x16x2xf32>
      tpu.vector_store %arg8[%c14, %c8_37, %c0_38], %20 {strides = array<i32>} : memref<20x32x2xf32, #tpu.memory_space<vmem>>, vector<6x16x2xf32>,
    } else {
    }
    %27 = vector.extract_strided_slice %14 {offsets = [96, 0], sizes = [128, 2], strides = [1, 1]} : vector<320x2xf32> to vector<128x2xf32>
    %c0_18 = arith.constant 0 : index
    %c0_19 = arith.constant 0 : index
    %28 = vector.load %arg5[%c0_18, %c0_19] : memref<8x8xf32, #tpu.memory_space<vmem>>, vector<2x8xf32>
    %cst_20 = arith.constant dense<0.000000e+00> : vector<128x8xf32>
    %29 = tpu.matmul %27, %28, %cst_20 {dimension_numbers = #tpu.dot_dimension_numbers<[1], [0], [0], [1], [0, 0, 1, 1], [], []>} : vector<128x2xf32>, vector<2x8xf32>, vector<128x8xf32> -> vector<128x8xf32>
    %c0_21 = arith.constant 0 : index
    %c0_22 = arith.constant 0 : index
    %c0_23 = arith.constant 0 : index
    %30 = vector.load %arg8[%c0_21, %c0_22, %c0_23] : memref<20x32x2xf32, #tpu.memory_space<vmem>>, vector<20x32x2xf32>
    %31 = vector.extract_strided_slice %30 {offsets = [0, 0, 0], sizes = [16, 32, 2], strides = [1, 1, 1]} : vector<20x32x2xf32> to vector<16x32x2xf32>
    %32 = vector.extract_strided_slice %30 {offsets = [1, 0, 0], sizes = [16, 32, 2], strides = [1, 1, 1]} : vector<20x32x2xf32> to vector<16x32x2xf32>
    %33 = arith.maximumf %31, %32 : vector<16x32x2xf32>
    %34 = vector.extract_strided_slice %30 {offsets = [2, 0, 0], sizes = [16, 32, 2], strides = [1, 1, 1]} : vector<20x32x2xf32> to vector<16x32x2xf32>
    %35 = arith.maximumf %33, %34 : vector<16x32x2xf32>
    %36 = vector.extract_strided_slice %30 {offsets = [3, 0, 0], sizes = [16, 32, 2], strides = [1, 1, 1]} : vector<20x32x2xf32> to vector<16x32x2xf32>
    %37 = arith.maximumf %35, %36 : vector<16x32x2xf32>
    %38 = vector.extract_strided_slice %30 {offsets = [4, 0, 0], sizes = [16, 32, 2], strides = [1, 1, 1]} : vector<20x32x2xf32> to vector<16x32x2xf32>
    %39 = arith.maximumf %37, %38 : vector<16x32x2xf32>
    %40 = vector.extract_strided_slice %39 {offsets = [0, 0, 0], sizes = [16, 28, 2], strides = [1, 1, 1]} : vector<16x32x2xf32> to vector<16x28x2xf32>
    %41 = vector.extract_strided_slice %39 {offsets = [0, 1, 0], sizes = [16, 28, 2], strides = [1, 1, 1]} : vector<16x32x2xf32> to vector<16x28x2xf32>
    %42 = arith.maximumf %40, %41 : vector<16x28x2xf32>
    %43 = vector.extract_strided_slice %39 {offsets = [0, 2, 0], sizes = [16, 28, 2], strides = [1, 1, 1]} : vector<16x32x2xf32> to vector<16x28x2xf32>
    %44 = arith.maximumf %42, %43 : vector<16x28x2xf32>
    %45 = vector.extract_strided_slice %39 {offsets = [0, 3, 0], sizes = [16, 28, 2], strides = [1, 1, 1]} : vector<16x32x2xf32> to vector<16x28x2xf32>
    %46 = arith.maximumf %44, %45 : vector<16x28x2xf32>
    %47 = vector.extract_strided_slice %39 {offsets = [0, 4, 0], sizes = [16, 28, 2], strides = [1, 1, 1]} : vector<16x32x2xf32> to vector<16x28x2xf32>
    %48 = arith.maximumf %46, %47 : vector<16x28x2xf32>
    %49 = vector.extract_strided_slice %48 {offsets = [4, 6, 0], sizes = [8, 16, 2], strides = [1, 1, 1]} : vector<16x28x2xf32> to vector<8x16x2xf32>
    %50 = vector.shape_cast %49 : vector<8x16x2xf32> to vector<128x2xf32>
    %c2 = arith.constant 2 : index
    %c0_24 = arith.constant 0 : index
    %51 = vector.load %arg5[%c2, %c0_24] : memref<8x8xf32, #tpu.memory_space<vmem>>, vector<2x8xf32>
    %cst_25 = arith.constant dense<0.000000e+00> : vector<128x8xf32>
    %52 = tpu.matmul %50, %51, %cst_25 {dimension_numbers = #tpu.dot_dimension_numbers<[1], [0], [0], [1], [0, 0, 1, 1], [], []>} : vector<128x2xf32>, vector<2x8xf32>, vector<128x8xf32> -> vector<128x8xf32>
    %53 = arith.addf %29, %52 : vector<128x8xf32>
    %54 = vector.extract_strided_slice %48 {offsets = [0, 0, 0], sizes = [12, 28, 2], strides = [1, 1, 1]} : vector<16x28x2xf32> to vector<12x28x2xf32>
    %55 = vector.extract_strided_slice %48 {offsets = [1, 0, 0], sizes = [12, 28, 2], strides = [1, 1, 1]} : vector<16x28x2xf32> to vector<12x28x2xf32>
    %56 = arith.maximumf %54, %55 : vector<12x28x2xf32>
    %57 = vector.extract_strided_slice %48 {offsets = [2, 0, 0], sizes = [12, 28, 2], strides = [1, 1, 1]} : vector<16x28x2xf32> to vector<12x28x2xf32>
    %58 = arith.maximumf %56, %57 : vector<12x28x2xf32>
    %59 = vector.extract_strided_slice %48 {offsets = [3, 0, 0], sizes = [12, 28, 2], strides = [1, 1, 1]} : vector<16x28x2xf32> to vector<12x28x2xf32>
    %60 = arith.maximumf %58, %59 : vector<12x28x2xf32>
    %61 = vector.extract_strided_slice %48 {offsets = [4, 0, 0], sizes = [12, 28, 2], strides = [1, 1, 1]} : vector<16x28x2xf32> to vector<12x28x2xf32>
    %62 = arith.maximumf %60, %61 : vector<12x28x2xf32>
    %63 = vector.extract_strided_slice %62 {offsets = [0, 0, 0], sizes = [12, 24, 2], strides = [1, 1, 1]} : vector<12x28x2xf32> to vector<12x24x2xf32>
    %64 = vector.extract_strided_slice %62 {offsets = [0, 1, 0], sizes = [12, 24, 2], strides = [1, 1, 1]} : vector<12x28x2xf32> to vector<12x24x2xf32>
    %65 = arith.maximumf %63, %64 : vector<12x24x2xf32>
    %66 = vector.extract_strided_slice %62 {offsets = [0, 2, 0], sizes = [12, 24, 2], strides = [1, 1, 1]} : vector<12x28x2xf32> to vector<12x24x2xf32>
    %67 = arith.maximumf %65, %66 : vector<12x24x2xf32>
    %68 = vector.extract_strided_slice %62 {offsets = [0, 3, 0], sizes = [12, 24, 2], strides = [1, 1, 1]} : vector<12x28x2xf32> to vector<12x24x2xf32>
    %69 = arith.maximumf %67, %68 : vector<12x24x2xf32>
    %70 = vector.extract_strided_slice %62 {offsets = [0, 4, 0], sizes = [12, 24, 2], strides = [1, 1, 1]} : vector<12x28x2xf32> to vector<12x24x2xf32>
    %71 = arith.maximumf %69, %70 : vector<12x24x2xf32>
    %72 = vector.extract_strided_slice %71 {offsets = [2, 4, 0], sizes = [8, 16, 2], strides = [1, 1, 1]} : vector<12x24x2xf32> to vector<8x16x2xf32>
    %73 = vector.shape_cast %72 : vector<8x16x2xf32> to vector<128x2xf32>
    %c4 = arith.constant 4 : index
    %c0_26 = arith.constant 0 : index
    %74 = vector.load %arg5[%c4, %c0_26] : memref<8x8xf32, #tpu.memory_space<vmem>>, vector<2x8xf32>
    %cst_27 = arith.constant dense<0.000000e+00> : vector<128x8xf32>
    %75 = tpu.matmul %73, %74, %cst_27 {dimension_numbers = #tpu.dot_dimension_numbers<[1], [0], [0], [1], [0, 0, 1, 1], [], []>} : vector<128x2xf32>, vector<2x8xf32>, vector<128x8xf32> -> vector<128x8xf32>
    %76 = arith.addf %53, %75 : vector<128x8xf32>
    %77 = vector.extract_strided_slice %71 {offsets = [0, 0, 0], sizes = [8, 24, 2], strides = [1, 1, 1]} : vector<12x24x2xf32> to vector<8x24x2xf32>
    %78 = vector.extract_strided_slice %71 {offsets = [1, 0, 0], sizes = [8, 24, 2], strides = [1, 1, 1]} : vector<12x24x2xf32> to vector<8x24x2xf32>
    %79 = arith.maximumf %77, %78 : vector<8x24x2xf32>
    %80 = vector.extract_strided_slice %71 {offsets = [2, 0, 0], sizes = [8, 24, 2], strides = [1, 1, 1]} : vector<12x24x2xf32> to vector<8x24x2xf32>
    %81 = arith.maximumf %79, %80 : vector<8x24x2xf32>
    %82 = vector.extract_strided_slice %71 {offsets = [3, 0, 0], sizes = [8, 24, 2], strides = [1, 1, 1]} : vector<12x24x2xf32> to vector<8x24x2xf32>
    %83 = arith.maximumf %81, %82 : vector<8x24x2xf32>
    %84 = vector.extract_strided_slice %71 {offsets = [4, 0, 0], sizes = [8, 24, 2], strides = [1, 1, 1]} : vector<12x24x2xf32> to vector<8x24x2xf32>
    %85 = arith.maximumf %83, %84 : vector<8x24x2xf32>
    %86 = vector.extract_strided_slice %85 {offsets = [0, 0, 0], sizes = [8, 20, 2], strides = [1, 1, 1]} : vector<8x24x2xf32> to vector<8x20x2xf32>
    %87 = vector.extract_strided_slice %85 {offsets = [0, 1, 0], sizes = [8, 20, 2], strides = [1, 1, 1]} : vector<8x24x2xf32> to vector<8x20x2xf32>
    %88 = arith.maximumf %86, %87 : vector<8x20x2xf32>
    %89 = vector.extract_strided_slice %85 {offsets = [0, 2, 0], sizes = [8, 20, 2], strides = [1, 1, 1]} : vector<8x24x2xf32> to vector<8x20x2xf32>
    %90 = arith.maximumf %88, %89 : vector<8x20x2xf32>
    %91 = vector.extract_strided_slice %85 {offsets = [0, 3, 0], sizes = [8, 20, 2], strides = [1, 1, 1]} : vector<8x24x2xf32> to vector<8x20x2xf32>
    %92 = arith.maximumf %90, %91 : vector<8x20x2xf32>
    %93 = vector.extract_strided_slice %85 {offsets = [0, 4, 0], sizes = [8, 20, 2], strides = [1, 1, 1]} : vector<8x24x2xf32> to vector<8x20x2xf32>
    %94 = arith.maximumf %92, %93 : vector<8x20x2xf32>
    %95 = vector.extract_strided_slice %94 {offsets = [0, 2, 0], sizes = [8, 16, 2], strides = [1, 1, 1]} : vector<8x20x2xf32> to vector<8x16x2xf32>
    %96 = vector.shape_cast %95 : vector<8x16x2xf32> to vector<128x2xf32>
    %c6 = arith.constant 6 : index
    %c0_28 = arith.constant 0 : index
    %97 = vector.load %arg5[%c6, %c0_28] : memref<8x8xf32, #tpu.memory_space<vmem>>, vector<2x8xf32>
    %cst_29 = arith.constant dense<0.000000e+00> : vector<128x8xf32>
    %98 = tpu.matmul %96, %97, %cst_29 {dimension_numbers = #tpu.dot_dimension_numbers<[1], [0], [0], [1], [0, 0, 1, 1], [], []>} : vector<128x2xf32>, vector<2x8xf32>, vector<128x8xf32> -> vector<128x8xf32>
    %99 = arith.addf %76, %98 : vector<128x8xf32>
    %c0_30 = arith.constant 0 : index
    %c0_31 = arith.constant 0 : index
    %100 = vector.load %arg6[%c0_30, %c0_31] : memref<1x8xf32, #tpu.memory_space<vmem>>, vector<1x8xf32>
    %101 = vector.broadcast %100 : vector<1x8xf32> to vector<128x8xf32>
    %102 = arith.addf %99, %101 : vector<128x8xf32>
    %cst_32 = arith.constant 0.000000e+00 : f32
    %103 = vector.broadcast %cst_32 : f32 to vector<128x8xf32>
    %104 = arith.cmpf oge, %102, %103 : vector<128x8xf32>
    %cst_33 = arith.constant 1.000000e-01 : f32
    %105 = vector.broadcast %cst_33 : f32 to vector<128x8xf32>
    %106 = arith.mulf %105, %102 : vector<128x8xf32>
    %107 = arith.select %104, %102, %106 : vector<128x8xi1>, vector<128x8xf32>
    %c0_34 = arith.constant 0 : index
    %c0_35 = arith.constant 0 : index
    %c0_36 = arith.constant 0 : index
    %108 = vector.load %arg7[%c0_34, %c0_35, %c0_36] : memref<1x128x8xf32, #tpu.memory_space<vmem>>, vector<1x128x8xf32>
    %109 = vector.shape_cast %108 : vector<1x128x8xf32> to vector<128x8xf32>
    %110 = vector.shape_cast %107 : vector<128x8xf32> to vector<1x128x8xf32>
    tpu.vector_store %arg7[%c0_34, %c0_35, %c0_36], %110 {strides = array<i32>} : memref<1x128x8xf32, #tpu.memory_space<vmem>>, vector<1x128x8xf32>,
    return
  }
  func.func @transform_0(%arg0: i32, %arg1: i32) -> (i32, i32, i32) {
    %c0_i32 = arith.constant 0 : i32
    %c0_i32_0 = arith.constant 0 : i32
    %c0_i32_1 = arith.constant 0 : i32
    return %arg0, %c0_i32, %c0_i32_0 : i32, i32, i32
  }
  func.func @transform_1(%arg0: i32, %arg1: i32) -> (i32, i32) {
    %c0_i32 = arith.constant 0 : i32
    %c0_i32_0 = arith.constant 0 : i32
    %c0_i32_1 = arith.constant 0 : i32
    return %c0_i32, %c0_i32_0 : i32, i32
  }
  func.func @transform_2(%arg0: i32, %arg1: i32) -> (i32, i32) {
    %c0_i32 = arith.constant 0 : i32
    %c0_i32_0 = arith.constant 0 : i32
    %c0_i32_1 = arith.constant 0 : i32
    return %c0_i32, %c0_i32_0 : i32, i32
  }
  func.func @transform_3(%arg0: i32, %arg1: i32) -> (i32, i32) {
    %c0_i32 = arith.constant 0 : i32
    %c0_i32_0 = arith.constant 0 : i32
    %c0_i32_1 = arith.constant 0 : i32
    return %c0_i32, %c0_i32_0 : i32, i32
  }
  func.func @transform_4(%arg0: i32, %arg1: i32) -> (i32, i32) {
    %c0_i32 = arith.constant 0 : i32
    %c0_i32_0 = arith.constant 0 : i32
    %c0_i32_1 = arith.constant 0 : i32
    return %c0_i32, %c0_i32_0 : i32, i32
  }
  func.func @transform_5(%arg0: i32, %arg1: i32) -> (i32, i32, i32) {
    %c0_i32 = arith.constant 0 : i32
    %c0_i32_0 = arith.constant 0 : i32
    return %arg0, %arg1, %c0_i32 : i32, i32, i32
  }
}

</mosaic_0001>

<bundles_post_ra>
// kernel: spp_forward.1
= control target key start
LH: loop header
LB: loop body
LE: loop exit
PB: predicated region body
PF: predicated region fallthrough
CT: control target
= control target key end

     0   :  { %s4585_s18 = smov 0   ;;  %s4587_s19 = smov 0   ;;  %s7604_s0 = inlined_call_operand.vmem [shape: f32[2,448,4], index: 0, kind: input, shape index: {}]   ;;  %s7605_s1 = inlined_call_operand.vmem [shape: f32[4,2], index: 1, kind: input, shape index: {}]   ;;  %s7606_s2 = inlined_call_operand.vmem [shape: f32[1,2], index: 2, kind: input, shape index: {}]   ;;  %s7607_s3 = inlined_call_operand.vmem [shape: f32[8,8], index: 3, kind: input, shape index: {}]   ;;  %s7608_s4 = inlined_call_operand.vmem [shape: f32[1,8], index: 4, kind: input, shape index: {}]   ;;  %s7609_s5 = inlined_call_operand.vmem [shape: f32[2,256,8], index: 5, kind: output, shape index: {}]  }
   0x1   :  { %s4589_s20 = smov 0   ;;  %s4591_s21 = smov 0  }
   0x2   :  { %s4593_s22 = smov 0  }
   0x3 LB: > { %s24_s23 = sadd.s32 1, %s4542_s20  ;;  %s27_s24 = sadd.s32 1, %s4546_s21  ;;  %s4550_s22 = sphi %s4593_s22, %s15_s22   ;;  %s4546_s21 = sphi %s4591_s21, %s8045_s21   ;;  %s4542_s20 = sphi %s4589_s20, %s8044_s20   ;;  %s4538_s19 = sphi %s4587_s19, %s8043_s19   ;;  %s4534_s18 = sphi %s4585_s18, %s8042_s18  }
   0x4   : > { %p25_p0 = scmp.ge.s32.totalorder %s24_s23, 2  ;;  %p4310_p1 = scmp.ge.s32.totalorder %s4550_s22, 1 }
   0x5   : > { %p201_p2 = scmp.lt.s32.totalorder %s4550_s22, 5 }
   0x6   : > { %s8047_s23 = smov (%p25_p0, %s24_s23), 0  ;;  %s8049_s24 = smov (!%p25_p0, %s27_s24), %s4546_s21 }
   0x7   : > { %p202_p3 = pnand %p4310_p1, %p201_p2  ;;  %p29_p4 = scmp.ge.s32.totalorder %s8049_s24, 2 }
   0x9   : > { %s8051_s24 = smov (%p29_p4, %s8049_s24), 0  ;;  %205 = sbr.rel (%p202_p3) target bundleno = 1088 (0x440), region = 40 }
   0xe   : > { %v290_v0 = vld [vmem:[%s7605_s1] sm:$0xf]  ;;  %vm416_vm0 = vcmask 1043456   ;;  %p233_p5 = scmp.lt.s32.totalorder %s4538_s19, 1  ;;  %s4312_s27 = sshll.u32 %s4534_s18, 4  ;;  %vm295_vm1 = vcmask 31744  }
   0xf   : > { %4316 = vmatpush.msk.msra.mxu0 %vm416_vm0, %v290_v0  ;;  %p241_p6 = scmp.lt.s32.totalorder %s4312_s27, 31  ;;  %s4315_s28 = sshll.u32 %s4534_s18, 7  ;;  %4429 = vmatpush.msk.msra.mxu2 %vm416_vm0, %v290_v0  ;;  %v4680_v22 = vld [vmem:[%s7606_s2] ss:$0 sm:$0xff]  ;;  %vm677_vm3 = vcmask 15360  }
  0x10   : > { %s8053_s19 = smov (!%p233_p5, %s4538_s19), 1  ;;  %4430 = vmatpush.msk.msra.mxu3 %vm416_vm0, %v290_v0  ;;  %p4357_p7 = scmp.ne.s32.totalorder %s4534_s18, 0 }
  0x11   : > { %s8055_s27 = smov (!%p241_p6, %s4312_s27), 31  ;;  %s4432_s29 = smul.u32 448, %s8053_s19 }
  0x12   : > { %s4313_s30 = sshll.u32 %s8053_s19, 5 }
  0x13   : > { %s244_s6 = sadd.s32 %s4313_s30, %s8055_s27  ;;  %s237_s9 = scalar_lea.vmem %s7604_s0, %s4432_s29 }
  0x14   : > { %s4314_s10 = sshll.u32 %s244_s6, 3  ;;  %s4633_s14 = scalar_lea.vmem %s237_s9, %s4315_s28 }
  0x15   : > { %s4631_s13 = scalar_lea.vmem %s7609_s5, %s4314_s10  ;;  %v250_v1 = vld [vmem:[%s4633_s14] sm:$0xff]  ;;  %v251_v2 = vld [vmem:[%s4633_s14 + $0x8] sm:$0xff]  ;;  %v252_v3 = vld [vmem:[%s4633_s14 + $0x10] sm:$0xff] }
  0x16   : > { %4317 = vmatmul.msk.f32.vlgmr.msra.gmra.mxu0 %vm295_vm1, %v250_v1  ;;  %v253_v4 = vld [vmem:[%s4633_s14 + $0x18] sm:$0xff]  ;;  %v254_v5 = vld [vmem:[%s4633_s14 + $0x20] sm:$0xff]  ;;  %v255_v6 = vld [vmem:[%s4633_s14 + $0x28] sm:$0xff] }
  0x17   : > { %v256_v7 = vld [vmem:[%s4633_s14 + $0x30] sm:$0xff]  ;;  %v257_v8 = vld [vmem:[%s4633_s14 + $0x38] sm:$0xff]  ;;  %v258_v9 = vld [vmem:[%s4633_s14 + $0x40] sm:$0xff] }
  0x18   : > { %v259_v10 = vld [vmem:[%s4633_s14 + $0x48] sm:$0xff]  ;;  %v260_v11 = vld [vmem:[%s4633_s14 + $0x50] sm:$0xff]  ;;  %v261_v12 = vld [vmem:[%s4633_s14 + $0x58] sm:$0xff] }
  0x19   : > { %v276_v13 = vld [vmem:[%s4633_s14 + $0xd0] sm:$0xff]  ;;  %v262_v14 = vld [vmem:[%s4633_s14 + $0x60] sm:$0xff]  ;;  %v277_v15 = vld [vmem:[%s4633_s14 + $0xd8] sm:$0xff] }
  0x1a   : > { %4343 = vmatmul.msk.f32.vlgmr.msra.gmra.mxu2 %vm295_vm1, %v276_v13  ;;  %v263_v16 = vld [vmem:[%s4633_s14 + $0x68] sm:$0xff]  ;;  %v278_v17 = vld [vmem:[%s4633_s14 + $0xe0] sm:$0xff]  ;;  %v264_v18 = vld [vmem:[%s4633_s14 + $0x70] sm:$0xff] }
  0x1b   : > { %v279_v19 = vld [vmem:[%s4633_s14 + $0xe8] sm:$0xff]  ;;  %v265_v20 = vld [vmem:[%s4633_s14 + $0x78] sm:$0xff]  ;;  %v280_v21 = vld [vmem:[%s4633_s14 + $0xf0] sm:$0xff] }
  0x1c   : > { %v266_v24 = vld [vmem:[%s4633_s14 + $0x80] sm:$0xff]  ;;  %v281_v26 = vld [vmem:[%s4633_s14 + $0xf8] sm:$0xff]  ;;  %v267_v30 = vld [vmem:[%s4633_s14 + $0x88] sm:$0xff] }
  0x1d   : > { %v282_v32 = vld [vmem:[%s4633_s14 + $0x100] sm:$0xff]  ;;  %v268_v37 = vld [vmem:[%s4633_s14 + $0x90] sm:$0xff]  ;;  %v283_v39 = vld [vmem:[%s4633_s14 + $0x108] sm:$0xff] }
  0x1e   : > { %4318 = vmatmul.msk.f32.gmra.mxu0 %vm295_vm1, %v251_v2  ;;  %v286_v33 = vld [vmem:[%s4633_s14 + $0x120] sm:$0xff]  ;;  %v287_v40 = vld [vmem:[%s4633_s14 + $0x128] sm:$0xff]  ;;  %v269_v44 = vld [vmem:[%s4633_s14 + $0x98] sm:$0xff] }
  0x1f   : > { %4353 = vmatmul.msk.f32.vlgmr.msra.gmra.mxu3 %vm295_vm1, %v286_v33  ;;  %v284_v46 = vld [vmem:[%s4633_s14 + $0x110] sm:$0xff]  ;;  %v270_v51 = vld [vmem:[%s4633_s14 + $0xa0] sm:$0xff]  ;;  %v285_v53 = vld [vmem:[%s4633_s14 + $0x118] sm:$0xff] }
  0x20   : > { %v288_v47 = vld [vmem:[%s4633_s14 + $0x130] sm:$0xff]  ;;  %v289_v54 = vld [vmem:[%s4633_s14 + $0x138] sm:$0xff]  ;;  %v271_v58 = vld [vmem:[%s4633_s14 + $0xa8] sm:$0xff] }
  0x21   : > { %v272_v63 = vld [vmem:[%s4633_s14 + $0xb0] sm:$0xff] }
  0x22   : > { %4344 = vmatmul.msk.f32.gmra.mxu2 %vm295_vm1, %v277_v15 }
  0x26   : > { %4319 = vmatmul.msk.f32.gmra.mxu0 %vm295_vm1, %v252_v3 }
  0x27   : > { %4354 = vmatmul.msk.f32.gmra.mxu3 %vm295_vm1, %v287_v40 }
  0x2a   : > { %4345 = vmatmul.msk.f32.gmra.mxu2 %vm295_vm1, %v278_v17 }
  0x2e   : > { %4320 = vmatmul.msk.f32.gmra.mxu0 %vm295_vm1, %v253_v4  ;;  %v273_v4 = vld [vmem:[%s4633_s14 + $0xb8] sm:$0xff] }
  0x2f   : > { %4355 = vmatmul.msk.f32.gmra.mxu3 %vm295_vm1, %v288_v47 }
  0x32   : > { %4346 = vmatmul.msk.f32.gmra.mxu2 %vm295_vm1, %v279_v19 }
  0x36   : > { %4321 = vmatmul.msk.f32.gmra.mxu0 %vm295_vm1, %v254_v5 }
  0x37   : > { %4356 = vmatmul.msk.f32.gmra.mxu3 %vm295_vm1, %v289_v54 }
  0x3a   : > { %4347 = vmatmul.msk.f32.gmra.mxu2 %vm295_vm1, %v280_v21 }
  0x3e   : > { %4322 = vmatmul.msk.f32.gmra.mxu0 %vm295_vm1, %v255_v6 }
  0x42   : > { %4348 = vmatmul.msk.f32.gmra.mxu2 %vm295_vm1, %v281_v26 }
  0x46   : > { %4323 = vmatmul.msk.f32.gmra.mxu0 %vm295_vm1, %v256_v7 }
  0x4a   : > { %4349 = vmatmul.msk.f32.gmra.mxu2 %vm295_vm1, %v282_v32 }
  0x4e   : > { %4324 = vmatmul.msk.f32.gmra.mxu0 %vm295_vm1, %v257_v8 }
  0x52   : > { %4350 = vmatmul.msk.f32.gmra.mxu2 %vm295_vm1, %v283_v39 }
  0x56   : > { %4325 = vmatmul.msk.f32.gmra.mxu0 %vm295_vm1, %v258_v9  ;;  %v274_v9 = vld [vmem:[%s4633_s14 + $0xc0] sm:$0xff] }
  0x5a   : > { %4351 = vmatmul.msk.f32.gmra.mxu2 %vm295_vm1, %v284_v46 }
  0x5e   : > { %4326 = vmatmul.msk.f32.gmra.mxu0 %vm295_vm1, %v259_v10 }
  0x62   : > { %4352 = vmatmul.msk.f32.gmra.mxu2 %vm295_vm1, %v285_v53 }
  0x66   : > { %4327 = vmatmul.msk.f32.gmra.mxu0 %vm295_vm1, %v260_v11 }
  0x6e   : > { %4328 = vmatmul.msk.f32.gmra.mxu0 %vm295_vm1, %v261_v12 }
  0x76   : > { %4329 = vmatmul.msk.f32.gmra.mxu0 %vm295_vm1, %v262_v14  ;;  %v275_v14 = vld [vmem:[%s4633_s14 + $0xc8] sm:$0xff] }
  0x7e   : > { %4330 = vmatmul.msk.f32.gmra.mxu0 %vm295_vm1, %v263_v16 }
  0x86   : > { %4331 = vmatmul.msk.f32.gmra.mxu0 %vm295_vm1, %v264_v18 }
  0x8e   : > { %4332 = vmatmul.msk.f32.gmra.mxu0 %vm295_vm1, %v265_v20 }
  0x93   : > { %v437_v23 = vpop.f32.mrf.mxu0 }
  0x94   : > { %v438_v25 = vadd.f32 %v4680_v22, %v437_v23 }
  0x96   : > { %vm557_vm2 = vcmp.ge.f32.partialorder %v438_v25, 0.0  ;;  %v597_v27 = vmul.f32 0.1, %v438_v25  ;;  %4333 = vmatmul.msk.f32.gmra.mxu0 %vm295_vm1, %v266_v24 }
  0x98   : > { %v637_v28 = vsel %vm557_vm2, %v438_v25, %v597_v27 }
  0x99   : > { %718 = vst.msk [vmem:[#allocation2 + $0x8] sm:$0xff] %vm677_vm3, %v637_v28 }
  0x9b   : > { %v440_v29 = vpop.f32.mrf.mxu0 }
  0x9c   : > { %v441_v31 = vadd.f32 %v4680_v22, %v440_v29 }
  0x9d   : > { %v515_v27 = vpop.f32.mrf.mxu2 }
  0x9e   : > { %vm558_vm4 = vcmp.ge.f32.partialorder %v441_v31, 0.0  ;;  %v598_v34 = vmul.f32 0.1, %v441_v31  ;;  %4334 = vmatmul.msk.f32.gmra.mxu0 %vm295_vm1, %v267_v30  ;;  %v516_v28 = vadd.f32 %v4680_v22, %v515_v27 }
  0xa0   : > { %v638_v35 = vsel %vm558_vm4, %v441_v31, %v598_v34  ;;  %vm583_vm15 = vcmp.ge.f32.partialorder %v516_v28, 0.0  ;;  %v623_v31 = vmul.f32 0.1, %v516_v28 }
  0xa1   : > { %719 = vst.msk [vmem:[#allocation2 + $0x10] sm:$0xff] %vm677_vm3, %v638_v35 }
  0xa2   : > { %v4746_v33 = vsel %vm583_vm15, %v516_v28, %v623_v31 }
  0xa3   : > { %v443_v36 = vpop.f32.mrf.mxu0  ;;  %7773 = vst [vmem:[#allocation3_spill] sm:$0xff] %v4746_v33 }
  0xa4   : > { %v444_v38 = vadd.f32 %v4680_v22, %v443_v36  ;;  %744 = vst.msk [vmem:[#allocation2 + $0x1a8] sm:$0xff] %vm677_vm3, %v4746_v33 }
  0xa5   : > { %v518_v35 = vpop.f32.mrf.mxu2 }
  0xa6   : > { %vm559_vm5 = vcmp.ge.f32.partialorder %v444_v38, 0.0  ;;  %v599_v41 = vmul.f32 0.1, %v444_v38  ;;  %4335 = vmatmul.msk.f32.gmra.mxu0 %vm295_vm1, %v268_v37  ;;  %v519_v36 = vadd.f32 %v4680_v22, %v518_v35 }
  0xa8   : > { %v639_v42 = vsel %vm559_vm5, %v444_v38, %v599_v41  ;;  %vm584_vm2 = vcmp.ge.f32.partialorder %v519_v36, 0.0  ;;  %v624_v39 = vmul.f32 0.1, %v519_v36 }
  0xa9   : > { %720 = vst.msk [vmem:[#allocation2 + $0x28] sm:$0xff] %vm677_vm3, %v639_v42 }
  0xaa   : > { %v4756_v41 = vsel %vm584_vm2, %v519_v36, %v624_v39 }
  0xab   : > { %v446_v43 = vpop.f32.mrf.mxu0  ;;  %7774 = vst [vmem:[#allocation4_spill] sm:$0xff] %v4756_v41 }
  0xac   : > { %v447_v45 = vadd.f32 %v4680_v22, %v446_v43  ;;  %745 = vst.msk [vmem:[#allocation2 + $0x1b0] sm:$0xff] %vm677_vm3, %v4756_v41 }
  0xad   : > { %v521_v43 = vpop.f32.mrf.mxu2 }
  0xae   : > { %vm560_vm6 = vcmp.ge.f32.partialorder %v447_v45, 0.0  ;;  %v600_v48 = vmul.f32 0.1, %v447_v45  ;;  %4336 = vmatmul.msk.f32.gmra.mxu0 %vm295_vm1, %v269_v44  ;;  %v522_v44 = vadd.f32 %v4680_v22, %v521_v43 }
  0xb0   : > { %v640_v49 = vsel %vm560_vm6, %v447_v45, %v600_v48  ;;  %vm585_vm5 = vcmp.ge.f32.partialorder %v522_v44, 0.0  ;;  %v625_v47 = vmul.f32 0.1, %v522_v44 }
  0xb1   : > { %721 = vst.msk [vmem:[#allocation2 + $0x30] sm:$0xff] %vm677_vm3, %v640_v49 }
  0xb2   : > { %v665_v49 = vsel %vm585_vm5, %v522_v44, %v625_v47 }
  0xb3   : > { %v449_v50 = vpop.f32.mrf.mxu0  ;;  %746 = vst.msk [vmem:[#allocation2 + $0x1c8] sm:$0xff] %vm677_vm3, %v665_v49 }
  0xb4   : > { %v450_v52 = vadd.f32 %v4680_v22, %v449_v50 }
  0xb6   : > { %vm561_vm7 = vcmp.ge.f32.partialorder %v450_v52, 0.0  ;;  %v601_v55 = vmul.f32 0.1, %v450_v52  ;;  %4337 = vmatmul.msk.f32.gmra.mxu0 %vm295_vm1, %v270_v51  ;;  %v524_v51 = vpop.f32.mrf.mxu2 }
  0xb8   : > { %v641_v56 = vsel %vm561_vm7, %v450_v52, %v601_v55  ;;  %v525_v52 = vadd.f32 %v4680_v22, %v524_v51 }
  0xb9   : > { %722 = vst.msk [vmem:[#allocation2 + $0x48] sm:$0xff] %vm677_vm3, %v641_v56 }
  0xba   : > { %vm586_vm7 = vcmp.ge.f32.partialorder %v525_v52, 0.0  ;;  %v626_v55 = vmul.f32 0.1, %v525_v52 }
  0xbb   : > { %v452_v57 = vpop.f32.mrf.mxu0 }
  0xbc   : > { %v453_v59 = vadd.f32 %v4680_v22, %v452_v57  ;;  %v666_v57 = vsel %vm586_vm7, %v525_v52, %v626_v55 }
  0xbd   : > { %747 = vst.msk [vmem:[#allocation2 + $0x1d0] sm:$0xff] %vm677_vm3, %v666_v57 }
  0xbe   : > { %vm562_vm8 = vcmp.ge.f32.partialorder %v453_v59, 0.0  ;;  %v602_v60 = vmul.f32 0.1, %v453_v59  ;;  %4338 = vmatmul.msk.f32.gmra.mxu0 %vm295_vm1, %v271_v58 }
  0xc0   : > { %v642_v61 = vsel %vm562_vm8, %v453_v59, %v602_v60  ;;  %v527_v59 = vpop.f32.mrf.mxu2 }
  0xc1   : > { %723 = vst.msk [vmem:[#allocation2 + $0x50] sm:$0xff] %vm677_vm3, %v642_v61  ;;  %v528_v60 = vadd.f32 %v4680_v22, %v527_v59 }
  0xc3   : > { %v455_v62 = vpop.f32.mrf.mxu0 }
  0xc4   : > { %v456_v0 = vadd.f32 %v4680_v22, %v455_v62 }
  0xc6   : > { %vm563_vm9 = vcmp.ge.f32.partialorder %v456_v0, 0.0  ;;  %v603_v1 = vmul.f32 0.1, %v456_v0  ;;  %4339 = vmatmul.msk.f32.gmra.mxu0 %vm295_vm1, %v272_v63  ;;  %v627_v63 = vmul.f32 0.1, %v528_v60 }
  0xc8   : > { %v643_v2 = vsel %vm563_vm9, %v456_v0, %v603_v1  ;;  %vm587_vm9 = vcmp.ge.f32.partialorder %v528_v60, 0.0 }
  0xc9   : > { %724 = vst.msk [vmem:[#allocation2 + $0x68] sm:$0xff] %vm677_vm3, %v643_v2  ;;  %v667_v1 = vsel %vm587_vm9, %v528_v60, %v627_v63 }
  0xca   : > { %748 = vst.msk [vmem:[#allocation2 + $0x1e8] sm:$0xff] %vm677_vm3, %v667_v1 }
  0xcb   : > { %v458_v3 = vpop.f32.mrf.mxu0 }
  0xcc   : > { %v459_v5 = vadd.f32 %v4680_v22, %v458_v3  ;;  %v530_v3 = vpop.f32.mrf.mxu2 }
  0xce   : > { %vm564_vm10 = vcmp.ge.f32.partialorder %v459_v5, 0.0  ;;  %v604_v6 = vmul.f32 0.1, %v459_v5  ;;  %4340 = vmatmul.msk.f32.gmra.mxu0 %vm295_vm1, %v273_v4  ;;  %v531_v4 = vadd.f32 %v4680_v22, %v530_v3  ;;  %v4552_v3 = vmov -inf  }
  0xcf   : > { %678 = vst.msk [vmem:[#allocation2] sm:$0xff] %vm677_vm3, %v4552_v3 }
  0xd0   : > { %v644_v7 = vsel %vm564_vm10, %v459_v5, %v604_v6  ;;  %679 = vst.msk [vmem:[#allocation2 + $0x20] sm:$0xff] %vm677_vm3, %v4552_v3 }
  0xd1   : > { %725 = vst.msk [vmem:[#allocation2 + $0x70] sm:$0xff] %vm677_vm3, %v644_v7  ;;  %v628_v7 = vmul.f32 0.1, %v531_v4 }
  0xd2   : > { %680 = vst.msk [vmem:[#allocation2 + $0x40] sm:$0xff] %vm677_vm3, %v4552_v3 }
  0xd3   : > { %v461_v8 = vpop.f32.mrf.mxu0  ;;  %681 = vst.msk [vmem:[#allocation2 + $0x60] sm:$0xff] %vm677_vm3, %v4552_v3 }
  0xd4   : > { %v462_v10 = vadd.f32 %v4680_v22, %v461_v8  ;;  %682 = vst.msk [vmem:[#allocation2 + $0x80] sm:$0xff] %vm677_vm3, %v4552_v3 }
  0xd5   : > { %683 = vst.msk [vmem:[#allocation2 + $0xa0] sm:$0xff] %vm677_vm3, %v4552_v3 }
  0xd6   : > { %vm565_vm11 = vcmp.ge.f32.partialorder %v462_v10, 0.0  ;;  %v605_v11 = vmul.f32 0.1, %v462_v10  ;;  %4341 = vmatmul.msk.f32.gmra.mxu0 %vm295_vm1, %v274_v9  ;;  %684 = vst.msk [vmem:[#allocation2 + $0xc0] sm:$0xff] %vm677_vm3, %v4552_v3 }
  0xd7   : > { %685 = vst.msk [vmem:[#allocation2 + $0xe0] sm:$0xff] %vm677_vm3, %v4552_v3 }
  0xd8   : > { %v645_v12 = vsel %vm565_vm11, %v462_v10, %v605_v11  ;;  %vm588_vm11 = vcmp.ge.f32.partialorder %v531_v4, 0.0  ;;  %v533_v11 = vpop.f32.mrf.mxu2  ;;  %686 = vst.msk [vmem:[#allocation2 + $0x100] sm:$0xff] %vm677_vm3, %v4552_v3 }
  0xd9   : > { %726 = vst.msk [vmem:[#allocation2 + $0x88] sm:$0xff] %vm677_vm3, %v645_v12  ;;  %v668_v9 = vsel %vm588_vm11, %v531_v4, %v628_v7  ;;  %v534_v12 = vadd.f32 %v4680_v22, %v533_v11 }
  0xda   : > { %749 = vst.msk [vmem:[#allocation2 + $0x1f0] sm:$0xff] %vm677_vm3, %v668_v9 }
  0xdb   : > { %v464_v13 = vpop.f32.mrf.mxu0  ;;  %687 = vst.msk [vmem:[#allocation2 + $0x120] sm:$0xff] %vm677_vm3, %v4552_v3 }
  0xdc   : > { %v465_v15 = vadd.f32 %v4680_v22, %v464_v13  ;;  %v545_v13 = vpop.f32.mrf.mxu3  ;;  %688 = vst.msk [vmem:[#allocation2 + $0x140] sm:$0xff] %vm677_vm3, %v4552_v3 }
  0xdd   : > { %689 = vst.msk [vmem:[#allocation2 + $0x160] sm:$0xff] %vm677_vm3, %v4552_v3 }
  0xde   : > { %vm566_vm12 = vcmp.ge.f32.partialorder %v465_v15, 0.0  ;;  %v606_v16 = vmul.f32 0.1, %v465_v15  ;;  %4342 = vmatmul.msk.f32.gmra.mxu0 %vm295_vm1, %v275_v14  ;;  %690 = vst.msk [vmem:[#allocation2 + $0x180] sm:$0xff] %vm677_vm3, %v4552_v3 }
  0xdf   : > { %691 = vst.msk [vmem:[#allocation2 + $0x1a0] sm:$0xff] %vm677_vm3, %v4552_v3 }
  0xe0   : > { %v646_v17 = vsel %vm566_vm12, %v465_v15, %v606_v16  ;;  %v546_v15 = vadd.f32 %v4680_v22, %v545_v13  ;;  %692 = vst.msk [vmem:[#allocation2 + $0x1c0] sm:$0xff] %vm677_vm3, %v4552_v3 }
  0xe1   : > { %727 = vst.msk [vmem:[#allocation2 + $0x90] sm:$0xff] %vm677_vm3, %v646_v17  ;;  %v629_v17 = vmul.f32 0.1, %v534_v12 }
  0xe2   : > { %693 = vst.msk [vmem:[#allocation2 + $0x1e0] sm:$0xff] %vm677_vm3, %v4552_v3 }
  0xe3   : > { %v467_v18 = vpop.f32.mrf.mxu0  ;;  %694 = vst.msk [vmem:[#allocation2 + $0x200] sm:$0xff] %vm677_vm3, %v4552_v3 }
  0xe4   : > { %v468_v19 = vadd.f32 %v4680_v22, %v467_v18  ;;  %v633_v18 = vmul.f32 0.1, %v546_v15  ;;  %695 = vst.msk [vmem:[#allocation2 + $0x220] sm:$0xff] %vm677_vm3, %v4552_v3 }
  0xe5   : > { %696 = vst.msk [vmem:[#allocation2 + $0x240] sm:$0xff] %vm677_vm3, %v4552_v3 }
  0xe6   : > { %vm567_vm13 = vcmp.ge.f32.partialorder %v468_v19, 0.0  ;;  %v607_v20 = vmul.f32 0.1, %v468_v19  ;;  %697 = vst.msk [vmem:[#allocation2 + $0x260] sm:$0xff] %vm677_vm3, %v4552_v3 }
  0xe7   : > { %698 = vst.msk [vmem:[#allocation2 + $0x18] sm:$0xff] %vm677_vm3, %v4552_v3 }
  0xe8   : > { %v647_v21 = vsel %vm567_vm13, %v468_v19, %v607_v20  ;;  %vm589_vm13 = vcmp.ge.f32.partialorder %v534_v12, 0.0  ;;  %699 = vst.msk [vmem:[#allocation2 + $0x38] sm:$0xff] %vm677_vm3, %v4552_v3 }
  0xe9   : > { %728 = vst.msk [vmem:[#allocation2 + $0xa8] sm:$0xff] %vm677_vm3, %v647_v21  ;;  %v669_v20 = vsel %vm589_vm13, %v534_v12, %v629_v17 }
  0xea   : > { %750 = vst.msk [vmem:[#allocation2 + $0x208] sm:$0xff] %vm677_vm3, %v669_v20 }
  0xeb   : > { %v470_v23 = vpop.f32.mrf.mxu0  ;;  %700 = vst.msk [vmem:[#allocation2 + $0x58] sm:$0xff] %vm677_vm3, %v4552_v3 }
  0xec   : > { %v471_v24 = vadd.f32 %v4680_v22, %v470_v23  ;;  %701 = vst.msk [vmem:[#allocation2 + $0x78] sm:$0xff] %vm677_vm3, %v4552_v3 }
  0xed   : > { %702 = vst.msk [vmem:[#allocation2 + $0x98] sm:$0xff] %vm677_vm3, %v4552_v3 }
  0xee   : > { %vm568_vm14 = vcmp.ge.f32.partialorder %v471_v24, 0.0  ;;  %v608_v25 = vmul.f32 0.1, %v471_v24  ;;  %703 = vst.msk [vmem:[#allocation2 + $0xb8] sm:$0xff] %vm677_vm3, %v4552_v3 }
  0xef   : > { %704 = vst.msk [vmem:[#allocation2 + $0xd8] sm:$0xff] %vm677_vm3, %v4552_v3 }
  0xf0   : > { %v648_v26 = vsel %vm568_vm14, %v471_v24, %v608_v25  ;;  %vm593_vm14 = vcmp.ge.f32.partialorder %v546_v15, 0.0  ;;  %v536_v24 = vpop.f32.mrf.mxu2  ;;  %705 = vst.msk [vmem:[#allocation2 + $0xf8] sm:$0xff] %vm677_vm3, %v4552_v3 }
  0xf1   : > { %729 = vst.msk [vmem:[#allocation2 + $0xb0] sm:$0xff] %vm677_vm3, %v648_v26  ;;  %v673_v21 = vsel %vm593_vm14, %v546_v15, %v633_v18  ;;  %v537_v25 = vadd.f32 %v4680_v22, %v536_v24  ;;  %v548_v26 = vpop.f32.mrf.mxu3 }
  0xf2   : > { %754 = vst.msk [vmem:[#allocation2 + $0x248] sm:$0xff] %vm677_vm3, %v673_v21  ;;  %v549_v28 = vadd.f32 %v4680_v22, %v548_v26 }
  0xf3   : > { %v473_v29 = vpop.f32.mrf.mxu0  ;;  %706 = vst.msk [vmem:[#allocation2 + $0x118] sm:$0xff] %vm677_vm3, %v4552_v3 }
  0xf4   : > { %v474_v30 = vadd.f32 %v4680_v22, %v473_v29  ;;  %vm594_vm2 = vcmp.ge.f32.partialorder %v549_v28, 0.0  ;;  %v634_v31 = vmul.f32 0.1, %v549_v28  ;;  %707 = vst.msk [vmem:[#allocation2 + $0x138] sm:$0xff] %vm677_vm3, %v4552_v3 }
  0xf5   : > { %708 = vst.msk [vmem:[#allocation2 + $0x158] sm:$0xff] %vm677_vm3, %v4552_v3 }
  0xf6   : > { %vm569_vm1 = vcmp.ge.f32.partialorder %v474_v30, 0.0  ;;  %v609_v32 = vmul.f32 0.1, %v474_v30  ;;  %v674_v36 = vsel %vm594_vm2, %v549_v28, %v634_v31  ;;  %709 = vst.msk [vmem:[#allocation2 + $0x178] sm:$0xff] %vm677_vm3, %v4552_v3 }
  0xf7   : > { %755 = vst.msk [vmem:[#allocation2 + $0x250] sm:$0xff] %vm677_vm3, %v674_v36 }
  0xf8   : > { %v4750_v34 = vsel %vm569_vm1, %v474_v30, %v609_v32  ;;  %vm590_vm1 = vcmp.ge.f32.partialorder %v537_v25, 0.0  ;;  %v630_v30 = vmul.f32 0.1, %v537_v25  ;;  %710 = vst.msk [vmem:[#allocation2 + $0x198] sm:$0xff] %vm677_vm3, %v4552_v3 }
  0xf9   : > { %730 = vst.msk [vmem:[#allocation2 + $0xc8] sm:$0xff] %vm677_vm3, %v4750_v34 }
  0xfa   : > { %v670_v35 = vsel %vm590_vm1, %v537_v25, %v630_v30  ;;  %711 = vst.msk [vmem:[#allocation2 + $0x1b8] sm:$0xff] %vm677_vm3, %v4552_v3 }
  0xfb   : > { %v476_v37 = vpop.f32.mrf.mxu0  ;;  %751 = vst.msk [vmem:[#allocation2 + $0x210] sm:$0xff] %vm677_vm3, %v670_v35 }
  0xfc   : > { %v477_v38 = vadd.f32 %v4680_v22, %v476_v37  ;;  %712 = vst.msk [vmem:[#allocation2 + $0x1d8] sm:$0xff] %vm677_vm3, %v4552_v3 }
  0xfd   : > { %713 = vst.msk [vmem:[#allocation2 + $0x1f8] sm:$0xff] %vm677_vm3, %v4552_v3 }
  0xfe   : > { %vm570_vm4 = vcmp.ge.f32.partialorder %v477_v38, 0.0  ;;  %v610_v40 = vmul.f32 0.1, %v477_v38  ;;  %714 = vst.msk [vmem:[#allocation2 + $0x218] sm:$0xff] %vm677_vm3, %v4552_v3 }
  0xff   : > { %715 = vst.msk [vmem:[#allocation2 + $0x238] sm:$0xff] %vm677_vm3, %v4552_v3 }
 0x100   : > { %v4760_v42 = vsel %vm570_vm4, %v477_v38, %v610_v40  ;;  %v539_v38 = vpop.f32.mrf.mxu2  ;;  %v551_v40 = vpop.f32.mrf.mxu3  ;;  %716 = vst.msk [vmem:[#allocation2 + $0x258] sm:$0xff] %vm677_vm3, %v4552_v3 }
 0x101   : > { %731 = vst.msk [vmem:[#allocation2 + $0xd0] sm:$0xff] %vm677_vm3, %v4760_v42  ;;  %v540_v39 = vadd.f32 %v4680_v22, %v539_v38  ;;  %v552_v44 = vadd.f32 %v4680_v22, %v551_v40 }
 0x102   : > { %717 = vst.msk [vmem:[#allocation2 + $0x278] sm:$0xff] %vm677_vm3, %v4552_v3 }
 0x103   : > { %v479_v45 = vpop.f32.mrf.mxu0  ;;  %vm591_vm5 = vcmp.ge.f32.partialorder %v540_v39, 0.0  ;;  %v635_v47 = vmul.f32 0.1, %v552_v44 }
 0x104   : > { %v480_v46 = vadd.f32 %v4680_v22, %v479_v45 }
 0x106   : > { %vm571_vm6 = vcmp.ge.f32.partialorder %v480_v46, 0.0  ;;  %v611_v48 = vmul.f32 0.1, %v480_v46 }
 0x108   : > { %v4767_v50 = vsel %vm571_vm6, %v480_v46, %v611_v48  ;;  %v631_v46 = vmul.f32 0.1, %v540_v39  ;;  %vm595_vm6 = vcmp.ge.f32.partialorder %v552_v44, 0.0  ;;  %v554_v55 = vpop.f32.mrf.mxu3 }
 0x109   : > { %732 = vst.msk [vmem:[#allocation2 + $0xe8] sm:$0xff] %vm677_vm3, %v4767_v50  ;;  %v675_v51 = vsel %vm595_vm6, %v552_v44, %v635_v47  ;;  %v555_v57 = vadd.f32 %v4680_v22, %v554_v55 }
 0x10a   : > { %v671_v49 = vsel %vm591_vm5, %v540_v39, %v631_v46  ;;  %756 = vst.msk [vmem:[#allocation2 + $0x268] sm:$0xff] %vm677_vm3, %v675_v51 }
 0x10b   : > { %v482_v53 = vpop.f32.mrf.mxu0  ;;  %752 = vst.msk [vmem:[#allocation2 + $0x228] sm:$0xff] %vm677_vm3, %v671_v49  ;;  %vm596_vm9 = vcmp.ge.f32.partialorder %v555_v57, 0.0 }
 0x10c   : > { %v483_v54 = vadd.f32 %v4680_v22, %v482_v53  ;;  %v542_v53 = vpop.f32.mrf.mxu2 }
 0x10e   : > { %vm572_vm8 = vcmp.ge.f32.partialorder %v483_v54, 0.0  ;;  %v612_v56 = vmul.f32 0.1, %v483_v54 }
 0x110   : > { %v4774_v58 = vsel %vm572_vm8, %v483_v54, %v612_v56  ;;  %v543_v54 = vadd.f32 %v4680_v22, %v542_v53 }
 0x111   : > { %733 = vst.msk [vmem:[#allocation2 + $0xf0] sm:$0xff] %vm677_vm3, %v4774_v58 }
 0x112   : > { %vm592_vm8 = vcmp.ge.f32.partialorder %v543_v54, 0.0  ;;  %v632_v60 = vmul.f32 0.1, %v543_v54 }
 0x113   : > { %v485_v61 = vpop.f32.mrf.mxu0 }
 0x114   : > { %v486_v62 = vadd.f32 %v4680_v22, %v485_v61  ;;  %v636_v61 = vmul.f32 0.1, %v555_v57  ;;  %v672_v63 = vsel %vm592_vm8, %v543_v54, %v632_v60 }
 0x115   : > { %753 = vst.msk [vmem:[#allocation2 + $0x230] sm:$0xff] %vm677_vm3, %v672_v63 }
 0x116   : > { %vm573_vm10 = vcmp.ge.f32.partialorder %v486_v62, 0.0  ;;  %v613_v0 = vmul.f32 0.1, %v486_v62 }
 0x118   : > { %v4781_v2 = vsel %vm573_vm10, %v486_v62, %v613_v0  ;;  %v676_v0 = vsel %vm596_vm9, %v555_v57, %v636_v61 }
 0x119   : > { %734 = vst.msk [vmem:[#allocation2 + $0x108] sm:$0xff] %vm677_vm3, %v4781_v2 }
 0x11a   : > { %757 = vst.msk [vmem:[#allocation2 + $0x270] sm:$0xff] %vm677_vm3, %v676_v0 }
 0x11b   : > { %v488_v5 = vpop.f32.mrf.mxu0 }
 0x11c   : > { %v489_v6 = vadd.f32 %v4680_v22, %v488_v5 }
 0x11e   : > { %vm574_vm12 = vcmp.ge.f32.partialorder %v489_v6, 0.0  ;;  %v614_v8 = vmul.f32 0.1, %v489_v6 }
 0x120   : > { %v4788_v10 = vsel %vm574_vm12, %v489_v6, %v614_v8 }
 0x121   : > { %735 = vst.msk [vmem:[#allocation2 + $0x110] sm:$0xff] %vm677_vm3, %v4788_v10 }
 0x123   : > { %v491_v14 = vpop.f32.mrf.mxu0 }
 0x124   : > { %v492_v16 = vadd.f32 %v4680_v22, %v491_v14 }
 0x126   : > { %vm575_vm15 = vcmp.ge.f32.partialorder %v492_v16, 0.0  ;;  %v615_v19 = vmul.f32 0.1, %v492_v16 }
 0x128   : > { %v4796_v23 = vsel %vm575_vm15, %v492_v16, %v615_v19 }
 0x129   : > { %736 = vst.msk [vmem:[#allocation2 + $0x128] sm:$0xff] %vm677_vm3, %v4796_v23 }
 0x12b   : > { %v494_v27 = vpop.f32.mrf.mxu0 }
 0x12c   : > { %v495_v29 = vadd.f32 %v4680_v22, %v494_v27 }
 0x12e   : > { %vm576_vm4 = vcmp.ge.f32.partialorder %v495_v29, 0.0  ;;  %v616_v32 = vmul.f32 0.1, %v495_v29 }
 0x130   : > { %v4805_v37 = vsel %vm576_vm4, %v495_v29, %v616_v32 }
 0x131   : > { %737 = vst.msk [vmem:[#allocation2 + $0x130] sm:$0xff] %vm677_vm3, %v4805_v37 }
 0x133   : > { %v497_v43 = vpop.f32.mrf.mxu0 }
 0x134   : > { %v498_v45 = vadd.f32 %v4680_v22, %v497_v43 }
 0x136   : > { %vm577_vm7 = vcmp.ge.f32.partialorder %v498_v45, 0.0  ;;  %v617_v48 = vmul.f32 0.1, %v498_v45 }
 0x138   : > { %v4814_v52 = vsel %vm577_vm7, %v498_v45, %v617_v48 }
 0x139   : > { %7775 = vst [vmem:[#allocation5_spill] sm:$0xff] %v4814_v52 }
 0x13a   : > { %738 = vst.msk [vmem:[#allocation2 + $0x148] sm:$0xff] %vm677_vm3, %v4814_v52 }
 0x13b   : > { %v500_v56 = vpop.f32.mrf.mxu0 }
 0x13c   : > { %v501_v59 = vadd.f32 %v4680_v22, %v500_v56 }
 0x13e   : > { %vm578_vm10 = vcmp.ge.f32.partialorder %v501_v59, 0.0  ;;  %v618_v62 = vmul.f32 0.1, %v501_v59 }
 0x140   : > { %v4823_v1 = vsel %vm578_vm10, %v501_v59, %v618_v62 }
 0x141   : > { %7776 = vst [vmem:[#allocation6_spill] sm:$0xff] %v4823_v1 }
 0x142   : > { %739 = vst.msk [vmem:[#allocation2 + $0x150] sm:$0xff] %vm677_vm3, %v4823_v1 }
 0x143   : > { %v503_v4 = vpop.f32.mrf.mxu0 }
 0x144   : > { %v504_v5 = vadd.f32 %v4680_v22, %v503_v4 }
 0x146   : > { %vm579_vm11 = vcmp.ge.f32.partialorder %v504_v5, 0.0  ;;  %v619_v6 = vmul.f32 0.1, %v504_v5 }
 0x148   : > { %v4841_v7 = vsel %vm579_vm11, %v504_v5, %v619_v6 }
 0x149   : > { %7777 = vst [vmem:[#allocation7_spill] sm:$0xff] %v4841_v7 }
 0x14a   : > { %740 = vst.msk [vmem:[#allocation2 + $0x168] sm:$0xff] %vm677_vm3, %v4841_v7 }
 0x14b   : > { %v506_v8 = vpop.f32.mrf.mxu0 }
 0x14c   : > { %v507_v9 = vadd.f32 %v4680_v22, %v506_v8 }
 0x14e   : > { %vm580_vm12 = vcmp.ge.f32.partialorder %v507_v9, 0.0  ;;  %v620_v11 = vmul.f32 0.1, %v507_v9 }
 0x150   : > { %v4860_v12 = vsel %vm580_vm12, %v507_v9, %v620_v11 }
 0x151   : > { %7778 = vst [vmem:[#allocation8_spill] sm:$0xff] %v4860_v12 }
 0x152   : > { %741 = vst.msk [vmem:[#allocation2 + $0x170] sm:$0xff] %vm677_vm3, %v4860_v12 }
 0x153   : > { %v509_v13 = vpop.f32.mrf.mxu0 }
 0x154   : > { %v510_v14 = vadd.f32 %v4680_v22, %v509_v13 }
 0x156   : > { %vm581_vm13 = vcmp.ge.f32.partialorder %v510_v14, 0.0  ;;  %v621_v15 = vmul.f32 0.1, %v510_v14 }
 0x158   : > { %v4879_v16 = vsel %vm581_vm13, %v510_v14, %v621_v15 }
 0x159   : > { %7779 = vst [vmem:[#allocation9_spill] sm:$0xff] %v4879_v16 }
 0x15a   : > { %742 = vst.msk [vmem:[#allocation2 + $0x188] sm:$0xff] %vm677_vm3, %v4879_v16 }
 0x15b   : > { %v512_v17 = vpop.f32.mrf.mxu0 }
 0x15c   : > { %v513_v18 = vadd.f32 %v4680_v22, %v512_v17 }
 0x15e   : > { %vm582_vm14 = vcmp.ge.f32.partialorder %v513_v18, 0.0  ;;  %v622_v19 = vmul.f32 0.1, %v513_v18  ;;  %761 = sbr.rel (%p4357_p7) target bundleno = 368 (0x170), region = 44 }
 0x160   : > { %v4898_v20 = vsel %vm582_vm14, %v513_v18, %v622_v19 }
 0x161   : > { %7780 = vst [vmem:[#allocation10_spill] sm:$0xff] %v4898_v20 }
 0x162   : > { %743 = vst.msk [vmem:[#allocation2 + $0x190] sm:$0xff] %vm677_vm3, %v4898_v20 }
 0x163   : > { %v4553_v22 = vmov -inf  }
 0x164   : > { %762 = vst.msk [vmem:[#allocation2 + $0x8] sm:$0xff] %vm677_vm3, %v4553_v22 }
 0x165   : > { %763 = vst.msk [vmem:[#allocation2 + $0x10] sm:$0xff] %vm677_vm3, %v4553_v22 }
 0x166   : > { %764 = vst.msk [vmem:[#allocation2 + $0x28] sm:$0xff] %vm677_vm3, %v4553_v22 }
 0x167   : > { %765 = vst.msk [vmem:[#allocation2 + $0x30] sm:$0xff] %vm677_vm3, %v4553_v22 }
 0x168   : > { %766 = vst.msk [vmem:[#allocation2 + $0x48] sm:$0xff] %vm677_vm3, %v4553_v22 }
 0x169   : > { %767 = vst.msk [vmem:[#allocation2 + $0x50] sm:$0xff] %vm677_vm3, %v4553_v22 }
 0x16a   : > { %768 = vst.msk [vmem:[#allocation2 + $0x68] sm:$0xff] %vm677_vm3, %v4553_v22 }
 0x16b   : > { %769 = vst.msk [vmem:[#allocation2 + $0x70] sm:$0xff] %vm677_vm3, %v4553_v22 }
 0x16c   : > { %770 = vst.msk [vmem:[#allocation2 + $0x88] sm:$0xff] %vm677_vm3, %v4553_v22 }
 0x16d   : > { %771 = vst.msk [vmem:[#allocation2 + $0x90] sm:$0xff] %vm677_vm3, %v4553_v22 }
 0x16e   : > { %772 = vst.msk [vmem:[#allocation2 + $0xa8] sm:$0xff] %vm677_vm3, %v4553_v22 }
 0x16f   : > { %773 = vst.msk [vmem:[#allocation2 + $0xb0] sm:$0xff] %vm677_vm3, %v4553_v22 }
 0x170 PF: > { %p4358_p8 = scmp.ne.s32.totalorder %s4534_s18, 1 }
 0x172   : > { %777 = sbr.rel (%p4358_p8) target bundleno = 388 (0x184), region = 48 }
 0x177   : > { %v4554_v21 = vmov -inf  }
 0x178   : > { %779 = vst.msk [vmem:[#allocation2 + $0x1c8] sm:$0xff] %vm677_vm3, %v4554_v21 }
 0x179   : > { %780 = vst.msk [vmem:[#allocation2 + $0x1d0] sm:$0xff] %vm677_vm3, %v4554_v21 }
 0x17a   : > { %781 = vst.msk [vmem:[#allocation2 + $0x1e8] sm:$0xff] %vm677_vm3, %v4554_v21 }
 0x17b   : > { %782 = vst.msk [vmem:[#allocation2 + $0x1f0] sm:$0xff] %vm677_vm3, %v4554_v21 }
 0x17c   : > { %783 = vst.msk [vmem:[#allocation2 + $0x208] sm:$0xff] %vm677_vm3, %v4554_v21 }
 0x17d   : > { %784 = vst.msk [vmem:[#allocation2 + $0x210] sm:$0xff] %vm677_vm3, %v4554_v21 }
 0x17e   : > { %785 = vst.msk [vmem:[#allocation2 + $0x228] sm:$0xff] %vm677_vm3, %v4554_v21 }
 0x17f   : > { %786 = vst.msk [vmem:[#allocation2 + $0x230] sm:$0xff] %vm677_vm3, %v4554_v21 }
 0x180   : > { %787 = vst.msk [vmem:[#allocation2 + $0x248] sm:$0xff] %vm677_vm3, %v4554_v21 }
 0x181   : > { %788 = vst.msk [vmem:[#allocation2 + $0x250] sm:$0xff] %vm677_vm3, %v4554_v21 }
 0x182   : > { %789 = vst.msk [vmem:[#allocation2 + $0x268] sm:$0xff] %vm677_vm3, %v4554_v21 }
 0x183   : > { %790 = vst.msk [vmem:[#allocation2 + $0x270] sm:$0xff] %vm677_vm3, %v4554_v21 }
 0x184 PF: > { %v791_v24 = vld [vmem:[%s7607_s3] sm:$0x3]  ;;  %vm2179_vm15 = vcmask 1041408   ;;  %v2220_v25 = vld [vmem:[%s7607_s3 + $0x2] sm:$0x3]  ;;  %v793_v27 = vld [vmem:[#allocation2 + $0x8] sm:$0xff] }
 0x185   : > { %v792_v26 = vld [vmem:[#allocation2] sm:$0xff]  ;;  %4376 = vmatpush.msk.msrb.mxu2 %vm2179_vm15, %v791_v24  ;;  %4359 = vmatpush.msk.msra.mxu1 %vm2179_vm15, %v2220_v25  ;;  %v794_v28 = vld [vmem:[#allocation2 + $0x10] sm:$0xff]  ;;  %v797_v30 = vld [vmem:[#allocation2 + $0x28] sm:$0xff]  ;;  %vm1192_vm1 = vcmask 1046528   ;;  %vm1433_vm2 = vcmask 1045504   ;;  %vm1674_vm4 = vcmask 1044480  }
 0x186   : > { %v796_v29 = vld [vmem:[#allocation2 + $0x20] sm:$0xff]  ;;  %4377 = vmatmul.msk.f32.vlgmr.msrb.gmra.mxu2 %vm677_vm3, %v4750_v34  ;;  %4431 = vmatpush.msk.msrb.mxu3 %vm2179_vm15, %v2220_v25  ;;  %v798_v31 = vld [vmem:[#allocation2 + $0x30] sm:$0xff]  ;;  %v4965_v36 = vld [vmem:[#allocation2 + $0x48] sm:$0xff]  ;;  %v873_v40 = vmax.f32 %v793_v27, %v797_v30  ;;  %vm4203_vm6 = vcmask 64512  }
 0x187   : > { %v800_v32 = vld [vmem:[#allocation2 + $0x40] sm:$0xff]  ;;  %v872_v35 = vmax.f32 %v792_v26, %v796_v29  ;;  %v4967_v38 = vld [vmem:[#allocation2 + $0x50] sm:$0xff]  ;;  %v874_v43 = vmax.f32 %v794_v28, %v798_v31  ;;  %v805_v45 = vld [vmem:[#allocation2 + $0x68] sm:$0xff]  ;;  %v877_v34 = vmax.f32 %v797_v30, %v4965_v36 }
 0x188   : > { %v804_v39 = vld [vmem:[#allocation2 + $0x60] sm:$0xff]  ;;  %v876_v44 = vmax.f32 %v796_v29, %v800_v32  ;;  %v4969_v46 = vld [vmem:[#allocation2 + $0x70] sm:$0xff]  ;;  %v878_v48 = vmax.f32 %v798_v31, %v4967_v38  ;;  %v4975_v49 = vld [vmem:[#allocation2 + $0x88] sm:$0xff]  ;;  %v937_v56 = vmax.f32 %v873_v40, %v4965_v36  ;;  %v881_v13 = vmax.f32 %v4965_v36, %v805_v45 }
 0x189   : > { %v4971_v47 = vld [vmem:[#allocation2 + $0x80] sm:$0xff]  ;;  %v4977_v51 = vld [vmem:[#allocation2 + $0x90] sm:$0xff]  ;;  %v936_v55 = vmax.f32 %v872_v35, %v800_v32  ;;  %v4983_v57 = vld [vmem:[#allocation2 + $0xa8] sm:$0xff]  ;;  %v885_v61 = vmax.f32 %v805_v45, %v4975_v49  ;;  %v938_v0 = vmax.f32 %v874_v43, %v4967_v38  ;;  %v5003_v9 = vmax.f32 %v877_v34, %v805_v45 }
 0x18a   : > { %v4979_v53 = vld [vmem:[#allocation2 + $0xa0] sm:$0xff]  ;;  %v884_v54 = vmax.f32 %v804_v39, %v4971_v47  ;;  %v4985_v59 = vld [vmem:[#allocation2 + $0xb0] sm:$0xff]  ;;  %v886_v62 = vmax.f32 %v4969_v46, %v4977_v51  ;;  %v4995_v3 = vld [vmem:[#allocation2 + $0xc8] sm:$0xff]  ;;  %v889_v5 = vmax.f32 %v4975_v49, %v4983_v57  ;;  %v940_v8 = vmax.f32 %v876_v44, %v804_v39 }
 0x18b   : > { %7781 = vst [vmem:[#allocation11_spill] sm:$0xff] %v4979_v53  ;;  %v4987_v60 = vld [vmem:[#allocation2 + $0xc0] sm:$0xff]  ;;  %v888_v63 = vmax.f32 %v4971_v47, %v4979_v53  ;;  %v4997_v4 = vld [vmem:[#allocation2 + $0xd0] sm:$0xff]  ;;  %v890_v6 = vmax.f32 %v4977_v51, %v4985_v59  ;;  %v880_v11 = vmax.f32 %v800_v32, %v804_v39  ;;  %v882_v14 = vmax.f32 %v4967_v38, %v4969_v46  ;;  %v5025_v24 = vld [vmem:[#allocation2 + $0xe8] sm:$0xff] }
 0x18c   : > { %7782 = vst [vmem:[#allocation12_spill] sm:$0xff] %v4987_v60  ;;  %v5009_v15 = vmax.f32 %v878_v48, %v4969_v46  ;;  %v5011_v17 = vld [vmem:[#allocation2 + $0xe0] sm:$0xff]  ;;  %v5014_v18 = vmax.f32 %v884_v54, %v4979_v53  ;;  %v5017_v19 = vmax.f32 %v885_v61, %v4983_v57  ;;  %v5020_v22 = vmax.f32 %v886_v62, %v4985_v59  ;;  %v5027_v25 = vld [vmem:[#allocation2 + $0xf0] sm:$0xff]  ;;  %v5039_v36 = vld [vmem:[#allocation2 + $0x108] sm:$0xff] }
 0x18d   : > { %7783 = vst [vmem:[#allocation13_spill] sm:$0xff] %v4995_v3  ;;  %v952_v21 = vmax.f32 %v888_v63, %v4987_v60  ;;  %v953_v26 = vmax.f32 %v889_v5, %v4995_v3  ;;  %v954_v27 = vmax.f32 %v890_v6, %v4997_v4  ;;  %v1000_v28 = vmax.f32 %v936_v55, %v804_v39  ;;  %v5031_v30 = vld [vmem:[#allocation2 + $0x100] sm:$0xff]  ;;  %v5041_v38 = vld [vmem:[#allocation2 + $0x110] sm:$0xff]  ;;  %v5057_v48 = vld [vmem:[#allocation2 + $0x128] sm:$0xff] }
 0x18e   : > { %7784 = vst [vmem:[#allocation14_spill] sm:$0xff] %v4997_v4  ;;  %4378 = vmatmul.msk.f32.gmra.mxu2 %vm677_vm3, %v4760_v42  ;;  %v1001_v29 = vmax.f32 %v937_v56, %v805_v45  ;;  %v1002_v31 = vmax.f32 %v938_v0, %v4969_v46  ;;  %v1004_v32 = vmax.f32 %v940_v8, %v4971_v47  ;;  %v5047_v43 = vld [vmem:[#allocation2 + $0x120] sm:$0xff]  ;;  %v5061_v55 = vld [vmem:[#allocation2 + $0x148] sm:$0xff]  ;;  %v5161_v41 = vld [vmem:[#allocation2 + $0x1b0] sm:$0xff] }
 0x18f   : > { %7785 = vst [vmem:[#allocation15_spill] sm:$0xff] %v5011_v17  ;;  %v1005_v35 = vmax.f32 %v5003_v9, %v4975_v49  ;;  %v1006_v42 = vmax.f32 %v5009_v15, %v4977_v51  ;;  %v5044_v40 = vmax.f32 %v880_v11, %v4971_v47  ;;  %v1016_v39 = vmax.f32 %v952_v21, %v5011_v17  ;;  %v5059_v54 = vld [vmem:[#allocation2 + $0x140] sm:$0xff]  ;;  %v5208_v16 = vld [vmem:[#allocation2 + $0xd8] sm:$0xff] }
 0x190   : > { %7786 = vst [vmem:[#allocation16_spill] sm:$0xff] %v5025_v24  ;;  %v1017_v44 = vmax.f32 %v953_v26, %v5025_v24  ;;  %v1018_v45 = vmax.f32 %v954_v27, %v5027_v25  ;;  %v5052_v46 = vmax.f32 %v1000_v28, %v4971_v47  ;;  %v5055_v34 = vmax.f32 %v1001_v29, %v4975_v49  ;;  %v4018_v63 = vld [vmem:[%s7607_s3 + $0x6] sm:$0x3]  ;;  %v5218_v1 = vld [vmem:[#allocation2 + $0xf8] sm:$0xff] }
 0x191   : > { %7787 = vst [vmem:[#allocation17_spill] sm:$0xff] %v5027_v25  ;;  %v5064_v56 = vmax.f32 %v881_v13, %v4975_v49  ;;  %v5067_v61 = vmax.f32 %v882_v14, %v4977_v51  ;;  %v1012_v62 = vmax.f32 %v5014_v18, %v4987_v60  ;;  %v5072_v47 = vmax.f32 %v1002_v31, %v4977_v51  ;;  %v5112_v29 = vld [vmem:[#allocation2 + $0x160] sm:$0xff] }
 0x192   : > { %7788 = vst [vmem:[#allocation18_spill] sm:$0xff] %v5041_v38  ;;  %v1013_v0 = vmax.f32 %v5017_v19, %v4995_v3  ;;  %v5082_v5 = vmax.f32 %v1004_v32, %v4979_v53  ;;  %v1080_v6 = vmax.f32 %v1016_v39, %v5031_v30  ;;  %4410 = vmatpush.msk.msrb.mxu1 %vm2179_vm15, %v4018_v63  ;;  %v5100_v39 = vld [vmem:[#allocation2 + $0x130] sm:$0xff] }
 0x193   : > { %7789 = vst [vmem:[#allocation19_spill] sm:$0xff] %v5044_v40  ;;  %v1081_v51 = vmax.f32 %v1017_v44, %v5039_v36  ;;  %v5088_v8 = vmax.f32 %v1018_v45, %v5041_v38  ;;  %v908_v9 = vmax.f32 %v5047_v43, %v5059_v54  ;;  %v909_v11 = vmax.f32 %v5057_v48, %v5061_v55  ;;  %v5102_v44 = vld [vmem:[#allocation2 + $0x150] sm:$0xff] }
 0x194   : > { %7790 = vst [vmem:[#allocation20_spill] sm:$0xff] %v5047_v43  ;;  %v1221_v13 = vrot.slane %v1080_v6, 1  ;;  %v1462_v14 = vrot.slane %v1080_v6, 2  ;;  %v1703_v15 = vrot.slane %v1080_v6, 3  ;;  %v1943_v18 = vrot.slane %v1080_v6, 4 }
 0x195   : > { %7791 = vst [vmem:[#allocation21_spill] sm:$0xff] %v5052_v46  ;;  %v1222_v19 = vrot.slane %v1081_v51, 1  ;;  %v7615_v21 = vrot.slane %v5088_v8, 1  ;;  %v1463_v26 = vrot.slane %v1081_v51, 2  ;;  %v7614_v27 = vrot.slane %v5088_v8, 2  ;;  %v5122_v46 = vld [vmem:[#allocation2 + $0x170] sm:$0xff] }
 0x196   : > { %7792 = vst [vmem:[#allocation22_spill] sm:$0xff] %v5055_v34  ;;  %4379 = vmatmul.msk.f32.gmra.mxu2 %vm677_vm3, %v4767_v50  ;;  %v1704_v28 = vrot.slane %v1081_v51, 3  ;;  %v1944_v31 = vrot.slane %v1081_v51, 4  ;;  %v5115_v32 = vmax.f32 %v1005_v35, %v4983_v57  ;;  %v5120_v34 = vld [vmem:[#allocation2 + $0x168] sm:$0xff]  ;;  %v5131_v35 = vld [vmem:[#allocation2 + $0x180] sm:$0xff] }
 0x197   : > { %7793 = vst [vmem:[#allocation23_spill] sm:$0xff] %v5064_v56  ;;  %v1223_v45 = vsel %vm1192_vm1, %v1221_v13, %v1222_v19  ;;  %v1225_v50 = vsel %vm1192_vm1, %v1222_v19, %v7615_v21  ;;  %v1464_v63 = vsel %vm1433_vm2, %v1462_v14, %v1463_v26  ;;  %v1466_v49 = vsel %vm1433_vm2, %v1463_v26, %v7614_v27  ;;  %v5159_v56 = vld [vmem:[#allocation2 + $0x1a8] sm:$0xff] }
 0x198   : > { %7794 = vst [vmem:[#allocation24_spill] sm:$0xff] %v5067_v61  ;;  %v1386_v13 = vmax.f32 %v1081_v51, %v1225_v50  ;;  %v5125_v14 = vmax.f32 %v1012_v62, %v5011_v17  ;;  %v1705_v19 = vsel %vm1674_vm4, %v1703_v15, %v1704_v28  ;;  %v7800_v26 = vrot.slane %v5088_v8, 3  ;;  %v799_v51 = vld [vmem:[#allocation2 + $0x38] sm:$0xff]  ;;  %v5141_v15 = vld [vmem:[#allocation2 + $0x190] sm:$0xff] }
 0x199   : > { %7795 = vst [vmem:[#allocation25_spill] sm:$0xff] %v5072_v47  ;;  %v1385_v47 = vmax.f32 %v1080_v6, %v1223_v45  ;;  %v795_v6 = vld [vmem:[#allocation2 + $0x18] sm:$0xff]  ;;  %v5136_v45 = vmax.f32 %v1013_v0, %v5025_v24  ;;  %v1945_v62 = vsel %vm416_vm0, %v1943_v18, %v1944_v31  ;;  %v973_v61 = vmax.f32 %v909_v11, %v5120_v34 }
 0x19a   : > { %7796 = vst [vmem:[#allocation26_spill] sm:$0xff] %v5082_v5  ;;  %v5118_v5 = vmax.f32 %v1006_v42, %v4985_v59  ;;  %v1707_v27 = vsel %vm1674_vm4, %v1704_v28, %v7800_v26  ;;  %v910_v42 = vmax.f32 %v5100_v39, %v5102_v44  ;;  %v1627_v21 = vmax.f32 %v1386_v13, %v1466_v49  ;;  %v5153_v49 = vld [vmem:[#allocation2 + $0x98] sm:$0xff] }
 0x19b   : > { %7797 = vst [vmem:[#allocation27_spill] sm:$0xff] %v5115_v32  ;;  %v1626_v50 = vmax.f32 %v1385_v47, %v1464_v63  ;;  %v7802_v28 = vrot.slane %v5088_v8, 4  ;;  %v972_v32 = vmax.f32 %v908_v9, %v5112_v29  ;;  %v5151_v47 = vld [vmem:[#allocation2 + $0x58] sm:$0xff] }
 0x19c   : > { %7798 = vst [vmem:[#allocation28_spill] sm:$0xff] %v5118_v5  ;;  %v5143_v5 = vld [vmem:[#allocation2 + $0x78] sm:$0xff]  ;;  %v974_v0 = vmax.f32 %v910_v42, %v5122_v46  ;;  %v1868_v13 = vmax.f32 %v1627_v21, %v1707_v27  ;;  %v879_v9 = vmax.f32 %v799_v51, %v5151_v47  ;;  %v7807_v27 = vmax.f32 %v5020_v22, %v4997_v4 }
 0x19d   : > { %7799 = vst [vmem:[#allocation29_spill] sm:$0xff] %v5125_v14  ;;  %v5139_v14 = vld [vmem:[#allocation2 + $0x188] sm:$0xff]  ;;  %v1947_v26 = vsel %vm416_vm0, %v1944_v31, %v7802_v28  ;;  %v5155_v18 = vld [vmem:[#allocation2 + $0xb8] sm:$0xff]  ;;  %v1867_v63 = vmax.f32 %v1626_v50, %v1705_v19  ;;  %v875_v31 = vmax.f32 %v795_v6, %v799_v51  ;;  %v1036_v11 = vmax.f32 %v972_v32, %v5131_v35 }
 0x19e   : > { %7801 = vst [vmem:[#allocation30_spill] sm:$0xff] %v5136_v45  ;;  %v5157_v45 = vld [vmem:[#allocation2 + $0x1a0] sm:$0xff]  ;;  %v1037_v42 = vmax.f32 %v973_v61, %v5139_v14  ;;  %v1038_v28 = vmax.f32 %v974_v0, %v5141_v15  ;;  %4380 = vmatmul.msk.f32.gmra.mxu2 %vm677_vm3, %v4774_v58  ;;  %v887_v21 = vmax.f32 %v5143_v5, %v5153_v49 }
 0x19f   : > { %7803 = vst [vmem:[#allocation31_spill] sm:$0xff] %v5155_v18  ;;  %v5175_v19 = vmax.f32 %v7807_v27, %v5027_v25  ;;  %v5177_v6 = vmax.f32 %v1867_v63, %v1945_v62  ;;  %v5179_v51 = vmax.f32 %v1868_v13, %v1947_v26  ;;  %v891_v61 = vmax.f32 %v5153_v49, %v5155_v18 }
 0x1a0   : > { %7804 = vst [vmem:[#allocation32_spill] sm:$0xff] %v5157_v45  ;;  %v1100_v32 = vmax.f32 %v1036_v11, %v5157_v45  ;;  %v1101_v58 = vmax.f32 %v1037_v42, %v5159_v56  ;;  %v5186_v50 = vmax.f32 %v1038_v28, %v5161_v41  ;;  %v5189_v0 = vmax.f32 %v879_v9, %v5143_v5 }
 0x1a1   : > { %7805 = vst [vmem:[#allocation33_spill] sm:$0xff] %v5159_v56  ;;  %v2180_v22 = vrot.slane %v5177_v6, 6  ;;  %v7628_v62 = vrot.slane %v5179_v51, 6  ;;  %v939_v26 = vmax.f32 %v875_v31, %v5151_v47  ;;  %v5195_v63 = vmax.f32 %v887_v21, %v5155_v18 }
 0x1a2   : > { %7806 = vst [vmem:[#allocation34_spill] sm:$0xff] %v5161_v41  ;;  %v1256_v13 = vrot.slane %v1100_v32, 1  ;;  %v1257_v27 = vrot.slane %v1101_v58, 1  ;;  %v7629_v11 = vrot.slane %v5186_v50, 1  ;;  %v1497_v42 = vrot.slane %v1100_v32, 2 }
 0x1a3   : > { %7808 = vst [vmem:[#allocation35_spill] sm:$0xff] %v5175_v19  ;;  %v2182_v28 = vsel %vm2179_vm15, %v2180_v22, %v7628_v62  ;;  %v1498_v9 = vrot.slane %v1101_v58, 2  ;;  %v7635_v19 = vrot.slane %v5186_v50, 2  ;;  %v1738_v33 = vrot.slane %v1100_v32, 3 }
 0x1a4   : > { %7809 = vst [vmem:[#allocation36_spill] sm:$0xff] %v5177_v6  ;;  %4360 = vmatmul.msk.f32.vlgmr.msra.gmra.mxu1 %vm677_vm3, %v2182_v28  ;;  %v1258_v31 = vsel %vm1192_vm1, %v1256_v13, %v1257_v27  ;;  %v1260_v21 = vsel %vm1192_vm1, %v1257_v27, %v7629_v11  ;;  %v1739_v40 = vrot.slane %v1101_v58, 3  ;;  %v7633_v20 = vrot.slane %v5186_v50, 3 }
 0x1a5   : > { %v1405_v12 = vmax.f32 %v1100_v32, %v1258_v31  ;;  %v1406_v7 = vmax.f32 %v1101_v58, %v1260_v21  ;;  %v1499_v22 = vsel %vm1433_vm2, %v1497_v42, %v1498_v9  ;;  %v1501_v62 = vsel %vm1433_vm2, %v1498_v9, %v7635_v19  ;;  %v5224_v9 = vld [vmem:[#allocation2 + $0x138] sm:$0xff] }
 0x1a6   : > { %v1740_v28 = vsel %vm1674_vm4, %v1738_v33, %v1739_v40  ;;  %v1742_v13 = vsel %vm1674_vm4, %v1739_v40, %v7633_v20  ;;  %v1978_v27 = vrot.slane %v1100_v32, 4  ;;  %v1979_v11 = vrot.slane %v1101_v58, 4  ;;  %4381 = vmatmul.msk.f32.gmra.mxu2 %vm677_vm3, %v4781_v2  ;;  %7810 = vst [vmem:[#allocation37_spill] sm:$0xff] %v5224_v9  ;;  %v5226_v33 = vld [vmem:[#allocation2 + $0x158] sm:$0xff] }
 0x1a7   : > { %v1646_v31 = vmax.f32 %v1405_v12, %v1499_v22  ;;  %v1647_v21 = vmax.f32 %v1406_v7, %v1501_v62  ;;  %v7634_v42 = vrot.slane %v5186_v50, 4  ;;  %v955_v6 = vmax.f32 %v891_v61, %v5208_v16  ;;  %7811 = vst [vmem:[#allocation38_spill] sm:$0xff] %v5226_v33  ;;  %v5231_v58 = vld [vmem:[#allocation2 + $0x118] sm:$0xff] }
 0x1a8   : > { %v1980_v32 = vsel %vm416_vm0, %v1978_v27, %v1979_v11  ;;  %7812 = vst [vmem:[#allocation39_spill] sm:$0xff] %v5231_v58  ;;  %v1003_v20 = vmax.f32 %v939_v26, %v5143_v5  ;;  %v5240_v22 = vld [vmem:[#allocation2 + $0x178] sm:$0xff]  ;;  %v893_v2 = vmax.f32 %v4983_v57, %v4995_v3 }
 0x1a9   : > { %v1887_v7 = vmax.f32 %v1646_v31, %v1740_v28  ;;  %v1888_v12 = vmax.f32 %v1647_v21, %v1742_v13  ;;  %v1982_v61 = vsel %vm416_vm0, %v1979_v11, %v7634_v42  ;;  %v1019_v62 = vmax.f32 %v955_v6, %v5218_v1  ;;  %7813 = vst [vmem:[#allocation40_spill] sm:$0xff] %v5240_v22  ;;  %v5258_v21 = vld [vmem:[#allocation2 + $0x198] sm:$0xff] }
 0x1aa   : > { %v5247_v26 = vmax.f32 %v1003_v20, %v5153_v49  ;;  %v911_v28 = vmax.f32 %v5224_v9, %v5226_v33  ;;  %v892_v20 = vmax.f32 %v4979_v53, %v4987_v60  ;;  %v7818_v53 = vrot.slane %v5088_v8, 2 }
 0x1ab   : > { %v5251_v13 = vmax.f32 %v1887_v7, %v1980_v32  ;;  %v5253_v31 = vmax.f32 %v1888_v12, %v1982_v61  ;;  %v1083_v11 = vmax.f32 %v1019_v62, %v5231_v58  ;;  %v894_v32 = vmax.f32 %v4985_v59, %v4997_v4  ;;  %v5269_v62 = vld [vmem:[#allocation2 + $0x1b8] sm:$0xff] }
 0x1ac   : > { %7814 = vst [vmem:[#allocation41_spill] sm:$0xff] %v5247_v26  ;;  %v975_v27 = vmax.f32 %v911_v28, %v5240_v22  ;;  %v956_v19 = vmax.f32 %v892_v20, %v5011_v17  ;;  %v7817_v59 = vrot.slane %v5088_v8, 1  ;;  %v7819_v20 = vrot.slane %v5088_v8, 3 }
 0x1ad   : > { %7815 = vst [vmem:[#allocation42_spill] sm:$0xff] %v5251_v13  ;;  %v2205_v7 = vrot.slane %v5251_v13, 6  ;;  %v7644_v12 = vrot.slane %v5253_v31, 6  ;;  %v1226_v61 = vrot.slane %v1083_v11, 1  ;;  %v1467_v6 = vrot.slane %v1083_v11, 2 }
 0x1ae   : > { %7816 = vst [vmem:[#allocation43_spill] sm:$0xff] %v5253_v31  ;;  %v1708_v40 = vrot.slane %v1083_v11, 3  ;;  %v1948_v42 = vrot.slane %v1083_v11, 4  ;;  %v1039_v28 = vmax.f32 %v975_v27, %v5258_v21  ;;  %4382 = vmatmul.msk.f32.gmra.mxu2 %vm677_vm3, %v4788_v10  ;;  %v7820_v4 = vrot.slane %v5088_v8, 4 }
 0x1af   : > { %v2207_v57 = vsel %vm2179_vm15, %v2205_v7, %v7644_v12  ;;  %v1227_v13 = vsel %vm1192_vm1, %v7817_v59, %v1226_v61  ;;  %v1388_v26 = vmax.f32 %v1083_v11, %v1226_v61  ;;  %v1468_v9 = vsel %vm1433_vm2, %v7818_v53, %v1467_v6 }
 0x1b0   : > { %4370 = vmatmul.msk.f32.vlgmr.msrb.gmra.mxu3 %vm677_vm3, %v2207_v57  ;;  %v1387_v27 = vmax.f32 %v5088_v8, %v1227_v13  ;;  %v1709_v10 = vsel %vm1674_vm4, %v7819_v20, %v1708_v40  ;;  %v1949_v7 = vsel %vm416_vm0, %v7820_v4, %v1948_v42  ;;  %v1103_v12 = vmax.f32 %v1039_v28, %v5269_v62 }
 0x1b1   : > { %v1629_v59 = vmax.f32 %v1388_v26, %v1467_v6  ;;  %v957_v11 = vmax.f32 %v893_v2, %v5025_v24  ;;  %v958_v61 = vmax.f32 %v894_v32, %v5027_v25  ;;  %v1020_v53 = vmax.f32 %v956_v19, %v5031_v30 }
 0x1b2   : > { %v1628_v57 = vmax.f32 %v1387_v27, %v1468_v9  ;;  %v1261_v58 = vrot.slane %v1103_v12, 1  ;;  %v1502_v13 = vrot.slane %v1103_v12, 2  ;;  %v1743_v3 = vrot.slane %v1103_v12, 3 }
 0x1b3   : > { %v1870_v52 = vmax.f32 %v1629_v59, %v1708_v40  ;;  %v1983_v60 = vrot.slane %v1103_v12, 4  ;;  %v1021_v20 = vmax.f32 %v957_v11, %v5039_v36  ;;  %v1022_v8 = vmax.f32 %v958_v61, %v5041_v38 }
 0x1b4   : > { %v1869_v4 = vmax.f32 %v1628_v57, %v1709_v10  ;;  %v7821_v28 = vrot.slane %v5186_v50, 1  ;;  %v1408_v2 = vmax.f32 %v1103_v12, %v1261_v58  ;;  %v7822_v6 = vrot.slane %v5186_v50, 2 }
 0x1b5   : > { %v5304_v9 = vmax.f32 %v1870_v52, %v1948_v42  ;;  %v7823_v40 = vrot.slane %v5186_v50, 3  ;;  %v7824_v59 = vrot.slane %v5186_v50, 4  ;;  %v1085_v12 = vmax.f32 %v1021_v20, %v5057_v48 }
 0x1b6   : > { %v1262_v26 = vsel %vm1192_vm1, %v7821_v28, %v1261_v58  ;;  %v1503_v19 = vsel %vm1433_vm2, %v7822_v6, %v1502_v13  ;;  %v5313_v11 = vmax.f32 %v1869_v4, %v1949_v7  ;;  %v1649_v61 = vmax.f32 %v1408_v2, %v1502_v13  ;;  %4383 = vmatmul.msk.f32.gmra.mxu2 %vm677_vm3, %v4796_v23 }
 0x1b7   : > { %v1407_v32 = vmax.f32 %v5186_v50, %v1262_v26  ;;  %v1744_v27 = vsel %vm1674_vm4, %v7823_v40, %v1743_v3  ;;  %v1984_v10 = vsel %vm416_vm0, %v7824_v59, %v1983_v60  ;;  %v1084_v58 = vmax.f32 %v1020_v53, %v5047_v43 }
 0x1b8   : > { %v5320_v42 = vmax.f32 %v1022_v8, %v5100_v39  ;;  %v912_v57 = vmax.f32 %v5059_v54, %v5112_v29  ;;  %v913_v50 = vmax.f32 %v5061_v55, %v5120_v34  ;;  %v2183_v7 = vrot.slane %v5313_v11, 6 }
 0x1b9   : > { %v1648_v52 = vmax.f32 %v1407_v32, %v1503_v19  ;;  %v1890_v13 = vmax.f32 %v1649_v61, %v1743_v3  ;;  %v1228_v4 = vrot.slane %v1084_v58, 1  ;;  %v1229_v53 = vrot.slane %v1085_v12, 1 }
 0x1ba   : > { %v7654_v20 = vrot.slane %v5320_v42, 1  ;;  %v1469_v26 = vrot.slane %v1084_v58, 2  ;;  %v1470_v23 = vrot.slane %v1085_v12, 2  ;;  %v7825_v2 = vrot.slane %v5179_v51, 6 }
 0x1bb   : > { %v1889_v28 = vmax.f32 %v1648_v52, %v1744_v27  ;;  %v5331_v6 = vmax.f32 %v1890_v13, %v1983_v60  ;;  %v1230_v19 = vsel %vm1192_vm1, %v1228_v4, %v1229_v53  ;;  %v7653_v32 = vrot.slane %v5320_v42, 2 }
 0x1bc   : > { %v2184_v8 = vsel %vm2179_vm15, %v7825_v2, %v2183_v7  ;;  %v1232_v40 = vsel %vm1192_vm1, %v1229_v53, %v7654_v20  ;;  %v1389_v27 = vmax.f32 %v1084_v58, %v1230_v19  ;;  %v1471_v59 = vsel %vm1433_vm2, %v1469_v26, %v1470_v23 }
 0x1bd   : > { %7826 = vst [vmem:[#allocation44_spill] sm:$0xff] %v5331_v6  ;;  %4361 = vmatmul.msk.f32.gmra.mxu1 %vm677_vm3, %v2184_v8  ;;  %v5336_v3 = vmax.f32 %v1889_v28, %v1984_v10  ;;  %v1390_v61 = vmax.f32 %v1085_v12, %v1232_v40  ;;  %v1473_v60 = vsel %vm1433_vm2, %v1470_v23, %v7653_v32  ;;  %v1710_v52 = vrot.slane %v1084_v58, 3 }
 0x1be   : > { %v1711_v7 = vrot.slane %v1085_v12, 3  ;;  %v1630_v4 = vmax.f32 %v1389_v27, %v1471_v59  ;;  %v7652_v10 = vrot.slane %v5320_v42, 3  ;;  %v1950_v28 = vrot.slane %v1084_v58, 4  ;;  %4384 = vmatmul.msk.f32.gmra.mxu2 %vm677_vm3, %v4805_v37 }
 0x1bf   : > { %7827 = vst [vmem:[#allocation45_spill] sm:$0xff] %v5336_v3  ;;  %v2208_v13 = vrot.slane %v5336_v3, 6  ;;  %v1631_v2 = vmax.f32 %v1390_v61, %v1473_v60  ;;  %v1951_v53 = vrot.slane %v1085_v12, 4  ;;  %v7651_v19 = vrot.slane %v5320_v42, 4 }
 0x1c0   : > { %v1712_v8 = vsel %vm1674_vm4, %v1710_v52, %v1711_v7  ;;  %v7828_v26 = vrot.slane %v5253_v31, 6  ;;  %v1714_v40 = vsel %vm1674_vm4, %v1711_v7, %v7652_v10  ;;  %v914_v58 = vmax.f32 %v5102_v44, %v5122_v46 }
 0x1c1   : > { %v1871_v27 = vmax.f32 %v1630_v4, %v1712_v8  ;;  %v1872_v59 = vmax.f32 %v1631_v2, %v1714_v40  ;;  %v1952_v37 = vsel %vm416_vm0, %v1950_v28, %v1951_v53  ;;  %v1954_v61 = vsel %vm416_vm0, %v1951_v53, %v7651_v19  ;;  %v3365_v2 = vld [vmem:[%s7607_s3 + $0x4] sm:$0x3]  ;;  %v7840_v40 = vld [vmem:[#allocation5_spill] sm:$0xff] }
 0x1c2   : > { %v2209_v23 = vsel %vm2179_vm15, %v7828_v26, %v2208_v13  ;;  %v7829_v60 = vmax.f32 %v5151_v47, %v5143_v5  ;;  %v7831_v7 = vmax.f32 %v5189_v0, %v5153_v49  ;;  %v976_v28 = vmax.f32 %v912_v57, %v5131_v35  ;;  %v5392_v53 = vld [vmem:[#allocation2 + $0x1c0] sm:$0xff]  ;;  %4393 = vmatpush.msk.msra.mxu3 %vm2179_vm15, %v3365_v2 }
 0x1c3   : > { %4371 = vmatmul.msk.f32.gmra.mxu3 %vm677_vm3, %v2209_v23  ;;  %v5378_v4 = vmax.f32 %v1871_v27, %v1952_v37  ;;  %v7833_v5 = vmax.f32 %v5195_v63, %v5208_v16  ;;  %v5390_v8 = vmax.f32 %v1872_v59, %v1954_v61  ;;  %7835 = vst [vmem:[#allocation49_spill] sm:$0xff] %v5392_v53  ;;  %v5402_v63 = vld [vmem:[#allocation2 + $0x1d0] sm:$0xff]  ;;  %v7839_v27 = vld [vmem:[#allocation12_spill] sm:$0xff] }
 0x1c4   : > { %v5370_v52 = vmax.f32 %v7829_v60, %v5153_v49  ;;  %v5376_v13 = vmax.f32 %v7831_v7, %v5155_v18  ;;  %v5394_v49 = vld [vmem:[#allocation2 + $0x1c8] sm:$0xff]  ;;  %v977_v0 = vmax.f32 %v913_v50, %v5139_v14  ;;  %v978_v57 = vmax.f32 %v914_v58, %v5141_v15  ;;  %7837 = vst [vmem:[#allocation51_spill] sm:$0xff] %v5402_v63 }
 0x1c5   : > { %v5388_v47 = vmax.f32 %v7833_v5, %v5218_v1  ;;  %7836 = vst [vmem:[#allocation50_spill] sm:$0xff] %v5394_v49  ;;  %v2185_v23 = vrot.slane %v5378_v4, 6  ;;  %v7650_v59 = vrot.slane %v5390_v8, 6  ;;  %v1040_v58 = vmax.f32 %v976_v28, %v5157_v45 }
 0x1c6   : > { %7830 = vst [vmem:[#allocation46_spill] sm:$0xff] %v5370_v52  ;;  %v1041_v37 = vmax.f32 %v977_v0, %v5159_v56  ;;  %v7838_v61 = vmax.f32 %v5131_v35, %v5157_v45  ;;  %v1042_v7 = vmax.f32 %v978_v57, %v5161_v41  ;;  %v895_v2 = vmax.f32 %v5155_v18, %v5208_v16 }
 0x1c7   : > { %7832 = vst [vmem:[#allocation47_spill] sm:$0xff] %v5376_v13  ;;  %v915_v5 = vmax.f32 %v5226_v33, %v5240_v22  ;;  %v2187_v28 = vsel %vm2179_vm15, %v2185_v23, %v7650_v59  ;;  %v1104_v0 = vmax.f32 %v1040_v58, %v5392_v53  ;;  %4385 = vmatmul.msk.f32.gmra.mxu2 %vm677_vm3, %v7840_v40  ;;  %v7841_v23 = vld [vmem:[#allocation13_spill] sm:$0xff]  ;;  %v5451_v33 = vld [vmem:[#allocation2 + $0x1d8] sm:$0xff] }
 0x1c8   : > { %7834 = vst [vmem:[#allocation48_spill] sm:$0xff] %v5388_v47  ;;  %v5417_v60 = vmax.f32 %v7838_v61, %v5392_v53  ;;  %v1105_v50 = vmax.f32 %v1041_v37, %v5394_v49  ;;  %v896_v61 = vmax.f32 %v7839_v27, %v5011_v17  ;;  %4362 = vmatmul.msk.f32.gmra.mxu1 %vm677_vm3, %v2187_v28 }
 0x1c9   : > { %v5435_v57 = vmax.f32 %v1042_v7, %v5402_v63  ;;  %v959_v26 = vmax.f32 %v895_v2, %v5218_v1  ;;  %v979_v12 = vmax.f32 %v915_v5, %v5258_v21  ;;  %v897_v58 = vmax.f32 %v7841_v23, %v5025_v24 }
 0x1ca   : > { %v1263_v59 = vrot.slane %v1104_v0, 1  ;;  %v1264_v37 = vrot.slane %v1105_v50, 1  ;;  %v1504_v19 = vrot.slane %v1104_v0, 2  ;;  %v1505_v10 = vrot.slane %v1105_v50, 2 }
 0x1cb   : > { %v1266_v27 = vrot.slane %v5435_v57, 1  ;;  %v1507_v40 = vrot.slane %v5435_v57, 2  ;;  %v1745_v32 = vrot.slane %v1104_v0, 3  ;;  %v1746_v28 = vrot.slane %v1105_v50, 3 }
 0x1cc   : > { %v1265_v7 = vsel %vm1192_vm1, %v1263_v59, %v1264_v37  ;;  %v1506_v20 = vsel %vm1433_vm2, %v1504_v19, %v1505_v10  ;;  %v1748_v2 = vrot.slane %v5435_v57, 3  ;;  %v1985_v5 = vrot.slane %v1104_v0, 4  ;;  %v7842_v19 = vld [vmem:[#allocation39_spill] sm:$0xff] }
 0x1cd   : > { %v1267_v6 = vsel %vm1192_vm1, %v1264_v37, %v1266_v27  ;;  %v1409_v23 = vmax.f32 %v1104_v0, %v1265_v7  ;;  %v1508_v3 = vsel %vm1433_vm2, %v1505_v10, %v1507_v40  ;;  %v1747_v31 = vsel %vm1674_vm4, %v1745_v32, %v1746_v28  ;;  %v7843_v37 = vld [vmem:[#allocation14_spill] sm:$0xff] }
 0x1ce   : > { %v1410_v47 = vmax.f32 %v1105_v50, %v1267_v6  ;;  %v1749_v13 = vsel %vm1674_vm4, %v1746_v28, %v1748_v2  ;;  %v1986_v52 = vrot.slane %v1105_v50, 4  ;;  %v1988_v18 = vrot.slane %v5435_v57, 4  ;;  %v7845_v28 = vld [vmem:[#allocation6_spill] sm:$0xff] }
 0x1cf   : > { %v1650_v59 = vmax.f32 %v1409_v23, %v1506_v20  ;;  %v1023_v24 = vmax.f32 %v959_v26, %v7842_v19  ;;  %v1043_v17 = vmax.f32 %v979_v12, %v5269_v62  ;;  %v898_v0 = vmax.f32 %v7843_v37, %v5027_v25  ;;  %4386 = vmatmul.msk.f32.gmra.mxu2 %vm677_vm3, %v7845_v28  ;;  %v7846_v26 = vld [vmem:[#allocation37_spill] sm:$0xff] }
 0x1d0   : > { %v1651_v32 = vmax.f32 %v1410_v47, %v1508_v3  ;;  %v1987_v6 = vsel %vm416_vm0, %v1985_v5, %v1986_v52  ;;  %v960_v50 = vmax.f32 %v896_v61, %v5031_v30  ;;  %v1989_v20 = vsel %vm416_vm0, %v1986_v52, %v1988_v18 }
 0x1d1   : > { %v1891_v22 = vmax.f32 %v1650_v59, %v1747_v31  ;;  %v1087_v23 = vmax.f32 %v1023_v24, %v7846_v26  ;;  %v1107_v12 = vmax.f32 %v1043_v17, %v5451_v33  ;;  %v961_v37 = vmax.f32 %v897_v58, %v5039_v36 }
 0x1d2   : > { %v1892_v19 = vmax.f32 %v1651_v32, %v1749_v13  ;;  %v962_v7 = vmax.f32 %v898_v0, %v5041_v38  ;;  %v1024_v3 = vmax.f32 %v960_v50, %v5047_v43  ;;  %v7849_v17 = vrot.slane %v5320_v42, 1  ;;  %v7853_v38 = vld [vmem:[#allocation7_spill] sm:$0xff] }
 0x1d3   : > { %v5469_v47 = vmax.f32 %v1891_v22, %v1987_v6  ;;  %v1233_v61 = vrot.slane %v1087_v23, 1  ;;  %v1474_v5 = vrot.slane %v1087_v23, 2  ;;  %v1715_v10 = vrot.slane %v1087_v23, 3 }
 0x1d4   : > { %v5471_v28 = vmax.f32 %v1892_v19, %v1989_v20  ;;  %v1955_v31 = vrot.slane %v1087_v23, 4  ;;  %v1268_v52 = vrot.slane %v1107_v12, 1  ;;  %v1509_v59 = vrot.slane %v1107_v12, 2 }
 0x1d5   : > { %7847 = vst [vmem:[#allocation12_spill] sm:$0xff] %v5469_v47  ;;  %v2210_v24 = vrot.slane %v5469_v47, 6  ;;  %v1234_v13 = vsel %vm1192_vm1, %v7849_v17, %v1233_v61  ;;  %v1392_v58 = vmax.f32 %v1087_v23, %v1233_v61  ;;  %v7850_v0 = vrot.slane %v5320_v42, 2 }
 0x1d6   : > { %7848 = vst [vmem:[#allocation5_spill] sm:$0xff] %v5471_v28  ;;  %v2211_v32 = vrot.slane %v5471_v28, 6  ;;  %v1391_v6 = vmax.f32 %v5320_v42, %v1234_v13  ;;  %v7851_v19 = vrot.slane %v5320_v42, 3  ;;  %v7852_v20 = vrot.slane %v5320_v42, 4 }
 0x1d7   : > { %v1475_v22 = vsel %vm1433_vm2, %v7850_v0, %v1474_v5  ;;  %v1633_v43 = vmax.f32 %v1392_v58, %v1474_v5  ;;  %v1269_v17 = vsel %vm1192_vm1, %v1266_v27, %v1268_v52  ;;  %v1412_v23 = vmax.f32 %v1107_v12, %v1268_v52  ;;  %4387 = vmatmul.msk.f32.gmra.mxu2 %vm677_vm3, %v7853_v38 }
 0x1d8   : > { %v1716_v50 = vsel %vm1674_vm4, %v7851_v19, %v1715_v10  ;;  %v1956_v47 = vsel %vm416_vm0, %v7852_v20, %v1955_v31  ;;  %v1510_v61 = vsel %vm1433_vm2, %v1507_v40, %v1509_v59  ;;  %v2212_v0 = vsel %vm2179_vm15, %v2210_v24, %v2211_v32 }
 0x1d9   : > { %v1632_v25 = vmax.f32 %v1391_v6, %v1475_v22  ;;  %v1411_v28 = vmax.f32 %v5435_v57, %v1269_v17  ;;  %v1750_v13 = vrot.slane %v1107_v12, 3  ;;  %4372 = vmatmul.msk.f32.gmra.mxu3 %vm677_vm3, %v2212_v0  ;;  %v1874_v42 = vmax.f32 %v1633_v43, %v1715_v10 }
 0x1da   : > { %v1653_v19 = vmax.f32 %v1412_v23, %v1509_v59  ;;  %v1990_v20 = vrot.slane %v1107_v12, 4  ;;  %v1025_v5 = vmax.f32 %v961_v37, %v5057_v48  ;;  %v1026_v24 = vmax.f32 %v962_v7, %v5100_v39 }
 0x1db   : > { %v1873_v27 = vmax.f32 %v1632_v25, %v1716_v50  ;;  %v1652_v52 = vmax.f32 %v1411_v28, %v1510_v61  ;;  %v1751_v40 = vsel %vm1674_vm4, %v1748_v2, %v1750_v13  ;;  %v5498_v58 = vmax.f32 %v1874_v42, %v1955_v31 }
 0x1dc   : > { %v1894_v57 = vmax.f32 %v1653_v19, %v1750_v13  ;;  %v1991_v22 = vsel %vm416_vm0, %v1988_v18, %v1990_v20  ;;  %v1088_v38 = vmax.f32 %v1024_v3, %v5059_v54  ;;  %v1089_v10 = vmax.f32 %v1025_v5, %v5061_v55  ;;  %v7857_v19 = vld [vmem:[#allocation8_spill] sm:$0xff] }
 0x1dd   : > { %v5502_v6 = vmax.f32 %v1873_v27, %v1956_v47  ;;  %v1893_v43 = vmax.f32 %v1652_v52, %v1751_v40  ;;  %v5506_v12 = vmax.f32 %v1026_v24, %v5102_v44  ;;  %v916_v47 = vmax.f32 %v5112_v29, %v5131_v35 }
 0x1de   : > { %v5510_v2 = vmax.f32 %v1894_v57, %v1990_v20  ;;  %v1235_v7 = vrot.slane %v1088_v38, 1  ;;  %v1476_v37 = vrot.slane %v1088_v38, 2  ;;  %v1236_v3 = vrot.slane %v1089_v10, 1 }
 0x1df   : > { %v2188_v28 = vrot.slane %v5502_v6, 6  ;;  %v5513_v18 = vmax.f32 %v1893_v43, %v1991_v22  ;;  %v7678_v31 = vrot.slane %v5506_v12, 1  ;;  %v1477_v59 = vrot.slane %v1089_v10, 2  ;;  %4388 = vmatmul.msk.f32.gmra.mxu2 %vm677_vm3, %v7857_v19 }
 0x1e0   : > { %7854 = vst [vmem:[#allocation13_spill] sm:$0xff] %v5510_v2  ;;  %v7677_v50 = vrot.slane %v5506_v12, 2  ;;  %v1717_v17 = vrot.slane %v1088_v38, 3  ;;  %v7856_v23 = vrot.slane %v5390_v8, 6  ;;  %v1237_v13 = vsel %vm1192_vm1, %v1235_v7, %v1236_v3 }
 0x1e1   : > { %7855 = vst [vmem:[#allocation14_spill] sm:$0xff] %v5513_v18  ;;  %v2213_v0 = vrot.slane %v5513_v18, 6  ;;  %v1718_v42 = vrot.slane %v1089_v10, 3  ;;  %v1239_v35 = vsel %vm1192_vm1, %v1236_v3, %v7678_v31  ;;  %v1393_v20 = vmax.f32 %v1088_v38, %v1237_v13 }
 0x1e2   : > { %v2189_v61 = vsel %vm2179_vm15, %v7856_v23, %v2188_v28  ;;  %v1478_v5 = vsel %vm1433_vm2, %v1476_v37, %v1477_v59  ;;  %v1480_v27 = vsel %vm1433_vm2, %v1477_v59, %v7677_v50  ;;  %v1394_v40 = vmax.f32 %v1089_v10, %v1239_v35 }
 0x1e3   : > { %4363 = vmatmul.msk.f32.gmra.mxu1 %vm677_vm3, %v2189_v61  ;;  %v2214_v52 = vsel %vm2179_vm15, %v2211_v32, %v2213_v0  ;;  %v1719_v24 = vsel %vm1674_vm4, %v1717_v17, %v1718_v42  ;;  %v7676_v57 = vrot.slane %v5506_v12, 3  ;;  %v1634_v22 = vmax.f32 %v1393_v20, %v1478_v5  ;;  %v5570_v20 = vld [vmem:[#allocation2 + $0x1e0] sm:$0xff]  ;;  %v857_v0 = vld [vmem:[#allocation2 + $0x208] sm:$0xff] }
 0x1e4   : > { %4373 = vmatmul.msk.f32.gmra.mxu3 %vm677_vm3, %v2214_v52  ;;  %v1957_v43 = vrot.slane %v1088_v38, 4  ;;  %v1958_v7 = vrot.slane %v1089_v10, 4  ;;  %v7675_v28 = vrot.slane %v5506_v12, 4  ;;  %v1635_v3 = vmax.f32 %v1394_v40, %v1480_v27  ;;  %7863 = vst [vmem:[#allocation7_spill] sm:$0xff] %v5570_v20  ;;  %v5576_v52 = vld [vmem:[#allocation2 + $0x1e8] sm:$0xff] }
 0x1e5   : > { %v1721_v37 = vsel %vm1674_vm4, %v1718_v42, %v7676_v57  ;;  %v917_v32 = vmax.f32 %v5120_v34, %v5139_v14  ;;  %v918_v59 = vmax.f32 %v5122_v46, %v5141_v15  ;;  %v7858_v17 = vmax.f32 %v5139_v14, %v5159_v56  ;;  %7864 = vst [vmem:[#allocation8_spill] sm:$0xff] %v5576_v52  ;;  %v7868_v57 = vld [vmem:[#allocation10_spill] sm:$0xff] }
 0x1e6   : > { %v1875_v38 = vmax.f32 %v1634_v22, %v1719_v24  ;;  %v1959_v10 = vsel %vm416_vm0, %v1957_v43, %v1958_v7  ;;  %v1961_v61 = vsel %vm416_vm0, %v1958_v7, %v7675_v28  ;;  %v7859_v13 = vmax.f32 %v5141_v15, %v5161_v41  ;;  %v5583_v22 = vld [vmem:[#allocation2 + $0x1f0] sm:$0xff]  ;;  %v5585_v43 = vld [vmem:[#allocation2 + $0x200] sm:$0xff] }
 0x1e7   : > { %v5550_v23 = vmax.f32 %v7858_v17, %v5394_v49  ;;  %v7861_v14 = vmax.f32 %v5258_v21, %v5269_v62  ;;  %v1876_v35 = vmax.f32 %v1635_v3, %v1721_v37  ;;  %v980_v40 = vmax.f32 %v916_v47, %v5157_v45  ;;  %7865 = vst [vmem:[#allocation52_spill] sm:$0xff] %v5583_v22  ;;  %v7867_v17 = vld [vmem:[#allocation9_spill] sm:$0xff] }
 0x1e8   : > { %v5562_v42 = vmax.f32 %v7859_v13, %v5402_v63  ;;  %v5574_v27 = vmax.f32 %v1875_v38, %v1959_v10  ;;  %7866 = vst [vmem:[#allocation53_spill] sm:$0xff] %v5585_v43  ;;  %v981_v3 = vmax.f32 %v917_v32, %v5159_v56  ;;  %v982_v37 = vmax.f32 %v918_v59, %v5161_v41  ;;  %v7912_v41 = vld [vmem:[#allocation48_spill] sm:$0xff] }
 0x1e9   : > { %v5568_v19 = vmax.f32 %v7861_v14, %v5451_v33  ;;  %v5581_v24 = vmax.f32 %v1876_v35, %v1961_v61  ;;  %4389 = vmatmul.msk.f32.gmra.mxu2 %vm677_vm3, %v7867_v17  ;;  %v1044_v61 = vmax.f32 %v980_v40, %v5392_v53  ;;  %v1048_v59 = vmax.f32 %v5417_v60, %v5570_v20 }
 0x1ea   : > { %7860 = vst [vmem:[#allocation6_spill] sm:$0xff] %v5562_v42  ;;  %v2190_v38 = vrot.slane %v5574_v27, 6  ;;  %v1045_v14 = vmax.f32 %v981_v3, %v5394_v49  ;;  %v1046_v32 = vmax.f32 %v982_v37, %v5402_v63  ;;  %v1049_v10 = vmax.f32 %v5550_v23, %v5576_v52 }
 0x1eb   : > { %7862 = vst [vmem:[#allocation37_spill] sm:$0xff] %v5568_v19  ;;  %v7674_v13 = vrot.slane %v5581_v24, 6  ;;  %v1108_v40 = vmax.f32 %v1044_v61, %v5570_v20  ;;  %v899_v23 = vmax.f32 %v5208_v16, %v5218_v1  ;;  %v5637_v50 = vmax.f32 %v1048_v59, %v5585_v43 }
 0x1ec   : > { %v1109_v60 = vmax.f32 %v1045_v14, %v5576_v52  ;;  %v5618_v47 = vmax.f32 %v1046_v32, %v5583_v22  ;;  %v5647_v63 = vmax.f32 %v1049_v10, %v857_v0  ;;  %v7876_v0 = vld [vmem:[#allocation18_spill] sm:$0xff]  ;;  %v7877_v10 = vld [vmem:[#allocation17_spill] sm:$0xff]  ;;  %v7702_v49 = vrot.slane %v7912_v41, 1 }
 0x1ed   : > { %v2192_v3 = vsel %vm2179_vm15, %v2190_v38, %v7674_v13  ;;  %v1270_v7 = vrot.slane %v1108_v40, 1  ;;  %v1511_v15 = vrot.slane %v1108_v40, 2  ;;  %v1752_v17 = vrot.slane %v1108_v40, 3  ;;  %7869 = vst [vmem:[#allocation9_spill] sm:$0xff] %v5637_v50 }
 0x1ee   : > { %4364 = vmatmul.msk.f32.gmra.mxu1 %vm677_vm3, %v2192_v3  ;;  %v1271_v61 = vrot.slane %v1109_v60, 1  ;;  %v7680_v35 = vrot.slane %v5618_v47, 1  ;;  %v1512_v38 = vrot.slane %v1109_v60, 2  ;;  %v7683_v25 = vrot.slane %v5618_v47, 2  ;;  %7873 = vst [vmem:[#allocation10_spill] sm:$0xff] %v5647_v63 }
 0x1ef   : > { %v1753_v37 = vrot.slane %v1109_v60, 3  ;;  %v1992_v5 = vrot.slane %v1108_v40, 4  ;;  %v1993_v32 = vrot.slane %v1109_v60, 4  ;;  %v7870_v52 = vrot.slane %v5618_v47, 3 }
 0x1f0   : > { %v1272_v3 = vsel %vm1192_vm1, %v1270_v7, %v1271_v61  ;;  %v1274_v13 = vsel %vm1192_vm1, %v1271_v61, %v7680_v35  ;;  %v1513_v1 = vsel %vm1433_vm2, %v1511_v15, %v1512_v38  ;;  %v1515_v28 = vsel %vm1433_vm2, %v1512_v38, %v7683_v25  ;;  %v7871_v35 = vld [vmem:[#allocation39_spill] sm:$0xff]  ;;  %v7872_v38 = vld [vmem:[#allocation40_spill] sm:$0xff] }
 0x1f1   : > { %4390 = vmatmul.msk.f32.gmra.mxu2 %vm677_vm3, %v7868_v57  ;;  %v1413_v31 = vmax.f32 %v1108_v40, %v1272_v3  ;;  %v1414_v14 = vmax.f32 %v1109_v60, %v1274_v13  ;;  %v1754_v7 = vsel %vm1674_vm4, %v1752_v17, %v1753_v37  ;;  %v1756_v61 = vsel %vm1674_vm4, %v1753_v37, %v7870_v52  ;;  %v7874_v52 = vld [vmem:[#allocation15_spill] sm:$0xff] }
 0x1f2   : > { %v1995_v15 = vrot.slane %v5618_v47, 4  ;;  %v963_v20 = vmax.f32 %v899_v23, %v7871_v35  ;;  %v919_v25 = vmax.f32 %v7872_v38, %v5258_v21  ;;  %v1994_v40 = vsel %vm416_vm0, %v1992_v5, %v1993_v32  ;;  %v7875_v23 = vld [vmem:[#allocation16_spill] sm:$0xff]  ;;  %v855_v5 = vld [vmem:[#allocation2 + $0x1f8] sm:$0xff] }
 0x1f3   : > { %v1654_v57 = vmax.f32 %v1413_v31, %v1513_v1  ;;  %v1655_v59 = vmax.f32 %v1414_v14, %v1515_v28  ;;  %v900_v37 = vmax.f32 %v7874_v52, %v5031_v30  ;;  %v901_v21 = vmax.f32 %v7875_v23, %v5039_v36  ;;  %v7878_v28 = vld [vmem:[#allocation38_spill] sm:$0xff]  ;;  %v7879_v1 = vld [vmem:[#allocation20_spill] sm:$0xff]  ;;  %v7884_v52 = vld [vmem:[#allocation3_spill] sm:$0xff] }
 0x1f4   : > { %v1996_v13 = vsel %vm416_vm0, %v1993_v32, %v1995_v15  ;;  %v1027_v17 = vmax.f32 %v963_v20, %v7846_v26  ;;  %v983_v60 = vmax.f32 %v919_v25, %v5269_v62  ;;  %v902_v31 = vmax.f32 %v7877_v10, %v7876_v0  ;;  %v7880_v20 = vld [vmem:[#allocation11_spill] sm:$0xff] }
 0x1f5   : > { %v1895_v3 = vmax.f32 %v1654_v57, %v1754_v7  ;;  %v1896_v35 = vmax.f32 %v1655_v59, %v1756_v61  ;;  %v964_v26 = vmax.f32 %v900_v37, %v7879_v1  ;;  %v7881_v62 = vld [vmem:[#allocation19_spill] sm:$0xff]  ;;  %v965_v7 = vmax.f32 %v901_v21, %v5057_v48 }
 0x1f6   : > { %v1091_v14 = vmax.f32 %v1027_v17, %v7878_v28  ;;  %v1047_v32 = vmax.f32 %v983_v60, %v5451_v33  ;;  %v1008_v25 = vmax.f32 %v7881_v62, %v7880_v20  ;;  %v966_v36 = vmax.f32 %v902_v31, %v5100_v39  ;;  %v7903_v20 = vld [vmem:[#allocation25_spill] sm:$0xff] }
 0x1f7   : > { %v5664_v38 = vmax.f32 %v1895_v3, %v1994_v40  ;;  %v5666_v30 = vmax.f32 %v1896_v35, %v1996_v13  ;;  %v1028_v40 = vmax.f32 %v964_v26, %v5059_v54  ;;  %v7885_v13 = vrot.slane %v5506_v12, 1 }
 0x1f8   : > { %v1240_v61 = vrot.slane %v1091_v14, 1  ;;  %v1481_v57 = vrot.slane %v1091_v14, 2  ;;  %v1722_v59 = vrot.slane %v1091_v14, 3  ;;  %v1962_v17 = vrot.slane %v1091_v14, 4 }
 0x1f9   : > { %7882 = vst [vmem:[#allocation39_spill] sm:$0xff] %v5664_v38  ;;  %4391 = vmatmul.msk.f32.gmra.mxu2 %vm677_vm3, %v7884_v52  ;;  %v2215_v33 = vrot.slane %v5664_v38, 6  ;;  %v2216_v60 = vrot.slane %v5666_v30, 6  ;;  %v1111_v37 = vmax.f32 %v1047_v32, %v855_v5  ;;  %v7886_v39 = vrot.slane %v5506_v12, 2 }
 0x1fa   : > { %7883 = vst [vmem:[#allocation40_spill] sm:$0xff] %v5666_v30  ;;  %v1241_v48 = vsel %vm1192_vm1, %v7885_v13, %v1240_v61  ;;  %v1396_v3 = vmax.f32 %v1091_v14, %v1240_v61  ;;  %v7887_v23 = vrot.slane %v5506_v12, 3  ;;  %v7888_v54 = vrot.slane %v5506_v12, 4 }
 0x1fb   : > { %v1482_v35 = vsel %vm1433_vm2, %v7886_v39, %v1481_v57  ;;  %v2217_v0 = vsel %vm2179_vm15, %v2215_v33, %v2216_v60  ;;  %v1395_v10 = vmax.f32 %v5506_v12, %v1241_v48  ;;  %v1275_v28 = vrot.slane %v1111_v37, 1 }
 0x1fc   : > { %v1723_v21 = vsel %vm1674_vm4, %v7887_v23, %v1722_v59  ;;  %v1963_v31 = vsel %vm416_vm0, %v7888_v54, %v1962_v17  ;;  %4374 = vmatmul.msk.f32.gmra.mxu3 %vm677_vm3, %v2217_v0  ;;  %v1637_v14 = vmax.f32 %v1396_v3, %v1481_v57  ;;  %v1516_v5 = vrot.slane %v1111_v37, 2 }
 0x1fd   : > { %v1757_v32 = vrot.slane %v1111_v37, 3  ;;  %v1997_v1 = vrot.slane %v1111_v37, 4  ;;  %v1636_v26 = vmax.f32 %v1395_v10, %v1482_v35  ;;  %v7889_v61 = vrot.slane %v5618_v47, 1 }
 0x1fe   : > { %v1416_v13 = vmax.f32 %v1111_v37, %v1275_v28  ;;  %v1029_v33 = vmax.f32 %v965_v7, %v5061_v55  ;;  %v1878_v48 = vmax.f32 %v1637_v14, %v1722_v59  ;;  %v7890_v39 = vrot.slane %v5618_v47, 2 }
 0x1ff   : > { %v1276_v52 = vsel %vm1192_vm1, %v7889_v61, %v1275_v28  ;;  %v7891_v57 = vrot.slane %v5618_v47, 3  ;;  %v1877_v0 = vmax.f32 %v1636_v26, %v1723_v21  ;;  %v1998_v10 = vsel %vm416_vm0, %v1995_v15, %v1997_v1  ;;  %v7892_v28 = vld [vmem:[#allocation4_spill] sm:$0xff]  ;;  %v7893_v15 = vld [vmem:[#allocation23_spill] sm:$0xff] }
 0x200   : > { %v1415_v12 = vmax.f32 %v5618_v47, %v1276_v52  ;;  %v1517_v23 = vsel %vm1433_vm2, %v7890_v39, %v1516_v5  ;;  %v1657_v35 = vmax.f32 %v1416_v13, %v1516_v5  ;;  %v1030_v54 = vmax.f32 %v966_v36, %v5102_v44  ;;  %v4478_v5 = vld [vmem:[#allocation2 + $0xa8] sm:$0xff] }
 0x201   : > { %v1758_v3 = vsel %vm1674_vm4, %v7891_v57, %v1757_v32  ;;  %v5705_v37 = vmax.f32 %v1878_v48, %v1962_v17  ;;  %v1092_v7 = vmax.f32 %v1028_v40, %v5112_v29  ;;  %v1093_v59 = vmax.f32 %v1029_v33, %v5120_v34  ;;  %4392 = vmatmul.msk.f32.gmra.mxu2 %vm677_vm3, %v7892_v28 }
 0x202   : > { %v1656_v55 = vmax.f32 %v1415_v12, %v1517_v23  ;;  %v5711_v14 = vmax.f32 %v1877_v0, %v1963_v31  ;;  %v1898_v47 = vmax.f32 %v1657_v35, %v1757_v32  ;;  %v5714_v21 = vmax.f32 %v1030_v54, %v5122_v46 }
 0x203   : > { %v1009_v26 = vmax.f32 %v7893_v15, %v4478_v5  ;;  %v1242_v17 = vrot.slane %v1092_v7, 1  ;;  %v1243_v29 = vrot.slane %v1093_v59, 1  ;;  %v1483_v52 = vrot.slane %v1092_v7, 2 }
 0x204   : > { %v1897_v36 = vmax.f32 %v1656_v55, %v1758_v3  ;;  %v2193_v34 = vrot.slane %v5711_v14, 6  ;;  %v5722_v31 = vmax.f32 %v1898_v47, %v1997_v1  ;;  %v7690_v32 = vrot.slane %v5714_v21, 1 }
 0x205   : > { %v1244_v61 = vsel %vm1192_vm1, %v1242_v17, %v1243_v29  ;;  %v1484_v13 = vrot.slane %v1093_v59, 2  ;;  %v7896_v33 = vrot.slane %v5581_v24, 6  ;;  %v7689_v1 = vrot.slane %v5714_v21, 2 }
 0x206   : > { %7894 = vst [vmem:[#allocation15_spill] sm:$0xff] %v5722_v31  ;;  %v5725_v46 = vmax.f32 %v1897_v36, %v1998_v10  ;;  %v1246_v12 = vsel %vm1192_vm1, %v1243_v29, %v7690_v32  ;;  %v1397_v39 = vmax.f32 %v1092_v7, %v1244_v61  ;;  %v1724_v0 = vrot.slane %v1092_v7, 3  ;;  %v7897_v61 = vld [vmem:[#allocation24_spill] sm:$0xff] }
 0x207   : > { %v2194_v48 = vsel %vm2179_vm15, %v7896_v33, %v2193_v34  ;;  %v1398_v57 = vmax.f32 %v1093_v59, %v1246_v12  ;;  %v1485_v3 = vsel %vm1433_vm2, %v1483_v52, %v1484_v13  ;;  %v1487_v35 = vsel %vm1433_vm2, %v1484_v13, %v7689_v1  ;;  %v4479_v34 = vld [vmem:[#allocation2 + $0xb0] sm:$0xff] }
 0x208   : > { %7895 = vst [vmem:[#allocation16_spill] sm:$0xff] %v5725_v46  ;;  %4365 = vmatmul.msk.f32.gmra.mxu1 %vm677_vm3, %v2194_v48  ;;  %v2218_v23 = vrot.slane %v5725_v46, 6  ;;  %v1638_v10 = vmax.f32 %v1397_v39, %v1485_v3  ;;  %v1725_v54 = vrot.slane %v1093_v59, 3  ;;  %v7688_v55 = vrot.slane %v5714_v21, 3  ;;  %v7898_v48 = vld [vmem:[#allocation31_spill] sm:$0xff] }
 0x209   : > { %v1639_v47 = vmax.f32 %v1398_v57, %v1487_v35  ;;  %v1964_v5 = vrot.slane %v1092_v7, 4  ;;  %v1965_v15 = vrot.slane %v1093_v59, 4  ;;  %v7687_v29 = vrot.slane %v5714_v21, 4  ;;  %v7899_v7 = vld [vmem:[#allocation46_spill] sm:$0xff]  ;;  %v4480_v39 = vld [vmem:[#allocation2 + $0xc0] sm:$0xff]  ;;  %v4481_v57 = vld [vmem:[#allocation2 + $0xc8] sm:$0xff] }
 0x20a   : > { %v2219_v28 = vsel %vm2179_vm15, %v2216_v60, %v2218_v23  ;;  %v1726_v36 = vsel %vm1674_vm4, %v1724_v0, %v1725_v54  ;;  %v1728_v17 = vsel %vm1674_vm4, %v1725_v54, %v7688_v55  ;;  %v1010_v52 = vmax.f32 %v7897_v61, %v4479_v34  ;;  %v4482_v0 = vld [vmem:[#allocation2 + $0xd0] sm:$0xff]  ;;  %v7910_v55 = vld [vmem:[#allocation30_spill] sm:$0xff] }
 0x20b   : > { %4375 = vmatmul.msk.f32.gmra.mxu3 %vm677_vm3, %v2219_v28  ;;  %v1879_v13 = vmax.f32 %v1638_v10, %v1726_v36  ;;  %v1880_v33 = vmax.f32 %v1639_v47, %v1728_v17  ;;  %v1966_v60 = vsel %vm416_vm0, %v1964_v5, %v1965_v15  ;;  %v1011_v59 = vmax.f32 %v7899_v7, %v7898_v48  ;;  %v7901_v47 = vld [vmem:[#allocation21_spill] sm:$0xff]  ;;  %v7906_v7 = vld [vmem:[#allocation27_spill] sm:$0xff] }
 0x20c   : > { %v1968_v12 = vsel %vm416_vm0, %v1965_v15, %v7687_v29  ;;  %v5761_v23 = vmax.f32 %v1008_v25, %v4480_v39  ;;  %v5763_v3 = vmax.f32 %v1009_v26, %v4481_v57  ;;  %v5765_v35 = vmax.f32 %v1010_v52, %v4482_v0  ;;  %v7902_v15 = vld [vmem:[#allocation22_spill] sm:$0xff]  ;;  %v7904_v25 = vld [vmem:[#allocation41_spill] sm:$0xff]  ;;  %v7907_v39 = vld [vmem:[#allocation28_spill] sm:$0xff] }
 0x20d   : > { %v5767_v10 = vmax.f32 %v1879_v13, %v1966_v60  ;;  %v5769_v54 = vmax.f32 %v1880_v33, %v1968_v12  ;;  %v5772_v28 = vmax.f32 %v1011_v59, %v5208_v16  ;;  %v1193_v5 = vrot.slane %v7901_v47, 1  ;;  %v7905_v26 = vld [vmem:[#allocation26_spill] sm:$0xff]  ;;  %v7908_v0 = vld [vmem:[#allocation47_spill] sm:$0xff] }
 0x20e   : > { %v1194_v36 = vrot.slane %v7902_v15, 1  ;;  %v1196_v62 = vrot.slane %v7903_v20, 1  ;;  %v7691_v17 = vrot.slane %v7904_v25, 1  ;;  %v1200_v34 = vrot.slane %v7905_v26, 1 }
 0x20f   : > { %7900 = vst [vmem:[#allocation18_spill] sm:$0xff] %v5767_v10  ;;  %v2195_v61 = vrot.slane %v5767_v10, 6  ;;  %v7686_v52 = vrot.slane %v5769_v54, 6  ;;  %v1201_v59 = vrot.slane %v7906_v7, 1  ;;  %v1203_v57 = vrot.slane %v7907_v39, 1 }
 0x210   : > { %v1195_v33 = vsel %vm1192_vm1, %v1193_v5, %v1194_v36  ;;  %v5787_v60 = vsel %vm1192_vm1, %v1194_v36, %v1196_v62  ;;  %v5792_v48 = vsel %vm1192_vm1, %v1196_v62, %v7691_v17  ;;  %v7696_v16 = vrot.slane %v7908_v0, 1  ;;  %v7911_v17 = vld [vmem:[#allocation35_spill] sm:$0xff] }
 0x211   : > { %v2197_v12 = vsel %vm2179_vm15, %v2195_v61, %v7686_v52  ;;  %v1207_v5 = vrot.slane %v5761_v23, 1  ;;  %v1202_v36 = vsel %vm1192_vm1, %v1200_v34, %v1201_v59  ;;  %v1208_v13 = vrot.slane %v5763_v3, 1  ;;  %v7909_v52 = vld [vmem:[#allocation29_spill] sm:$0xff] }
 0x212   : > { %4366 = vmatmul.msk.f32.gmra.mxu1 %vm677_vm3, %v2197_v12  ;;  %v1210_v62 = vrot.slane %v5765_v35, 1  ;;  %v7698_v44 = vrot.slane %v5772_v28, 1  ;;  %v1204_v40 = vsel %vm1192_vm1, %v1201_v59, %v1203_v57  ;;  %v1206_v61 = vsel %vm1192_vm1, %v1203_v57, %v7696_v16 }
 0x213   : > { %v1214_v29 = vrot.slane %v7909_v52, 1  ;;  %v1215_v1 = vrot.slane %v7910_v55, 1  ;;  %v1209_v12 = vsel %vm1192_vm1, %v1207_v5, %v1208_v13  ;;  %v1217_v43 = vrot.slane %v7911_v17, 1 }
 0x214   : > { %v1211_v34 = vsel %vm1192_vm1, %v1208_v13, %v1210_v62  ;;  %v1213_v32 = vsel %vm1192_vm1, %v1210_v62, %v7698_v44  ;;  %v1369_v57 = vmax.f32 %v7901_v47, %v1195_v33  ;;  %v1370_v16 = vmax.f32 %v7902_v15, %v5787_v60 }
 0x215   : > { %v1216_v59 = vsel %vm1192_vm1, %v1214_v29, %v1215_v1  ;;  %v1218_v56 = vsel %vm1192_vm1, %v1215_v1, %v1217_v43  ;;  %v1371_v13 = vmax.f32 %v7903_v20, %v5792_v48  ;;  %v1373_v5 = vmax.f32 %v7905_v26, %v1202_v36 }
 0x216   : > { %v1374_v62 = vmax.f32 %v7906_v7, %v1204_v40  ;;  %v1220_v29 = vsel %vm1192_vm1, %v1217_v43, %v7702_v49  ;;  %v1375_v44 = vmax.f32 %v7907_v39, %v1206_v61  ;;  %v1377_v33 = vmax.f32 %v5761_v23, %v1209_v12 }
 0x217   : > { %v1378_v53 = vmax.f32 %v5763_v3, %v1211_v34  ;;  %v1379_v60 = vmax.f32 %v5765_v35, %v1213_v32  ;;  %v1381_v1 = vmax.f32 %v7909_v52, %v1216_v59  ;;  %v1382_v48 = vmax.f32 %v7910_v55, %v1218_v56 }
 0x218   : > { %v1383_v36 = vmax.f32 %v7911_v17, %v1220_v29  ;;  %v1434_v40 = vrot.slane %v7901_v47, 2  ;;  %v1435_v45 = vrot.slane %v7902_v15, 2  ;;  %v1437_v43 = vrot.slane %v7903_v20, 2 }
 0x219   : > { %v7711_v61 = vrot.slane %v7904_v25, 2  ;;  %v1441_v12 = vrot.slane %v7905_v26, 2  ;;  %v1442_v34 = vrot.slane %v7906_v7, 2  ;;  %v1444_v32 = vrot.slane %v7907_v39, 2 }
 0x21a   : > { %v7714_v59 = vrot.slane %v7908_v0, 2  ;;  %v1436_v56 = vsel %vm1433_vm2, %v1434_v40, %v1435_v45  ;;  %v1438_v29 = vsel %vm1433_vm2, %v1435_v45, %v1437_v43  ;;  %v1448_v63 = vrot.slane %v5761_v23, 2 }
 0x21b   : > { %v1440_v49 = vsel %vm1433_vm2, %v1437_v43, %v7711_v61  ;;  %v1443_v50 = vsel %vm1433_vm2, %v1441_v12, %v1442_v34  ;;  %v1445_v22 = vsel %vm1433_vm2, %v1442_v34, %v1444_v32  ;;  %v1449_v31 = vrot.slane %v5763_v3, 2 }
 0x21c   : > { %v1447_v42 = vsel %vm1433_vm2, %v1444_v32, %v7714_v59  ;;  %v1451_v40 = vrot.slane %v5765_v35, 2  ;;  %v1453_v45 = vrot.slane %v5772_v28, 2  ;;  %v1455_v46 = vrot.slane %v7909_v52, 2 }
 0x21d   : > { %v1456_v43 = vrot.slane %v7910_v55, 2  ;;  %v1450_v61 = vsel %vm1433_vm2, %v1448_v63, %v1449_v31  ;;  %v1458_v12 = vrot.slane %v7911_v17, 2  ;;  %v7725_v34 = vrot.slane %v7912_v41, 2 }
 0x21e   : > { %v5865_v30 = vmax.f32 %v1369_v57, %v1436_v56  ;;  %v1452_v32 = vsel %vm1433_vm2, %v1449_v31, %v1451_v40  ;;  %v1454_v59 = vsel %vm1433_vm2, %v1451_v40, %v1453_v45  ;;  %v5872_v19 = vmax.f32 %v1370_v16, %v1438_v29 }
 0x21f   : > { %v1457_v38 = vsel %vm1433_vm2, %v1455_v46, %v1456_v43  ;;  %v1459_v2 = vsel %vm1433_vm2, %v1456_v43, %v1458_v12  ;;  %v1461_v63 = vsel %vm1433_vm2, %v1458_v12, %v7725_v34  ;;  %v5878_v18 = vmax.f32 %v1371_v13, %v1440_v49 }
 0x220   : > { %v5880_v57 = vmax.f32 %v1373_v5, %v1443_v50  ;;  %v5882_v56 = vmax.f32 %v1374_v62, %v1445_v22  ;;  %v5884_v31 = vmax.f32 %v1375_v44, %v1447_v42  ;;  %v5886_v10 = vmax.f32 %v1377_v33, %v1450_v61 }
 0x221   : > { %v5888_v40 = vmax.f32 %v1378_v53, %v1452_v32  ;;  %v5890_v46 = vmax.f32 %v1379_v60, %v1454_v59  ;;  %v5892_v16 = vmax.f32 %v1381_v1, %v1457_v38  ;;  %v5894_v29 = vmax.f32 %v1382_v48, %v1459_v2 }
 0x222   : > { %v5896_v43 = vmax.f32 %v1383_v36, %v1461_v63  ;;  %v1675_v49 = vrot.slane %v7901_v47, 3  ;;  %v1676_v50 = vrot.slane %v7902_v15, 3  ;;  %v1678_v22 = vrot.slane %v7903_v20, 3 }
 0x223   : > { %v7724_v42 = vrot.slane %v7904_v25, 3  ;;  %v1682_v44 = vrot.slane %v7905_v26, 3  ;;  %v1683_v53 = vrot.slane %v7906_v7, 3  ;;  %v1685_v13 = vrot.slane %v7907_v39, 3 }
 0x224   : > { %v7723_v38 = vrot.slane %v7908_v0, 3  ;;  %v1677_v2 = vsel %vm1674_vm4, %v1675_v49, %v1676_v50  ;;  %v1679_v5 = vsel %vm1674_vm4, %v1676_v50, %v1678_v22  ;;  %v1689_v33 = vrot.slane %v5761_v23, 3 }
 0x225   : > { %v1681_v62 = vsel %vm1674_vm4, %v1678_v22, %v7724_v42  ;;  %v1684_v60 = vsel %vm1674_vm4, %v1682_v44, %v1683_v53  ;;  %v1686_v1 = vsel %vm1674_vm4, %v1683_v53, %v1685_v13  ;;  %v1690_v36 = vrot.slane %v5763_v3, 3 }
 0x226   : > { %v1688_v48 = vsel %vm1674_vm4, %v1685_v13, %v7723_v38  ;;  %v1692_v61 = vrot.slane %v5765_v35, 3  ;;  %v1694_v59 = vrot.slane %v5772_v28, 3  ;;  %v1696_v12 = vrot.slane %v7909_v52, 3 }
 0x227   : > { %v1697_v32 = vrot.slane %v7910_v55, 3  ;;  %v1691_v63 = vsel %vm1674_vm4, %v1689_v33, %v1690_v36  ;;  %v1699_v49 = vrot.slane %v7911_v17, 3  ;;  %v1701_v50 = vrot.slane %v7912_v41, 3 }
 0x228   : > { %v1851_v22 = vmax.f32 %v5865_v30, %v1677_v2  ;;  %v1693_v44 = vsel %vm1674_vm4, %v1690_v36, %v1692_v61  ;;  %v1695_v53 = vsel %vm1674_vm4, %v1692_v61, %v1694_v59  ;;  %v1852_v38 = vmax.f32 %v5872_v19, %v1679_v5 }
 0x229   : > { %v1698_v13 = vsel %vm1674_vm4, %v1696_v12, %v1697_v32  ;;  %v1700_v42 = vsel %vm1674_vm4, %v1697_v32, %v1699_v49  ;;  %v1702_v33 = vsel %vm1674_vm4, %v1699_v49, %v1701_v50  ;;  %v1853_v34 = vmax.f32 %v5878_v18, %v1681_v62 }
 0x22a   : > { %v1855_v30 = vmax.f32 %v5880_v57, %v1684_v60  ;;  %v1856_v2 = vmax.f32 %v5882_v56, %v1686_v1  ;;  %v1857_v36 = vmax.f32 %v5884_v31, %v1688_v48  ;;  %v1859_v61 = vmax.f32 %v5886_v10, %v1691_v63 }
 0x22b   : > { %v1860_v12 = vmax.f32 %v5888_v40, %v1693_v44  ;;  %v1861_v19 = vmax.f32 %v5890_v46, %v1695_v53  ;;  %v1863_v5 = vmax.f32 %v5892_v16, %v1698_v13  ;;  %v1864_v32 = vmax.f32 %v5894_v29, %v1700_v42 }
 0x22c   : > { %v1865_v49 = vmax.f32 %v5896_v43, %v1702_v33  ;;  %v1915_v18 = vrot.slane %v7901_v47, 4  ;;  %v1916_v57 = vrot.slane %v7902_v15, 4  ;;  %v1918_v56 = vrot.slane %v7903_v20, 4 }
 0x22d   : > { %v1920_v31 = vrot.slane %v7904_v25, 4  ;;  %v1922_v10 = vrot.slane %v7905_v26, 4  ;;  %v1923_v40 = vrot.slane %v7906_v7, 4  ;;  %v1925_v46 = vrot.slane %v7907_v39, 4 }
 0x22e   : > { %v1927_v16 = vrot.slane %v7908_v0, 4  ;;  %v1917_v29 = vsel %vm416_vm0, %v1915_v18, %v1916_v57  ;;  %v1919_v43 = vsel %vm416_vm0, %v1916_v57, %v1918_v56  ;;  %v1929_v15 = vrot.slane %v5761_v23, 4 }
 0x22f   : > { %v1921_v47 = vsel %vm416_vm0, %v1918_v56, %v1920_v31  ;;  %v1924_v20 = vsel %vm416_vm0, %v1922_v10, %v1923_v40  ;;  %v1926_v26 = vsel %vm416_vm0, %v1923_v40, %v1925_v46  ;;  %v1930_v39 = vrot.slane %v5763_v3, 4 }
 0x230   : > { %v1928_v7 = vsel %vm416_vm0, %v1925_v46, %v1927_v16  ;;  %v1932_v42 = vrot.slane %v5765_v35, 4  ;;  %v1934_v62 = vrot.slane %v5772_v28, 4  ;;  %v1936_v60 = vrot.slane %v7909_v52, 4 }
 0x231   : > { %v1937_v1 = vrot.slane %v7910_v55, 4  ;;  %v1931_v23 = vsel %vm416_vm0, %v1929_v15, %v1930_v39  ;;  %v1939_v48 = vrot.slane %v7911_v17, 4  ;;  %v1941_v63 = vrot.slane %v7912_v41, 4 }
 0x232   : > { %v2091_v44 = vmax.f32 %v1851_v22, %v1917_v29  ;;  %v1933_v53 = vsel %vm416_vm0, %v1930_v39, %v1932_v42  ;;  %v1935_v3 = vsel %vm416_vm0, %v1932_v42, %v1934_v62  ;;  %v2092_v13 = vmax.f32 %v1852_v38, %v1919_v43 }
 0x233   : > { %v1938_v35 = vsel %vm416_vm0, %v1936_v60, %v1937_v1  ;;  %v1940_v52 = vsel %vm416_vm0, %v1937_v1, %v1939_v48  ;;  %v1942_v55 = vsel %vm416_vm0, %v1939_v48, %v1941_v63  ;;  %v2093_v33 = vmax.f32 %v1853_v34, %v1921_v47 }
 0x234   : > { %v2095_v17 = vmax.f32 %v1855_v30, %v1924_v20  ;;  %v2096_v18 = vmax.f32 %v1856_v2, %v1926_v26  ;;  %v2097_v57 = vmax.f32 %v1857_v36, %v1928_v7  ;;  %v2099_v22 = vmax.f32 %v1859_v61, %v1931_v23 }
 0x235   : > { %v2100_v56 = vmax.f32 %v1860_v12, %v1933_v53  ;;  %v2101_v10 = vmax.f32 %v1861_v19, %v1935_v3  ;;  %v5982_v40 = vmax.f32 %v1863_v5, %v1938_v35  ;;  %v5984_v46 = vmax.f32 %v1864_v32, %v1940_v52 }
 0x236   : > { %v5986_v29 = vmax.f32 %v1865_v49, %v1942_v55  ;;  %v2437_v38 = vmax.f32 %v2091_v44, %v2095_v17  ;;  %v2438_v43 = vmax.f32 %v2092_v13, %v2096_v18  ;;  %v2439_v15 = vmax.f32 %v2093_v33, %v2097_v57  ;;  %v7913_v49 = vld [vmem:[#allocation36_spill] sm:$0xff] }
 0x237   : > { %v2441_v39 = vmax.f32 %v2095_v17, %v2099_v22  ;;  %v2442_v42 = vmax.f32 %v2096_v18, %v2100_v56  ;;  %v2443_v60 = vmax.f32 %v2097_v57, %v2101_v10  ;;  %v2445_v34 = vmax.f32 %v2099_v22, %v5982_v40 }
 0x238   : > { %v2446_v30 = vmax.f32 %v2100_v56, %v5984_v46  ;;  %v2447_v2 = vmax.f32 %v2101_v10, %v5986_v29  ;;  %v2485_v36 = vmax.f32 %v2437_v38, %v2099_v22  ;;  %v2486_v61 = vmax.f32 %v2438_v43, %v2100_v56 }
 0x239   : > { %v2487_v12 = vmax.f32 %v2439_v15, %v2101_v10  ;;  %v2489_v19 = vmax.f32 %v2441_v39, %v5982_v40  ;;  %v2490_v5 = vmax.f32 %v2442_v42, %v5984_v46  ;;  %v2491_v32 = vmax.f32 %v2443_v60, %v5986_v29 }
 0x23a   : > { %v2493_v47 = vmax.f32 %v2445_v34, %v7913_v49  ;;  %v2494_v20 = vmax.f32 %v2446_v30, %v5179_v51  ;;  %v2495_v26 = vmax.f32 %v2447_v2, %v5313_v11  ;;  %v2533_v7 = vmax.f32 %v2485_v36, %v5982_v40 }
 0x23b   : > { %v2534_v1 = vmax.f32 %v2486_v61, %v5984_v46  ;;  %v2535_v23 = vmax.f32 %v2487_v12, %v5986_v29  ;;  %v2537_v48 = vmax.f32 %v2489_v19, %v7913_v49  ;;  %v2538_v44 = vmax.f32 %v2490_v5, %v5179_v51 }
 0x23c   : > { %v2539_v53 = vmax.f32 %v2491_v32, %v5313_v11  ;;  %v2541_v3 = vmax.f32 %v2493_v47, %v5378_v4  ;;  %v2542_v35 = vmax.f32 %v2494_v20, %v5390_v8  ;;  %v2543_v13 = vmax.f32 %v2495_v26, %v5502_v6 }
 0x23d   : > { %v6007_v52 = vmax.f32 %v2533_v7, %v7913_v49  ;;  %v6010_v55 = vmax.f32 %v2534_v1, %v5179_v51  ;;  %v6013_v33 = vmax.f32 %v2535_v23, %v5313_v11  ;;  %v6016_v17 = vmax.f32 %v2537_v48, %v5378_v4 }
 0x23e   : > { %v6019_v18 = vmax.f32 %v2538_v44, %v5390_v8  ;;  %v6022_v57 = vmax.f32 %v2539_v53, %v5502_v6  ;;  %v6025_v22 = vmax.f32 %v2541_v3, %v5574_v27  ;;  %v6028_v56 = vmax.f32 %v2542_v35, %v5581_v24 }
 0x23f   : > { %v6031_v10 = vmax.f32 %v2543_v13, %v5711_v14  ;;  %v2677_v38 = vrot.slane %v6007_v52, 1  ;;  %v2678_v43 = vrot.slane %v6010_v55, 1  ;;  %v2680_v15 = vrot.slane %v6013_v33, 1 }
 0x240   : > { %v2684_v39 = vrot.slane %v6016_v17, 1  ;;  %v2685_v42 = vrot.slane %v6019_v18, 1  ;;  %v7728_v60 = vrot.slane %v6022_v57, 1  ;;  %v2691_v34 = vrot.slane %v6025_v22, 1 }
 0x241   : > { %v2692_v30 = vrot.slane %v6028_v56, 1  ;;  %v2679_v2 = vsel %vm1192_vm1, %v2677_v38, %v2678_v43  ;;  %v2681_v36 = vsel %vm1192_vm1, %v2678_v43, %v2680_v15  ;;  %v7726_v61 = vrot.slane %v6031_v10, 1 }
 0x242   : > { %v2833_v12 = vrot.slane %v6007_v52, 2  ;;  %v2686_v19 = vsel %vm1192_vm1, %v2684_v39, %v2685_v42  ;;  %v2688_v5 = vsel %vm1192_vm1, %v2685_v42, %v7728_v60  ;;  %v2797_v47 = vmax.f32 %v6007_v52, %v2679_v2 }
 0x243   : > { %v2693_v32 = vsel %vm1192_vm1, %v2691_v34, %v2692_v30  ;;  %v2695_v20 = vsel %vm1192_vm1, %v2692_v30, %v7726_v61  ;;  %v2798_v26 = vmax.f32 %v6010_v55, %v2681_v36  ;;  %v2800_v7 = vmax.f32 %v6016_v17, %v2686_v19 }
 0x244   : > { %v2801_v1 = vmax.f32 %v6019_v18, %v2688_v5  ;;  %v2803_v23 = vmax.f32 %v6025_v22, %v2693_v32  ;;  %v2804_v48 = vmax.f32 %v6028_v56, %v2695_v20  ;;  %v2834_v44 = vrot.slane %v6010_v55, 2 }
 0x245   : > { %v7727_v53 = vrot.slane %v6013_v33, 2  ;;  %v2840_v3 = vrot.slane %v6016_v17, 2  ;;  %v2841_v35 = vrot.slane %v6019_v18, 2  ;;  %v7730_v13 = vrot.slane %v6022_v57, 2 }
 0x246   : > { %v2847_v38 = vrot.slane %v6025_v22, 2  ;;  %v2835_v43 = vsel %vm1433_vm2, %v2833_v12, %v2834_v44  ;;  %v2848_v42 = vrot.slane %v6028_v56, 2  ;;  %v7729_v34 = vrot.slane %v6031_v10, 2 }
 0x247   : > { %v2837_v39 = vsel %vm1433_vm2, %v2834_v44, %v7727_v53  ;;  %v2842_v30 = vsel %vm1433_vm2, %v2840_v3, %v2841_v35  ;;  %v2844_v2 = vsel %vm1433_vm2, %v2841_v35, %v7730_v13  ;;  %v2953_v36 = vmax.f32 %v2797_v47, %v2835_v43 }
 0x248   : > { %v2954_v19 = vmax.f32 %v2798_v26, %v2837_v39  ;;  %v2849_v5 = vsel %vm1433_vm2, %v2847_v38, %v2848_v42  ;;  %v2851_v12 = vsel %vm1433_vm2, %v2848_v42, %v7729_v34  ;;  %v2956_v32 = vmax.f32 %v2800_v7, %v2842_v30 }
 0x249   : > { %v2957_v20 = vmax.f32 %v2801_v1, %v2844_v2  ;;  %v2959_v44 = vmax.f32 %v2803_v23, %v2849_v5  ;;  %v2960_v61 = vmax.f32 %v2804_v48, %v2851_v12  ;;  %v2989_v53 = vrot.slane %v6007_v52, 3 }
 0x24a   : > { %v2990_v3 = vrot.slane %v6010_v55, 3  ;;  %v7731_v60 = vrot.slane %v6013_v33, 3  ;;  %v2996_v35 = vrot.slane %v6016_v17, 3  ;;  %v2997_v47 = vrot.slane %v6019_v18, 3 }
 0x24b   : > { %v7737_v26 = vrot.slane %v6022_v57, 3  ;;  %v3003_v43 = vrot.slane %v6025_v22, 3  ;;  %v3004_v7 = vrot.slane %v6028_v56, 3  ;;  %v7736_v1 = vrot.slane %v6031_v10, 3 }
 0x24c   : > { %v2991_v38 = vsel %vm1674_vm4, %v2989_v53, %v2990_v3  ;;  %v2993_v23 = vsel %vm1674_vm4, %v2990_v3, %v7731_v60  ;;  %v2998_v48 = vsel %vm1674_vm4, %v2996_v35, %v2997_v47  ;;  %v3145_v3 = vrot.slane %v6007_v52, 4 }
 0x24d   : > { %v3000_v39 = vsel %vm1674_vm4, %v2997_v47, %v7737_v26  ;;  %v3109_v42 = vmax.f32 %v2953_v36, %v2991_v38  ;;  %v3005_v30 = vsel %vm1674_vm4, %v3003_v43, %v3004_v7  ;;  %v3007_v53 = vsel %vm1674_vm4, %v3004_v7, %v7736_v1 }
 0x24e   : > { %v3110_v2 = vmax.f32 %v2954_v19, %v2993_v23  ;;  %v3112_v5 = vmax.f32 %v2956_v32, %v2998_v48  ;;  %v3113_v12 = vmax.f32 %v2957_v20, %v3000_v39  ;;  %v3115_v34 = vmax.f32 %v2959_v44, %v3005_v30  ;;  %v4483_v20 = vld [vmem:[#allocation2 + $0xf8] sm:$0xff] }
 0x24f   : > { %v3116_v13 = vmax.f32 %v2960_v61, %v3007_v53  ;;  %v3146_v35 = vrot.slane %v6010_v55, 4  ;;  %v7735_v60 = vrot.slane %v6013_v33, 4  ;;  %v3152_v47 = vrot.slane %v6016_v17, 4  ;;  %v6116_v17 = vld [vmem:[#allocation2 + $0x118] sm:$0xff] }
 0x250   : > { %v3153_v36 = vrot.slane %v6019_v18, 4  ;;  %v7734_v38 = vrot.slane %v6022_v57, 4  ;;  %v3159_v43 = vrot.slane %v6025_v22, 4  ;;  %v3160_v19 = vrot.slane %v6028_v56, 4 }
 0x251   : > { %v7733_v32 = vrot.slane %v6031_v10, 4  ;;  %v3147_v61 = vsel %vm416_vm0, %v3145_v3, %v3146_v35  ;;  %v3149_v52 = vsel %vm416_vm0, %v3146_v35, %v7735_v60  ;;  %v903_v18 = vmax.f32 %v4483_v20, %v6116_v17  ;;  %v6134_v3 = vld [vmem:[#allocation2 + $0x138] sm:$0xff] }
 0x252   : > { %v3154_v55 = vsel %vm416_vm0, %v3152_v47, %v3153_v36  ;;  %v3156_v22 = vsel %vm416_vm0, %v3153_v36, %v7734_v38  ;;  %v3161_v56 = vsel %vm416_vm0, %v3159_v43, %v3160_v19  ;;  %v3265_v7 = vmax.f32 %v3109_v42, %v3147_v61  ;;  %v6151_v61 = vld [vmem:[#allocation2 + $0x158] sm:$0xff]  ;;  %v4491_v38 = vld [vmem:[#allocation2 + $0x128] sm:$0xff] }
 0x253   : > { %v3163_v44 = vsel %vm416_vm0, %v3160_v19, %v7733_v32  ;;  %v3266_v23 = vmax.f32 %v3110_v2, %v3149_v52  ;;  %v6126_v48 = vmax.f32 %v3112_v5, %v3154_v55  ;;  %v6128_v39 = vmax.f32 %v3113_v12, %v3156_v22  ;;  %v4490_v32 = vld [vmem:[#allocation2 + $0x108] sm:$0xff] }
 0x254   : > { %v6130_v30 = vmax.f32 %v3115_v34, %v3161_v56  ;;  %v6132_v53 = vmax.f32 %v3116_v13, %v3163_v44  ;;  %v967_v35 = vmax.f32 %v903_v18, %v6134_v3  ;;  %v7915_v47 = vrot.slane %v7904_v25, 1  ;;  %v4488_v13 = vld [vmem:[#allocation2 + $0x100] sm:$0xff] }
 0x255   : > { %7914 = vst [vmem:[#allocation17_spill] sm:$0xff] %v6128_v39  ;;  %v7916_v43 = vrot.slane %v7908_v0, 1  ;;  %v3482_v5 = vmax.f32 %v3265_v7, %v6126_v48  ;;  %v3483_v34 = vmax.f32 %v3266_v23, %v6128_v39  ;;  %v7917_v55 = vrot.slane %v5772_v28, 1 }
 0x256   : > { %v1372_v36 = vmax.f32 %v7904_v25, %v7915_v47  ;;  %v3325_v2 = vrot.slane %v6130_v30, 4  ;;  %v7732_v12 = vrot.slane %v6132_v53, 4  ;;  %v1031_v52 = vmax.f32 %v967_v35, %v6151_v61  ;;  %v6171_v47 = vld [vmem:[#allocation2 + $0x178] sm:$0xff] }
 0x257   : > { %v1376_v42 = vmax.f32 %v7908_v0, %v7916_v43  ;;  %v1380_v20 = vmax.f32 %v5772_v28, %v7917_v55  ;;  %v6158_v18 = vmax.f32 %v3482_v5, %v6130_v30  ;;  %v6161_v22 = vmax.f32 %v3483_v34, %v6132_v53  ;;  %v4496_v28 = vld [vmem:[#allocation2 + $0x150] sm:$0xff] }
 0x258   : > { %v7918_v56 = vrot.slane %v7912_v41, 1  ;;  %v7919_v7 = vrot.slane %v7904_v25, 2  ;;  %v3327_v35 = vsel %vm416_vm0, %v3325_v2, %v7732_v12  ;;  %v1095_v43 = vmax.f32 %v1031_v52, %v6171_v47  ;;  %v4489_v2 = vld [vmem:[#allocation2 + $0x120] sm:$0xff] }
 0x259   : > { %v7920_v5 = vrot.slane %v7908_v0, 2  ;;  %v1621_v34 = vmax.f32 %v1380_v20, %v1453_v45  ;;  %4394 = vmatmul.msk.f32.vlgmr.msra.gmra.mxu3 %vm677_vm3, %v3327_v35  ;;  %v904_v12 = vmax.f32 %v4488_v13, %v4489_v2  ;;  %v905_v52 = vmax.f32 %v4490_v32, %v4491_v38 }
 0x25a   : > { %v1384_v44 = vmax.f32 %v7912_v41, %v7918_v56  ;;  %v1613_v23 = vmax.f32 %v1372_v36, %v7919_v7  ;;  %v7921_v56 = vrot.slane %v7912_v41, 2  ;;  %v7922_v36 = vrot.slane %v7904_v25, 3 }
 0x25b   : > { %v1617_v55 = vmax.f32 %v1376_v42, %v7920_v5  ;;  %v1247_v60 = vrot.slane %v1095_v43, 1  ;;  %v1488_v1 = vrot.slane %v1095_v43, 2  ;;  %v1729_v42 = vrot.slane %v1095_v43, 3 }
 0x25c   : > { %v1625_v19 = vmax.f32 %v1384_v44, %v7921_v56  ;;  %v1854_v7 = vmax.f32 %v1613_v23, %v7922_v36  ;;  %v1969_v5 = vrot.slane %v1095_v43, 4  ;;  %v7923_v45 = vrot.slane %v7908_v0, 3 }
 0x25d   : > { %v1862_v35 = vmax.f32 %v1621_v34, %v1694_v59  ;;  %v7924_v13 = vrot.slane %v5714_v21, 1  ;;  %v1400_v32 = vmax.f32 %v1095_v43, %v1247_v60  ;;  %v7925_v56 = vrot.slane %v5714_v21, 2  ;;  %v4492_v34 = vld [vmem:[#allocation2 + $0x110] sm:$0xff] }
 0x25e   : > { %v1858_v20 = vmax.f32 %v1617_v55, %v7923_v45  ;;  %v1866_v44 = vmax.f32 %v1625_v19, %v1701_v50  ;;  %v2094_v23 = vmax.f32 %v1854_v7, %v1920_v31  ;;  %v7926_v55 = vrot.slane %v5714_v21, 3  ;;  %v4493_v7 = vld [vmem:[#allocation2 + $0x130] sm:$0xff] }
 0x25f   : > { %v1248_v38 = vsel %vm1192_vm1, %v7924_v13, %v1247_v60  ;;  %v1489_v36 = vsel %vm1433_vm2, %v7925_v56, %v1488_v1  ;;  %v7927_v50 = vrot.slane %v5714_v21, 4  ;;  %v2102_v60 = vmax.f32 %v1862_v35, %v1934_v62  ;;  %v4494_v13 = vld [vmem:[#allocation2 + $0x140] sm:$0xff] }
 0x260   : > { %v1730_v2 = vsel %vm1674_vm4, %v7926_v55, %v1729_v42  ;;  %v1399_v59 = vmax.f32 %v5714_v21, %v1248_v38  ;;  %v2098_v31 = vmax.f32 %v1858_v20, %v1927_v16  ;;  %v1641_v19 = vmax.f32 %v1400_v32, %v1488_v1  ;;  %v4497_v1 = vld [vmem:[#allocation2 + $0x160] sm:$0xff] }
 0x261   : > { %v1970_v25 = vsel %vm416_vm0, %v7927_v50, %v1969_v5  ;;  %v6210_v43 = vmax.f32 %v1866_v44, %v1941_v63  ;;  %v906_v45 = vmax.f32 %v4492_v34, %v4493_v7  ;;  %v968_v38 = vmax.f32 %v904_v12, %v4494_v13  ;;  %v4495_v50 = vld [vmem:[#allocation2 + $0x148] sm:$0xff]  ;;  %v4502_v7 = vld [vmem:[#allocation2 + $0x190] sm:$0xff] }
 0x262   : > { %v1640_v56 = vmax.f32 %v1399_v59, %v1489_v36  ;;  %v2440_v21 = vmax.f32 %v2094_v23, %v2098_v31  ;;  %v2444_v55 = vmax.f32 %v2098_v31, %v2102_v60  ;;  %v969_v26 = vmax.f32 %v905_v52, %v4495_v50  ;;  %v4498_v44 = vld [vmem:[#allocation2 + $0x168] sm:$0xff]  ;;  %v4499_v23 = vld [vmem:[#allocation2 + $0x170] sm:$0xff]  ;;  %v4500_v52 = vld [vmem:[#allocation2 + $0x180] sm:$0xff] }
 0x263   : > { %v1882_v0 = vmax.f32 %v1641_v19, %v1729_v42  ;;  %v2448_v16 = vmax.f32 %v2102_v60, %v6210_v43  ;;  %v970_v62 = vmax.f32 %v906_v45, %v4496_v28  ;;  %v1032_v20 = vmax.f32 %v968_v38, %v4497_v1 }
 0x264   : > { %v1881_v41 = vmax.f32 %v1640_v56, %v1730_v2  ;;  %v2488_v63 = vmax.f32 %v2440_v21, %v2102_v60  ;;  %v2492_v35 = vmax.f32 %v2444_v55, %v6210_v43  ;;  %v1033_v32 = vmax.f32 %v969_v26, %v4498_v44  ;;  %v4501_v60 = vld [vmem:[#allocation2 + $0x188] sm:$0xff] }
 0x265   : > { %v6214_v34 = vmax.f32 %v1882_v0, %v1969_v5  ;;  %v2496_v12 = vmax.f32 %v2448_v16, %v5304_v9  ;;  %v1034_v36 = vmax.f32 %v970_v62, %v4499_v23  ;;  %v6217_v42 = vmax.f32 %v1032_v20, %v4500_v52 }
 0x266   : > { %v6219_v59 = vmax.f32 %v1881_v41, %v1970_v25  ;;  %v2536_v31 = vmax.f32 %v2488_v63, %v6210_v43  ;;  %v2540_v2 = vmax.f32 %v2492_v35, %v5304_v9  ;;  %v6223_v19 = vmax.f32 %v1033_v32, %v4501_v60 }
 0x267   : > { %v2544_v5 = vmax.f32 %v2496_v12, %v5498_v58  ;;  %v6228_v45 = vmax.f32 %v1034_v36, %v4502_v7  ;;  %v1249_v13 = vrot.slane %v6217_v42, 1  ;;  %v1490_v16 = vrot.slane %v6217_v42, 2 }
 0x268   : > { %v2198_v25 = vrot.slane %v6219_v59, 6  ;;  %v2584_v56 = vmax.f32 %v2536_v31, %v5304_v9  ;;  %v2588_v21 = vmax.f32 %v2540_v2, %v5498_v58  ;;  %v1250_v50 = vrot.slane %v6223_v19, 1 }
 0x269   : > { %v2592_v55 = vmax.f32 %v2544_v5, %v5705_v37  ;;  %v7928_v28 = vrot.slane %v5769_v54, 6  ;;  %v7929_v23 = vrot.slane %v6022_v57, 1  ;;  %v7930_v52 = vrot.slane %v6013_v33, 2 }
 0x26a   : > { %v2682_v1 = vrot.slane %v2584_v56, 1  ;;  %v2689_v20 = vrot.slane %v2588_v21, 1  ;;  %v2838_v41 = vrot.slane %v2584_v56, 2  ;;  %v2845_v35 = vrot.slane %v2588_v21, 2 }
 0x26b   : > { %v2199_v62 = vsel %vm2179_vm15, %v7928_v28, %v2198_v25  ;;  %v2696_v63 = vrot.slane %v2592_v55, 1  ;;  %v2852_v44 = vrot.slane %v2592_v55, 2  ;;  %v2994_v32 = vrot.slane %v2584_v56, 3 }
 0x26c   : > { %4367 = vmatmul.msk.f32.gmra.mxu1 %vm677_vm3, %v2199_v62  ;;  %v2683_v12 = vsel %vm1192_vm1, %v2680_v15, %v2682_v1  ;;  %v2690_v36 = vsel %vm1192_vm1, %v7929_v23, %v2689_v20  ;;  %v2839_v31 = vsel %vm1433_vm2, %v7930_v52, %v2838_v41  ;;  %v3001_v2 = vrot.slane %v2588_v21, 3 }
 0x26d   : > { %v7931_v60 = vrot.slane %v6031_v10, 1  ;;  %v2799_v7 = vmax.f32 %v6013_v33, %v2683_v12  ;;  %v2802_v25 = vmax.f32 %v6022_v57, %v2690_v36  ;;  %v7932_v28 = vrot.slane %v6022_v57, 2 }
 0x26e   : > { %v7933_v1 = vrot.slane %v6031_v10, 2  ;;  %v7934_v41 = vrot.slane %v6013_v33, 3  ;;  %v3150_v26 = vrot.slane %v2584_v56, 4  ;;  %v7936_v0 = vrot.slane %v6031_v10, 3 }
 0x26f   : > { %v2697_v5 = vsel %vm1192_vm1, %v7931_v60, %v2696_v63  ;;  %v2846_v15 = vsel %vm1433_vm2, %v7932_v28, %v2845_v35  ;;  %v7935_v63 = vrot.slane %v6022_v57, 3  ;;  %v2955_v52 = vmax.f32 %v2799_v7, %v2839_v31 }
 0x270   : > { %v2805_v62 = vmax.f32 %v6031_v10, %v2697_v5  ;;  %v2853_v20 = vsel %vm1433_vm2, %v7933_v1, %v2852_v44  ;;  %v2995_v23 = vsel %vm1674_vm4, %v7934_v41, %v2994_v32  ;;  %v2958_v36 = vmax.f32 %v2802_v25, %v2846_v15 }
 0x271   : > { %v3002_v12 = vsel %vm1674_vm4, %v7935_v63, %v3001_v2  ;;  %v3008_v60 = vrot.slane %v2592_v55, 3  ;;  %v3157_v35 = vrot.slane %v2588_v21, 4  ;;  %v3164_v28 = vrot.slane %v2592_v55, 4 }
 0x272   : > { %v2961_v38 = vmax.f32 %v2805_v62, %v2853_v20  ;;  %v1251_v5 = vsel %vm1192_vm1, %v1249_v13, %v1250_v50  ;;  %v3111_v1 = vmax.f32 %v2955_v52, %v2995_v23  ;;  %v3114_v39 = vmax.f32 %v2958_v36, %v3002_v12 }
 0x273   : > { %v3009_v44 = vsel %vm1674_vm4, %v7936_v0, %v3008_v60  ;;  %v7937_v32 = vrot.slane %v6013_v33, 4  ;;  %v7938_v31 = vrot.slane %v6022_v57, 4  ;;  %v7939_v21 = vrot.slane %v6031_v10, 4 }
 0x274   : > { %v3117_v2 = vmax.f32 %v2961_v38, %v3009_v44  ;;  %v7940_v13 = vrot.slane %v6228_v45, 1  ;;  %v1401_v33 = vmax.f32 %v6217_v42, %v1251_v5  ;;  %v1491_v57 = vrot.slane %v6223_v19, 2 }
 0x275   : > { %v3151_v41 = vsel %vm416_vm0, %v7937_v32, %v3150_v26  ;;  %v3158_v56 = vsel %vm416_vm0, %v7938_v31, %v3157_v35  ;;  %v3165_v55 = vsel %vm416_vm0, %v7939_v21, %v3164_v28  ;;  %v1493_v15 = vrot.slane %v6228_v45, 2 }
 0x276   : > { %v1253_v7 = vsel %vm1192_vm1, %v1250_v50, %v7940_v13  ;;  %v3267_v0 = vmax.f32 %v3111_v1, %v3151_v41  ;;  %v6287_v25 = vmax.f32 %v3114_v39, %v3158_v56  ;;  %v6291_v38 = vmax.f32 %v3117_v2, %v3165_v55 }
 0x277   : > { %v1402_v26 = vmax.f32 %v6223_v19, %v1253_v7  ;;  %v1731_v10 = vrot.slane %v6217_v42, 3  ;;  %v1732_v20 = vrot.slane %v6223_v19, 3  ;;  %v1734_v50 = vrot.slane %v6228_v45, 3 }
 0x278   : > { %v3484_v62 = vmax.f32 %v3267_v0, %v6287_v25  ;;  %v1971_v39 = vrot.slane %v6217_v42, 4  ;;  %v3328_v23 = vrot.slane %v6291_v38, 4  ;;  %v3487_v63 = vmax.f32 %v6287_v25, %v6291_v38 }
 0x279   : > { %v1492_v12 = vsel %vm1433_vm2, %v1490_v16, %v1491_v57  ;;  %v1494_v52 = vsel %vm1433_vm2, %v1491_v57, %v1493_v15  ;;  %v1733_v28 = vsel %vm1674_vm4, %v1731_v10, %v1732_v20  ;;  %v7941_v42 = vrot.slane %v6132_v53, 4  ;;  %v7943_v10 = vld [vmem:[#allocation18_spill] sm:$0xff] }
 0x27a   : > { %v6308_v36 = vmax.f32 %v3484_v62, %v6291_v38  ;;  %v1642_v60 = vmax.f32 %v1401_v33, %v1492_v12  ;;  %v1643_v35 = vmax.f32 %v1402_v26, %v1494_v52  ;;  %v1735_v44 = vsel %vm1674_vm4, %v1732_v20, %v1734_v50 }
 0x27b   : > { %v3329_v5 = vsel %vm416_vm0, %v7941_v42, %v3328_v23  ;;  %v1972_v16 = vrot.slane %v6223_v19, 4  ;;  %v1974_v1 = vrot.slane %v6228_v45, 4  ;;  %v2449_v2 = vmax.f32 %v5982_v40, %v7913_v49 }
 0x27c   : > { %4395 = vmatmul.msk.f32.gmra.mxu3 %vm677_vm3, %v3329_v5  ;;  %v1883_v32 = vmax.f32 %v1642_v60, %v1733_v28  ;;  %v1884_v41 = vmax.f32 %v1643_v35, %v1735_v44  ;;  %v2450_v31 = vmax.f32 %v5984_v46, %v5179_v51  ;;  %v2451_v19 = vmax.f32 %v5986_v29, %v5313_v11  ;;  %v4503_v44 = vld [vmem:[#allocation2 + $0x198] sm:$0xff] }
 0x27d   : > { %v1973_v56 = vsel %vm416_vm0, %v1971_v39, %v1972_v16  ;;  %v1975_v21 = vsel %vm416_vm0, %v1972_v16, %v1974_v1  ;;  %v907_v55 = vmax.f32 %v6116_v17, %v6134_v3  ;;  %v2497_v40 = vmax.f32 %v2449_v2, %v5378_v4 }
 0x27e   : > { %v6332_v13 = vmax.f32 %v1883_v32, %v1973_v56  ;;  %v6334_v7 = vmax.f32 %v1884_v41, %v1975_v21  ;;  %v2498_v46 = vmax.f32 %v2450_v31, %v5390_v8  ;;  %v2499_v0 = vmax.f32 %v2451_v19, %v5502_v6 }
 0x27f   : > { %v971_v33 = vmax.f32 %v907_v55, %v6151_v61  ;;  %v2452_v26 = vmax.f32 %v6210_v43, %v5304_v9  ;;  %v7942_v29 = vmax.f32 %v7913_v49, %v5378_v4  ;;  %v2545_v61 = vmax.f32 %v2497_v40, %v5574_v27 }
 0x280   : > { %v2200_v3 = vrot.slane %v6332_v13, 6  ;;  %v2201_v57 = vrot.slane %v6334_v7, 6  ;;  %v2465_v62 = vmax.f32 %v7943_v10, %v6332_v13  ;;  %v2466_v20 = vmax.f32 %v5769_v54, %v6334_v7 }
 0x281   : > { %v6346_v17 = vmax.f32 %v7942_v29, %v5574_v27  ;;  %v2546_v43 = vmax.f32 %v2498_v46, %v5581_v24  ;;  %v2547_v39 = vmax.f32 %v2499_v0, %v5711_v14  ;;  %v1035_v49 = vmax.f32 %v971_v33, %v6171_v47 }
 0x282   : > { %v2202_v23 = vsel %vm2179_vm15, %v2200_v3, %v2201_v57  ;;  %v2500_v12 = vmax.f32 %v2452_v26, %v5498_v58  ;;  %v7944_v52 = vmax.f32 %v5179_v51, %v5390_v8  ;;  %v7945_v35 = vmax.f32 %v5313_v11, %v5502_v6 }
 0x283   : > { %4368 = vmatmul.msk.f32.gmra.mxu1 %vm677_vm3, %v2202_v23  ;;  %v2593_v47 = vmax.f32 %v2545_v61, %v7943_v10  ;;  %v2594_v42 = vmax.f32 %v2546_v43, %v5769_v54  ;;  %v6378_v5 = vmax.f32 %v2547_v39, %v6219_v59  ;;  %v1099_v16 = vmax.f32 %v1035_v49, %v4503_v44 }
 0x284   : > { %v6366_v60 = vmax.f32 %v7944_v52, %v5581_v24  ;;  %v6372_v28 = vmax.f32 %v7945_v35, %v5711_v14  ;;  %v2548_v51 = vmax.f32 %v2500_v12, %v5705_v37  ;;  %v7946_v32 = vmax.f32 %v5304_v9, %v5498_v58 }
 0x285   : > { %v2549_v41 = vmax.f32 %v6346_v17, %v7943_v10  ;;  %v2698_v31 = vrot.slane %v2593_v47, 1  ;;  %v2699_v56 = vrot.slane %v2594_v42, 1  ;;  %v2701_v21 = vrot.slane %v6378_v5, 1 }
 0x286   : > { %v6385_v11 = vmax.f32 %v7946_v32, %v5705_v37  ;;  %v2550_v2 = vmax.f32 %v6366_v60, %v5769_v54  ;;  %v2854_v19 = vrot.slane %v2593_v47, 2  ;;  %v2855_v55 = vrot.slane %v2594_v42, 2 }
 0x287   : > { %v2857_v40 = vrot.slane %v6378_v5, 2  ;;  %v3010_v46 = vrot.slane %v2593_v47, 3  ;;  %v3011_v0 = vrot.slane %v2594_v42, 3  ;;  %v2700_v9 = vsel %vm1192_vm1, %v2698_v31, %v2699_v56 }
 0x288   : > { %v2702_v33 = vsel %vm1192_vm1, %v2699_v56, %v2701_v21  ;;  %v3013_v26 = vrot.slane %v6378_v5, 3  ;;  %v3166_v29 = vrot.slane %v2593_v47, 4  ;;  %v2806_v17 = vmax.f32 %v2593_v47, %v2700_v9 }
 0x289   : > { %v2807_v3 = vmax.f32 %v2594_v42, %v2702_v33  ;;  %v2856_v61 = vsel %vm1433_vm2, %v2854_v19, %v2855_v55  ;;  %v2858_v43 = vsel %vm1433_vm2, %v2855_v55, %v2857_v40  ;;  %v3012_v39 = vsel %vm1674_vm4, %v3010_v46, %v3011_v0 }
 0x28a   : > { %v3014_v49 = vsel %vm1674_vm4, %v3011_v0, %v3013_v26  ;;  %v3167_v23 = vrot.slane %v2594_v42, 4  ;;  %v3169_v12 = vrot.slane %v6378_v5, 4  ;;  %v2962_v52 = vmax.f32 %v2806_v17, %v2856_v61 }
 0x28b   : > { %v2963_v60 = vmax.f32 %v2807_v3, %v2858_v43  ;;  %v1254_v35 = vrot.slane %v1099_v16, 1  ;;  %v1495_v44 = vrot.slane %v1099_v16, 2  ;;  %v1736_v31 = vrot.slane %v1099_v16, 3 }
 0x28c   : > { %v3168_v32 = vsel %vm416_vm0, %v3166_v29, %v3167_v23  ;;  %v3170_v47 = vsel %vm416_vm0, %v3167_v23, %v3169_v12  ;;  %v1976_v56 = vrot.slane %v1099_v16, 4  ;;  %v3118_v19 = vmax.f32 %v2962_v52, %v3012_v39 }
 0x28d   : > { %v3119_v9 = vmax.f32 %v2963_v60, %v3014_v49  ;;  %v7947_v55 = vrot.slane %v6228_v45, 1  ;;  %v1404_v0 = vmax.f32 %v1099_v16, %v1254_v35  ;;  %v1496_v33 = vsel %vm1433_vm2, %v1493_v15, %v1495_v44 }
 0x28e   : > { %v1737_v29 = vsel %vm1674_vm4, %v1734_v50, %v1736_v31  ;;  %v1977_v17 = vsel %vm416_vm0, %v1974_v1, %v1976_v56  ;;  %v6416_v3 = vmax.f32 %v3118_v19, %v3168_v32  ;;  %v2596_v16 = vmax.f32 %v2548_v51, %v6214_v34 }
 0x28f   : > { %v1255_v46 = vsel %vm1192_vm1, %v7947_v55, %v1254_v35  ;;  %v6418_v61 = vmax.f32 %v3119_v9, %v3170_v47  ;;  %v1645_v43 = vmax.f32 %v1404_v0, %v1495_v44  ;;  %v2551_v49 = vmax.f32 %v6372_v28, %v6219_v59 }
 0x290   : > { %v1403_v42 = vmax.f32 %v6228_v45, %v1255_v46  ;;  %v2552_v15 = vmax.f32 %v6385_v11, %v6214_v34  ;;  %v6426_v50 = vmax.f32 %v2549_v41, %v6332_v13  ;;  %v3330_v45 = vrot.slane %v6416_v3, 4 }
 0x291   : > { %v3331_v1 = vrot.slane %v6418_v61, 4  ;;  %v1886_v23 = vmax.f32 %v1645_v43, %v1736_v31  ;;  %v2703_v52 = vrot.slane %v2596_v16, 1  ;;  %v2859_v35 = vrot.slane %v2596_v16, 2 }
 0x292   : > { %v1644_v39 = vmax.f32 %v1403_v42, %v1496_v33  ;;  %v3015_v44 = vrot.slane %v2596_v16, 3  ;;  %v3171_v51 = vrot.slane %v2596_v16, 4  ;;  %v2598_v11 = vmax.f32 %v2550_v2, %v6334_v7 }
 0x293   : > { %v3332_v32 = vsel %vm416_vm0, %v3330_v45, %v3331_v1  ;;  %v6431_v47 = vmax.f32 %v1886_v23, %v1976_v56  ;;  %v2704_v28 = vsel %vm1192_vm1, %v2701_v21, %v2703_v52  ;;  %v2860_v31 = vsel %vm1433_vm2, %v2857_v40, %v2859_v35 }
 0x294   : > { %v1885_v60 = vmax.f32 %v1644_v39, %v1737_v29  ;;  %4396 = vmatmul.msk.f32.gmra.mxu3 %vm677_vm3, %v3332_v32  ;;  %v2808_v19 = vmax.f32 %v6378_v5, %v2704_v28  ;;  %v3016_v9 = vsel %vm1674_vm4, %v3013_v26, %v3015_v44  ;;  %v3172_v56 = vsel %vm416_vm0, %v3169_v12, %v3171_v51 }
 0x295   : > { %v2468_v55 = vmax.f32 %v6214_v34, %v6431_v47  ;;  %v2600_v46 = vmax.f32 %v2552_v15, %v6431_v47  ;;  %v2705_v21 = vrot.slane %v6426_v50, 1  ;;  %v2706_v40 = vrot.slane %v2598_v11, 1 }
 0x296   : > { %v6436_v41 = vmax.f32 %v1885_v60, %v1977_v17  ;;  %v2964_v42 = vmax.f32 %v2808_v19, %v2860_v31  ;;  %v2861_v26 = vrot.slane %v6426_v50, 2  ;;  %v2862_v29 = vrot.slane %v2598_v11, 2 }
 0x297   : > { %v2710_v33 = vrot.slane %v2600_v46, 1  ;;  %v2707_v39 = vsel %vm1192_vm1, %v2705_v21, %v2706_v40  ;;  %v2866_v45 = vrot.slane %v2600_v46, 2  ;;  %v3018_v31 = vrot.slane %v2598_v11, 3 }
 0x298   : > { %v2203_v2 = vrot.slane %v6436_v41, 6  ;;  %v2467_v0 = vmax.f32 %v6219_v59, %v6436_v41  ;;  %v2599_v5 = vmax.f32 %v2551_v49, %v6436_v41  ;;  %v3120_v17 = vmax.f32 %v2964_v42, %v3016_v9 }
 0x299   : > { %v2863_v15 = vsel %vm1433_vm2, %v2861_v26, %v2862_v29  ;;  %v3017_v49 = vrot.slane %v6426_v50, 3  ;;  %v3173_v42 = vrot.slane %v6426_v50, 4  ;;  %v7962_v25 = vmax.f32 %v5574_v27, %v7943_v10 }
 0x29a   : > { %v2204_v12 = vsel %vm2179_vm15, %v2201_v57, %v2203_v2  ;;  %v2708_v43 = vrot.slane %v2599_v5, 1  ;;  %v2864_v16 = vrot.slane %v2599_v5, 2  ;;  %v6458_v23 = vmax.f32 %v3120_v17, %v3172_v56 }
 0x29b   : > { %4369 = vmatmul.msk.f32.gmra.mxu1 %vm677_vm3, %v2204_v12  ;;  %v2809_v57 = vmax.f32 %v6426_v50, %v2707_v39  ;;  %v3020_v9 = vrot.slane %v2599_v5, 3  ;;  %v3022_v2 = vrot.slane %v2600_v46, 3  ;;  %v3174_v12 = vrot.slane %v2598_v11, 4 }
 0x29c   : > { %v2709_v52 = vsel %vm1192_vm1, %v2706_v40, %v2708_v43  ;;  %v2711_v60 = vsel %vm1192_vm1, %v2708_v43, %v2710_v33  ;;  %v2865_v51 = vsel %vm1433_vm2, %v2862_v29, %v2864_v16  ;;  %v2867_v32 = vsel %vm1433_vm2, %v2864_v16, %v2866_v45 }
 0x29d   : > { %v2810_v35 = vmax.f32 %v2598_v11, %v2709_v52  ;;  %v2811_v44 = vmax.f32 %v2599_v5, %v2711_v60  ;;  %v3333_v28 = vrot.slane %v6458_v23, 4  ;;  %v2965_v19 = vmax.f32 %v2809_v57, %v2863_v15 }
 0x29e   : > { %v3019_v33 = vsel %vm1674_vm4, %v3017_v49, %v3018_v31  ;;  %v3021_v26 = vsel %vm1674_vm4, %v3018_v31, %v3020_v9  ;;  %v3023_v29 = vsel %vm1674_vm4, %v3020_v9, %v3022_v2  ;;  %v3176_v16 = vrot.slane %v2599_v5, 4 }
 0x29f   : > { %v2966_v21 = vmax.f32 %v2810_v35, %v2865_v51  ;;  %v2967_v56 = vmax.f32 %v2811_v44, %v2867_v32  ;;  %v3334_v40 = vsel %vm416_vm0, %v3331_v1, %v3333_v28  ;;  %v3121_v17 = vmax.f32 %v2965_v19, %v3019_v33 }
 0x2a0   : > { %4397 = vmatmul.msk.f32.gmra.mxu3 %vm677_vm3, %v3334_v40  ;;  %v3175_v15 = vsel %vm416_vm0, %v3173_v42, %v3174_v12  ;;  %v3178_v45 = vrot.slane %v2600_v46, 4  ;;  %v3530_v50 = vmax.f32 %v6158_v18, %v6416_v3  ;;  %v3177_v1 = vsel %vm416_vm0, %v3174_v12, %v3176_v16 }
 0x2a1   : > { %v3122_v43 = vmax.f32 %v2966_v21, %v3021_v26  ;;  %v3123_v39 = vmax.f32 %v2967_v56, %v3023_v29  ;;  %v6476_v49 = vmax.f32 %v3121_v17, %v3175_v15  ;;  %v3531_v11 = vmax.f32 %v6161_v22, %v6418_v61 }
 0x2a2   : > { %v3532_v52 = vmax.f32 %v6308_v36, %v6458_v23  ;;  %v3179_v60 = vsel %vm416_vm0, %v3176_v16, %v3178_v45  ;;  %v7948_v46 = vmax.f32 %v5378_v4, %v5574_v27  ;;  %v7949_v18 = vmax.f32 %v5390_v8, %v5581_v24 }
 0x2a3   : > { %v6483_v5 = vmax.f32 %v3122_v43, %v3177_v1  ;;  %v6493_v44 = vmax.f32 %v3123_v39, %v3179_v60  ;;  %v3335_v22 = vrot.slane %v6476_v49, 4  ;;  %v3554_v36 = vmax.f32 %v3530_v50, %v6476_v49 }
 0x2a4   : > { %v2505_v57 = vmax.f32 %v7948_v46, %v7943_v10  ;;  %v2506_v35 = vmax.f32 %v7949_v18, %v5769_v54  ;;  %v7950_v51 = vmax.f32 %v5502_v6, %v5711_v14  ;;  %v7951_v8 = vmax.f32 %v5498_v58, %v5705_v37 }
 0x2a5   : > { %v3336_v28 = vrot.slane %v6483_v5, 4  ;;  %v3555_v4 = vmax.f32 %v3531_v11, %v6483_v5  ;;  %v3556_v9 = vmax.f32 %v3532_v52, %v6493_v44  ;;  %v3602_v21 = vrot.slane %v3554_v36, 1 }
 0x2a6   : > { %v2507_v32 = vmax.f32 %v7950_v51, %v6219_v59  ;;  %v2508_v19 = vmax.f32 %v7951_v8, %v6214_v34  ;;  %v2553_v31 = vmax.f32 %v2505_v57, %v6332_v13  ;;  %v3690_v56 = vrot.slane %v3554_v36, 2 }
 0x2a7   : > { %v3778_v2 = vrot.slane %v3554_v36, 3  ;;  %v3337_v42 = vsel %vm416_vm0, %v3335_v22, %v3336_v28  ;;  %v3603_v6 = vrot.slane %v3555_v4, 1  ;;  %v3691_v40 = vrot.slane %v3555_v4, 2 }
 0x2a8   : > { %v3779_v33 = vrot.slane %v3555_v4, 3  ;;  %4398 = vmatmul.msk.f32.gmra.mxu3 %vm677_vm3, %v3337_v42  ;;  %v3605_v26 = vrot.slane %v3556_v9, 1  ;;  %v3693_v12 = vrot.slane %v3556_v9, 2  ;;  %v3781_v29 = vrot.slane %v3556_v9, 3  ;;  %v7952_v42 = vld [vmem:[#allocation42_spill] sm:$0xff] }
 0x2a9   : > { %v3866_v17 = vrot.slane %v3554_v36, 4  ;;  %v3604_v58 = vsel %vm1192_vm1, %v3602_v21, %v3603_v6  ;;  %v3692_v43 = vsel %vm1433_vm2, %v3690_v56, %v3691_v40  ;;  %v3867_v39 = vrot.slane %v3555_v4, 4 }
 0x2aa   : > { %v3780_v16 = vsel %vm1674_vm4, %v3778_v2, %v3779_v33  ;;  %v3606_v15 = vsel %vm1192_vm1, %v3603_v6, %v3605_v26  ;;  %v3666_v45 = vmax.f32 %v3554_v36, %v3604_v58  ;;  %v3694_v50 = vsel %vm1433_vm2, %v3691_v40, %v3693_v12  ;;  %v7953_v40 = vld [vmem:[#allocation43_spill] sm:$0xff]  ;;  %v7954_v58 = vld [vmem:[#allocation45_spill] sm:$0xff] }
 0x2ab   : > { %v3782_v1 = vsel %vm1674_vm4, %v3779_v33, %v3781_v29  ;;  %v3667_v11 = vmax.f32 %v3555_v4, %v3606_v15  ;;  %v3868_v52 = vsel %vm416_vm0, %v3866_v17, %v3867_v39  ;;  %v3869_v60 = vrot.slane %v3556_v9, 4 }
 0x2ac   : > { %v3338_v46 = vrot.slane %v6493_v44, 4  ;;  %v3754_v57 = vmax.f32 %v3666_v45, %v3692_v43  ;;  %v3668_v18 = vmax.f32 %v3556_v9, %v3605_v26  ;;  %v2554_v22 = vmax.f32 %v2506_v35, %v6334_v7  ;;  %v7955_v26 = vld [vmem:[#allocation44_spill] sm:$0xff] }
 0x2ad   : > { %v2555_v51 = vmax.f32 %v2507_v32, %v6436_v41  ;;  %v3755_v8 = vmax.f32 %v3667_v11, %v3694_v50  ;;  %v3870_v21 = vsel %vm416_vm0, %v3867_v39, %v3869_v60  ;;  %v2556_v56 = vmax.f32 %v2508_v19, %v6431_v47 }
 0x2ae   : > { %v3339_v36 = vsel %vm416_vm0, %v3336_v28, %v3338_v46  ;;  %v3842_v2 = vmax.f32 %v3754_v57, %v3780_v16  ;;  %v3756_v4 = vmax.f32 %v3668_v18, %v3693_v12  ;;  %v2601_v6 = vmax.f32 %v2553_v31, %v7952_v42 }
 0x2af   : > { %v2602_v33 = vmax.f32 %v2554_v22, %v7953_v40  ;;  %v3843_v17 = vmax.f32 %v3755_v8, %v3782_v1  ;;  %v2603_v9 = vmax.f32 %v2555_v51, %v7954_v58  ;;  %v2604_v35 = vmax.f32 %v2556_v56, %v7955_v26 }
 0x2b0   : > { %v7956_v32 = vmax.f32 %v6126_v48, %v6130_v30  ;;  %v3930_v28 = vmax.f32 %v3842_v2, %v3868_v52  ;;  %4399 = vmatmul.msk.f32.gmra.mxu3 %vm677_vm3, %v3339_v36  ;;  %v3844_v19 = vmax.f32 %v3756_v4, %v3781_v29  ;;  %v2712_v12 = vrot.slane %v2601_v6, 1 }
 0x2b1   : > { %v2713_v16 = vrot.slane %v2602_v33, 1  ;;  %v3931_v31 = vmax.f32 %v3843_v17, %v3870_v21  ;;  %v2715_v39 = vrot.slane %v2603_v9, 1  ;;  %v2717_v15 = vrot.slane %v2604_v35, 1 }
 0x2b2   : > { %v6532_v43 = vmax.f32 %v7956_v32, %v6416_v3  ;;  %v2868_v45 = vrot.slane %v2601_v6, 2  ;;  %v3978_v50 = vrot.slane %v3930_v28, 2  ;;  %v3932_v1 = vmax.f32 %v3844_v19, %v3869_v60 }
 0x2b3   : > { %v2714_v11 = vsel %vm1192_vm1, %v2712_v12, %v2713_v16  ;;  %v2869_v46 = vrot.slane %v2602_v33, 2  ;;  %v3979_v57 = vrot.slane %v3931_v31, 2  ;;  %v2716_v48 = vsel %vm1192_vm1, %v2713_v16, %v2715_v39 }
 0x2b4   : > { %v2718_v18 = vsel %vm1192_vm1, %v2715_v39, %v2717_v15  ;;  %v2812_v52 = vmax.f32 %v2601_v6, %v2714_v11  ;;  %v3981_v22 = vrot.slane %v3932_v1, 2  ;;  %v2813_v51 = vmax.f32 %v2602_v33, %v2716_v48 }
 0x2b5   : > { %v2814_v29 = vmax.f32 %v2603_v9, %v2718_v18  ;;  %v2870_v8 = vsel %vm1433_vm2, %v2868_v45, %v2869_v46  ;;  %v3980_v21 = vsel %vm1433_vm2, %v3978_v50, %v3979_v57  ;;  %v2871_v36 = vrot.slane %v2603_v9, 2 }
 0x2b6   : > { %v2873_v56 = vrot.slane %v2604_v35, 2  ;;  %v2968_v2 = vmax.f32 %v2812_v52, %v2870_v8  ;;  %4411 = vmatmul.msk.f32.vlgmr.msrb.gmra.mxu1 %vm677_vm3, %v3980_v21  ;;  %v3982_v60 = vsel %vm1433_vm2, %v3979_v57, %v3981_v22  ;;  %v3024_v4 = vrot.slane %v2601_v6, 3 }
 0x2b7   : > { %v3025_v17 = vrot.slane %v2602_v33, 3  ;;  %v3027_v32 = vrot.slane %v2603_v9, 3  ;;  %v2872_v28 = vsel %vm1433_vm2, %v2869_v46, %v2871_v36  ;;  %v3029_v12 = vrot.slane %v2604_v35, 3  ;;  %v7957_v46 = vld [vmem:[#allocation17_spill] sm:$0xff] }
 0x2b8   : > { %v2874_v19 = vsel %vm1433_vm2, %v2871_v36, %v2873_v56  ;;  %v3180_v16 = vrot.slane %v2601_v6, 4  ;;  %v2969_v31 = vmax.f32 %v2813_v51, %v2872_v28  ;;  %v3181_v11 = vrot.slane %v2602_v33, 4 }
 0x2b9   : > { %v2970_v39 = vmax.f32 %v2814_v29, %v2874_v19  ;;  %v3026_v15 = vsel %vm1674_vm4, %v3024_v4, %v3025_v17  ;;  %v3028_v45 = vsel %vm1674_vm4, %v3025_v17, %v3027_v32  ;;  %v3030_v50 = vsel %vm1674_vm4, %v3027_v32, %v3029_v12 }
 0x2ba   : > { %v3124_v1 = vmax.f32 %v2968_v2, %v3026_v15  ;;  %v3183_v57 = vrot.slane %v2603_v9, 4  ;;  %v3125_v48 = vmax.f32 %v2969_v31, %v3028_v45  ;;  %v3185_v52 = vrot.slane %v2604_v35, 4 }
 0x2bb   : > { %v3126_v18 = vmax.f32 %v2970_v39, %v3030_v50  ;;  %v7958_v22 = vmax.f32 %v7957_v46, %v6132_v53  ;;  %v3182_v6 = vsel %vm416_vm0, %v3180_v16, %v3181_v11  ;;  %v3511_v29 = vmax.f32 %v3487_v63, %v6458_v23 }
 0x2bc   : > { %v3184_v51 = vsel %vm416_vm0, %v3181_v11, %v3183_v57  ;;  %v3533_v33 = vmax.f32 %v6532_v43, %v6476_v49  ;;  %v3186_v9 = vsel %vm416_vm0, %v3183_v57, %v3185_v52  ;;  %v6560_v35 = vmax.f32 %v3124_v1, %v3182_v6 }
 0x2bd   : > { %v3510_v8 = vmax.f32 %v7958_v22, %v6418_v61  ;;  %v6562_v21 = vmax.f32 %v3125_v48, %v3184_v51  ;;  %v6565_v56 = vmax.f32 %v3126_v18, %v3186_v9  ;;  %v3535_v2 = vmax.f32 %v3511_v29, %v6493_v44 }
 0x2be   : > { %7959 = vst [vmem:[#allocation38_spill] sm:$0xff] %v6560_v35  ;;  %v2509_v63 = vmax.f32 %v7962_v25, %v6332_v13  ;;  %v7963_v43 = vmax.f32 %v5581_v24, %v5769_v54  ;;  %4412 = vmatmul.msk.f32.gmra.mxu1 %vm677_vm3, %v3982_v60  ;;  %v3340_v17 = vrot.slane %v6560_v35, 4  ;;  %v3557_v28 = vmax.f32 %v3533_v33, %v6560_v35 }
 0x2bf   : > { %7960 = vst [vmem:[#allocation20_spill] sm:$0xff] %v6562_v21  ;;  %v3534_v36 = vmax.f32 %v3510_v8, %v6483_v5  ;;  %v3341_v32 = vrot.slane %v6562_v21, 4  ;;  %v3559_v12 = vmax.f32 %v3535_v2, %v6565_v56  ;;  %v3343_v27 = vrot.slane %v6565_v56, 4 }
 0x2c0   : > { %7961 = vst [vmem:[#allocation11_spill] sm:$0xff] %v6565_v56  ;;  %v2510_v4 = vmax.f32 %v7963_v43, %v6334_v7  ;;  %v7964_v16 = vmax.f32 %v5711_v14, %v6219_v59  ;;  %v7965_v60 = vmax.f32 %v5705_v37, %v6214_v34  ;;  %v3607_v15 = vrot.slane %v3557_v28, 1 }
 0x2c1   : > { %v3558_v19 = vmax.f32 %v3534_v36, %v6562_v21  ;;  %v3342_v39 = vsel %vm416_vm0, %v3340_v17, %v3341_v32  ;;  %v3695_v50 = vrot.slane %v3557_v28, 2  ;;  %v3610_v1 = vrot.slane %v3559_v12, 1 }
 0x2c2   : > { %v2511_v24 = vmax.f32 %v7964_v16, %v6436_v41  ;;  %v2512_v31 = vmax.f32 %v7965_v60, %v6431_v47  ;;  %4400 = vmatmul.msk.f32.gmra.mxu3 %vm677_vm3, %v3342_v39  ;;  %v3698_v57 = vrot.slane %v3559_v12, 2  ;;  %v3783_v48 = vrot.slane %v3557_v28, 3 }
 0x2c3   : > { %v3608_v45 = vrot.slane %v3558_v19, 1  ;;  %v3696_v11 = vrot.slane %v3558_v19, 2  ;;  %v3784_v14 = vrot.slane %v3558_v19, 3  ;;  %v3786_v52 = vrot.slane %v3559_v12, 3 }
 0x2c4   : > { %v3871_v46 = vrot.slane %v3557_v28, 4  ;;  %v3872_v9 = vrot.slane %v3558_v19, 4  ;;  %v3874_v2 = vrot.slane %v3559_v12, 4  ;;  %v3344_v25 = vsel %vm416_vm0, %v3341_v32, %v3343_v27  ;;  %v7967_v32 = vld [vmem:[#allocation5_spill] sm:$0xff] }
 0x2c5   : > { %v3609_v18 = vsel %vm1192_vm1, %v3607_v15, %v3608_v45  ;;  %v3611_v22 = vsel %vm1192_vm1, %v3608_v45, %v3610_v1  ;;  %v3697_v8 = vsel %vm1433_vm2, %v3695_v50, %v3696_v11  ;;  %v3699_v6 = vsel %vm1433_vm2, %v3696_v11, %v3698_v57 }
 0x2c6   : > { %v3669_v37 = vmax.f32 %v3557_v28, %v3609_v18  ;;  %v3670_v51 = vmax.f32 %v3558_v19, %v3611_v22  ;;  %v3785_v29 = vsel %vm1674_vm4, %v3783_v48, %v3784_v14  ;;  %v3787_v33 = vsel %vm1674_vm4, %v3784_v14, %v3786_v52  ;;  %v7966_v48 = vld [vmem:[#allocation12_spill] sm:$0xff] }
 0x2c7   : > { %v3671_v43 = vmax.f32 %v3559_v12, %v3610_v1  ;;  %v3873_v16 = vsel %vm416_vm0, %v3871_v46, %v3872_v9  ;;  %v2557_v28 = vmax.f32 %v2509_v63, %v7952_v42  ;;  %v2558_v60 = vmax.f32 %v2510_v4, %v7953_v40  ;;  %v7968_v63 = vld [vmem:[#allocation14_spill] sm:$0xff] }
 0x2c8   : > { %v3757_v36 = vmax.f32 %v3669_v37, %v3697_v8  ;;  %v3758_v17 = vmax.f32 %v3670_v51, %v3699_v6  ;;  %v3875_v15 = vsel %vm416_vm0, %v3872_v9, %v3874_v2  ;;  %v2559_v50 = vmax.f32 %v2511_v24, %v7954_v58 }
 0x2c9   : > { %v3759_v45 = vmax.f32 %v3671_v43, %v3698_v57  ;;  %v2560_v19 = vmax.f32 %v2512_v31, %v7955_v26  ;;  %v2605_v18 = vmax.f32 %v2557_v28, %v7966_v48  ;;  %v2606_v12 = vmax.f32 %v2558_v60, %v7967_v32  ;;  %v7969_v57 = vld [vmem:[#allocation13_spill] sm:$0xff] }
 0x2ca   : > { %v3845_v39 = vmax.f32 %v3757_v36, %v3785_v29  ;;  %v3846_v11 = vmax.f32 %v3758_v17, %v3787_v33  ;;  %4401 = vmatmul.msk.f32.gmra.mxu3 %vm677_vm3, %v3344_v25  ;;  %v2607_v14 = vmax.f32 %v2559_v50, %v7968_v63  ;;  %v3488_v4 = vmax.f32 %v6130_v30, %v6416_v3 }
 0x2cb   : > { %v3847_v1 = vmax.f32 %v3759_v45, %v3786_v52  ;;  %v2608_v22 = vmax.f32 %v2560_v19, %v7969_v57  ;;  %v2719_v24 = vrot.slane %v2605_v18, 1  ;;  %v2720_v37 = vrot.slane %v2606_v12, 1 }
 0x2cc   : > { %v3933_v27 = vmax.f32 %v3845_v39, %v3873_v16  ;;  %v3934_v46 = vmax.f32 %v3846_v11, %v3875_v15  ;;  %v2722_v6 = vrot.slane %v2607_v14, 1  ;;  %v2875_v51 = vrot.slane %v2605_v18, 2 }
 0x2cd   : > { %v3935_v31 = vmax.f32 %v3847_v1, %v3874_v2  ;;  %v2721_v33 = vsel %vm1192_vm1, %v2719_v24, %v2720_v37  ;;  %v2724_v9 = vrot.slane %v2608_v22, 1  ;;  %v2876_v36 = vrot.slane %v2606_v12, 2 }
 0x2ce   : > { %v3983_v8 = vrot.slane %v3933_v27, 2  ;;  %v3984_v29 = vrot.slane %v3934_v46, 2  ;;  %v2723_v25 = vsel %vm1192_vm1, %v2720_v37, %v2722_v6  ;;  %v2815_v43 = vmax.f32 %v2605_v18, %v2721_v33 }
 0x2cf   : > { %v3986_v52 = vrot.slane %v3935_v31, 2  ;;  %v2878_v17 = vrot.slane %v2607_v14, 2  ;;  %v2725_v16 = vsel %vm1192_vm1, %v2722_v6, %v2724_v9  ;;  %v2816_v28 = vmax.f32 %v2606_v12, %v2723_v25 }
 0x2d0   : > { %v3985_v30 = vsel %vm1433_vm2, %v3983_v8, %v3984_v29  ;;  %v2877_v60 = vsel %vm1433_vm2, %v2875_v51, %v2876_v36  ;;  %v2817_v39 = vmax.f32 %v2607_v14, %v2725_v16  ;;  %v2880_v45 = vrot.slane %v2608_v22, 2  ;;  %v6634_v16 = vld [vmem:[#allocation2 + $0x1f8] sm:$0xff] }
 0x2d1   : > { %4413 = vmatmul.msk.f32.gmra.mxu1 %vm677_vm3, %v3985_v30  ;;  %v3987_v2 = vsel %vm1433_vm2, %v3984_v29, %v3986_v52  ;;  %v2879_v15 = vsel %vm1433_vm2, %v2876_v36, %v2878_v17  ;;  %v2971_v50 = vmax.f32 %v2815_v43, %v2877_v60  ;;  %v3031_v19 = vrot.slane %v2605_v18, 3 }
 0x2d2   : > { %v2972_v11 = vmax.f32 %v2816_v28, %v2879_v15  ;;  %v3032_v27 = vrot.slane %v2606_v12, 3  ;;  %v2881_v1 = vsel %vm1433_vm2, %v2878_v17, %v2880_v45  ;;  %v3034_v46 = vrot.slane %v2607_v14, 3 }
 0x2d3   : > { %v3036_v24 = vrot.slane %v2608_v22, 3  ;;  %v3187_v37 = vrot.slane %v2605_v18, 4  ;;  %v2973_v8 = vmax.f32 %v2817_v39, %v2881_v1  ;;  %v3188_v6 = vrot.slane %v2606_v12, 4 }
 0x2d4   : > { %v3033_v31 = vsel %vm1674_vm4, %v3031_v19, %v3032_v27  ;;  %v3190_v51 = vrot.slane %v2607_v14, 4  ;;  %v3035_v29 = vsel %vm1674_vm4, %v3032_v27, %v3034_v46  ;;  %v3192_v36 = vrot.slane %v2608_v22, 4  ;;  %v7971_v22 = vld [vmem:[#allocation37_spill] sm:$0xff] }
 0x2d5   : > { %v3037_v33 = vsel %vm1674_vm4, %v3034_v46, %v3036_v24  ;;  %v3127_v9 = vmax.f32 %v2971_v50, %v3033_v31  ;;  %v3128_v52 = vmax.f32 %v2972_v11, %v3035_v29  ;;  %v3189_v43 = vsel %vm416_vm0, %v3187_v37, %v3188_v6 }
 0x2d6   : > { %v3129_v25 = vmax.f32 %v2973_v8, %v3037_v33  ;;  %v3191_v17 = vsel %vm416_vm0, %v3188_v6, %v3190_v51  ;;  %v3193_v30 = vsel %vm416_vm0, %v3190_v51, %v3192_v36  ;;  %v3489_v12 = vmax.f32 %v6132_v53, %v6418_v61 }
 0x2d7   : > { %v6628_v18 = vmax.f32 %v3127_v9, %v3189_v43  ;;  %v3490_v14 = vmax.f32 %v6291_v38, %v6458_v23  ;;  %v1051_v28 = vmax.f32 %v7971_v22, %v6634_v16  ;;  %v6638_v60 = vmax.f32 %v3128_v52, %v3191_v17 }
 0x2d8   : > { %v6640_v39 = vmax.f32 %v3129_v25, %v3193_v30  ;;  %v3512_v15 = vmax.f32 %v3488_v4, %v6476_v49  ;;  %v3513_v53 = vmax.f32 %v3489_v12, %v6483_v5  ;;  %v2513_v38 = vmax.f32 %v2465_v62, %v7952_v42 }
 0x2d9   : > { %7970 = vst [vmem:[#allocation19_spill] sm:$0xff] %v6628_v18  ;;  %4414 = vmatmul.msk.f32.gmra.mxu1 %vm677_vm3, %v3987_v2  ;;  %v3345_v45 = vrot.slane %v6628_v18, 4  ;;  %v3514_v50 = vmax.f32 %v3490_v14, %v6493_v44  ;;  %v3346_v11 = vrot.slane %v6638_v60, 4  ;;  %v2514_v4 = vmax.f32 %v2466_v20, %v7953_v40 }
 0x2da   : > { %7972 = vst [vmem:[#allocation3_spill] sm:$0xff] %v6638_v60  ;;  %v3536_v19 = vmax.f32 %v3512_v15, %v6560_v35  ;;  %v3348_v27 = vrot.slane %v6640_v39, 4  ;;  %v3537_v2 = vmax.f32 %v3513_v53, %v6562_v21  ;;  %v2515_v10 = vmax.f32 %v2467_v0, %v7954_v58 }
 0x2db   : > { %7973 = vst [vmem:[#allocation4_spill] sm:$0xff] %v6640_v39  ;;  %v3538_v1 = vmax.f32 %v3514_v50, %v6565_v56  ;;  %v2516_v62 = vmax.f32 %v2468_v55, %v7955_v26  ;;  %v3347_v46 = vsel %vm416_vm0, %v3345_v45, %v3346_v11  ;;  %v2561_v20 = vmax.f32 %v2513_v38, %v7966_v48 }
 0x2dc   : > { %v3560_v24 = vmax.f32 %v3536_v19, %v6628_v18  ;;  %v3349_v54 = vsel %vm416_vm0, %v3346_v11, %v3348_v27  ;;  %4402 = vmatmul.msk.f32.gmra.mxu3 %vm677_vm3, %v3347_v46  ;;  %v3561_v37 = vmax.f32 %v3537_v2, %v6638_v60  ;;  %v2562_v0 = vmax.f32 %v2514_v4, %v7967_v32  ;;  %v7975_v46 = vld [vmem:[#allocation40_spill] sm:$0xff] }
 0x2dd   : > { %v3562_v59 = vmax.f32 %v3538_v1, %v6640_v39  ;;  %v2563_v8 = vmax.f32 %v2515_v10, %v7968_v63  ;;  %v2564_v27 = vmax.f32 %v2516_v62, %v7969_v57  ;;  %v7974_v1 = vld [vmem:[#allocation39_spill] sm:$0xff] }
 0x2de   : > { %v3612_v34 = vrot.slane %v3560_v24, 1  ;;  %v3700_v55 = vrot.slane %v3560_v24, 2  ;;  %v3788_v31 = vrot.slane %v3560_v24, 3  ;;  %v3876_v6 = vrot.slane %v3560_v24, 4 }
 0x2df   : > { %v3613_v51 = vrot.slane %v3561_v37, 1  ;;  %v3615_v29 = vrot.slane %v3562_v59, 1  ;;  %v3701_v33 = vrot.slane %v3561_v37, 2  ;;  %v3703_v9 = vrot.slane %v3562_v59, 2 }
 0x2e0   : > { %v3789_v36 = vrot.slane %v3561_v37, 3  ;;  %v3791_v52 = vrot.slane %v3562_v59, 3  ;;  %v3877_v25 = vrot.slane %v3561_v37, 4  ;;  %v3879_v43 = vrot.slane %v3562_v59, 4 }
 0x2e1   : > { %v3614_v17 = vsel %vm1192_vm1, %v3612_v34, %v3613_v51  ;;  %v3616_v30 = vsel %vm1192_vm1, %v3613_v51, %v3615_v29  ;;  %v3702_v12 = vsel %vm1433_vm2, %v3700_v55, %v3701_v33  ;;  %v3704_v14 = vsel %vm1433_vm2, %v3701_v33, %v3703_v9 }
 0x2e2   : > { %v3672_v15 = vmax.f32 %v3560_v24, %v3614_v17  ;;  %v3673_v45 = vmax.f32 %v3561_v37, %v3616_v30  ;;  %v3790_v53 = vsel %vm1674_vm4, %v3788_v31, %v3789_v36  ;;  %v3792_v50 = vsel %vm1674_vm4, %v3789_v36, %v3791_v52  ;;  %v7976_v37 = vld [vmem:[#allocation16_spill] sm:$0xff]  ;;  %v7977_v31 = vld [vmem:[#allocation15_spill] sm:$0xff] }
 0x2e3   : > { %v3878_v38 = vsel %vm416_vm0, %v3876_v6, %v3877_v25  ;;  %v3880_v11 = vsel %vm416_vm0, %v3877_v25, %v3879_v43  ;;  %v3674_v19 = vmax.f32 %v3562_v59, %v3615_v29  ;;  %v2609_v10 = vmax.f32 %v2561_v20, %v7974_v1 }
 0x2e4   : > { %v3760_v4 = vmax.f32 %v3672_v15, %v3702_v12  ;;  %v3761_v2 = vmax.f32 %v3673_v45, %v3704_v14  ;;  %v2610_v34 = vmax.f32 %v2562_v0, %v7975_v46  ;;  %4403 = vmatmul.msk.f32.gmra.mxu3 %vm677_vm3, %v3349_v54  ;;  %v2611_v55 = vmax.f32 %v2563_v8, %v7976_v37 }
 0x2e5   : > { %v3762_v24 = vmax.f32 %v3674_v19, %v3703_v9  ;;  %v2612_v51 = vmax.f32 %v2564_v27, %v7977_v31  ;;  %v3491_v6 = vmax.f32 %v6416_v3, %v6476_v49  ;;  %v2726_v29 = vrot.slane %v2609_v10, 1 }
 0x2e6   : > { %v3848_v33 = vmax.f32 %v3760_v4, %v3790_v53  ;;  %v3849_v59 = vmax.f32 %v3761_v2, %v3792_v50  ;;  %v2727_v62 = vrot.slane %v2610_v34, 1  ;;  %v2729_v25 = vrot.slane %v2611_v55, 1 }
 0x2e7   : > { %v3850_v36 = vmax.f32 %v3762_v24, %v3791_v52  ;;  %v2731_v17 = vrot.slane %v2612_v51, 1  ;;  %v2882_v20 = vrot.slane %v2609_v10, 2  ;;  %v2883_v9 = vrot.slane %v2610_v34, 2 }
 0x2e8   : > { %v3936_v30 = vmax.f32 %v3848_v33, %v3878_v38  ;;  %v3937_v0 = vmax.f32 %v3849_v59, %v3880_v11  ;;  %v2728_v54 = vsel %vm1192_vm1, %v2726_v29, %v2727_v62  ;;  %v2730_v8 = vsel %vm1192_vm1, %v2727_v62, %v2729_v25 }
 0x2e9   : > { %v3938_v12 = vmax.f32 %v3850_v36, %v3879_v43  ;;  %v2732_v14 = vsel %vm1192_vm1, %v2729_v25, %v2731_v17  ;;  %v2818_v15 = vmax.f32 %v2609_v10, %v2728_v54  ;;  %v2819_v53 = vmax.f32 %v2610_v34, %v2730_v8 }
 0x2ea   : > { %v3988_v3 = vrot.slane %v3936_v30, 2  ;;  %v3989_v45 = vrot.slane %v3937_v0, 2  ;;  %v2820_v50 = vmax.f32 %v2611_v55, %v2732_v14  ;;  %v2884_v52 = vsel %vm1433_vm2, %v2882_v20, %v2883_v9 }
 0x2eb   : > { %v3991_v19 = vrot.slane %v3938_v12, 2  ;;  %v2885_v27 = vrot.slane %v2611_v55, 2  ;;  %v2887_v4 = vrot.slane %v2612_v51, 2  ;;  %v2974_v11 = vmax.f32 %v2818_v15, %v2884_v52 }
 0x2ec   : > { %v3990_v38 = vsel %vm1433_vm2, %v3988_v3, %v3989_v45  ;;  %v3038_v2 = vrot.slane %v2609_v10, 3  ;;  %v3039_v24 = vrot.slane %v2610_v34, 3  ;;  %v3041_v29 = vrot.slane %v2611_v55, 3  ;;  %v6705_v3 = vld [vmem:[#allocation2 + $0x210] sm:$0xff] }
 0x2ed   : > { %4415 = vmatmul.msk.f32.gmra.mxu1 %vm677_vm3, %v3990_v38  ;;  %v3992_v43 = vsel %vm1433_vm2, %v3989_v45, %v3991_v19  ;;  %v2886_v33 = vsel %vm1433_vm2, %v2883_v9, %v2885_v27  ;;  %v2888_v59 = vsel %vm1433_vm2, %v2885_v27, %v2887_v4  ;;  %v3043_v17 = vrot.slane %v2612_v51, 3  ;;  %v6725_v38 = vld [vmem:[#allocation2 + $0x1e8] sm:$0xff] }
 0x2ee   : > { %v2975_v62 = vmax.f32 %v2819_v53, %v2886_v33  ;;  %v2976_v36 = vmax.f32 %v2820_v50, %v2888_v59  ;;  %v3040_v25 = vsel %vm1674_vm4, %v3038_v2, %v3039_v24  ;;  %v3042_v20 = vsel %vm1674_vm4, %v3039_v24, %v3041_v29  ;;  %7982 = vst [vmem:[#allocation21_spill] sm:$0xff] %v6725_v38  ;;  %v7984_v2 = vld [vmem:[#allocation6_spill] sm:$0xff] }
 0x2ef   : > { %v3130_v30 = vmax.f32 %v2974_v11, %v3040_v25  ;;  %v3194_v0 = vrot.slane %v2609_v10, 4  ;;  %v3195_v54 = vrot.slane %v2610_v34, 4  ;;  %v3044_v12 = vsel %vm1674_vm4, %v3041_v29, %v3043_v17 }
 0x2f0   : > { %v3131_v8 = vmax.f32 %v2975_v62, %v3042_v20  ;;  %v3197_v14 = vrot.slane %v2611_v55, 4  ;;  %v3199_v15 = vrot.slane %v2612_v51, 4  ;;  %v3132_v9 = vmax.f32 %v2976_v36, %v3044_v12  ;;  %v7988_v12 = vld [vmem:[#allocation10_spill] sm:$0xff] }
 0x2f1   : > { %v3196_v45 = vsel %vm416_vm0, %v3194_v0, %v3195_v54  ;;  %v3492_v53 = vmax.f32 %v6418_v61, %v6483_v5  ;;  %v3493_v50 = vmax.f32 %v6458_v23, %v6493_v44  ;;  %v3515_v55 = vmax.f32 %v3491_v6, %v6560_v35  ;;  %v6723_v61 = vld [vmem:[#allocation2 + $0x218] sm:$0xff]  ;;  %v6727_v23 = vld [vmem:[#allocation2 + $0x208] sm:$0xff]  ;;  %v7987_v0 = vld [vmem:[#allocation9_spill] sm:$0xff] }
 0x2f2   : > { %v3198_v19 = vsel %vm416_vm0, %v3195_v54, %v3197_v14  ;;  %v3200_v10 = vsel %vm416_vm0, %v3197_v14, %v3199_v15  ;;  %v6714_v34 = vmax.f32 %v3130_v30, %v3196_v45  ;;  %7981 = vst [vmem:[#allocation46_spill] sm:$0xff] %v6723_v61  ;;  %v7985_v6 = vld [vmem:[#allocation52_spill] sm:$0xff]  ;;  %v6749_v30 = vmax.f32 %v1051_v28, %v6723_v61 }
 0x2f3   : > { %v6717_v51 = vmax.f32 %v3131_v8, %v3198_v19  ;;  %v6719_v52 = vmax.f32 %v3132_v9, %v3200_v10  ;;  %v3516_v27 = vmax.f32 %v3492_v53, %v6562_v21  ;;  %v3517_v4 = vmax.f32 %v3493_v50, %v6565_v56  ;;  %7983 = vst [vmem:[#allocation22_spill] sm:$0xff] %v6727_v23 }
 0x2f4   : > { %7978 = vst [vmem:[#allocation23_spill] sm:$0xff] %v6714_v34  ;;  %v7986_v24 = vmax.f32 %v7984_v2, %v7985_v6  ;;  %v3350_v59 = vrot.slane %v6714_v34, 4  ;;  %v3539_v29 = vmax.f32 %v3515_v55, %v6628_v18  ;;  %v1277_v54 = vrot.slane %v7987_v0, 1 }
 0x2f5   : > { %7979 = vst [vmem:[#allocation24_spill] sm:$0xff] %v6717_v51  ;;  %4416 = vmatmul.msk.f32.gmra.mxu1 %vm677_vm3, %v3992_v43  ;;  %v3351_v62 = vrot.slane %v6717_v51, 4  ;;  %v3540_v36 = vmax.f32 %v3516_v27, %v6638_v60  ;;  %v3541_v25 = vmax.f32 %v3517_v4, %v6640_v39  ;;  %v3353_v17 = vrot.slane %v6719_v52, 4 }
 0x2f6   : > { %7980 = vst [vmem:[#allocation31_spill] sm:$0xff] %v6719_v52  ;;  %v6735_v33 = vmax.f32 %v7986_v24, %v6705_v3  ;;  %v3563_v20 = vmax.f32 %v3539_v29, %v6714_v34  ;;  %v1278_v43 = vrot.slane %v7988_v12, 1 }
 0x2f7   : > { %v3352_v8 = vsel %vm416_vm0, %v3350_v59, %v3351_v62  ;;  %v3564_v14 = vmax.f32 %v3540_v36, %v6717_v51  ;;  %v3565_v15 = vmax.f32 %v3541_v25, %v6719_v52  ;;  %v3354_v9 = vsel %vm416_vm0, %v3351_v62, %v3353_v17 }
 0x2f8   : > { %4404 = vmatmul.msk.f32.gmra.mxu3 %vm677_vm3, %v3352_v8  ;;  %v3617_v45 = vrot.slane %v3563_v20, 1  ;;  %v3705_v53 = vrot.slane %v3563_v20, 2  ;;  %v3793_v50 = vrot.slane %v3563_v20, 3  ;;  %v3881_v22 = vrot.slane %v3563_v20, 4 }
 0x2f9   : > { %v3618_v28 = vrot.slane %v3564_v14, 1  ;;  %v3620_v19 = vrot.slane %v3565_v15, 1  ;;  %v3706_v10 = vrot.slane %v3564_v14, 2  ;;  %v3708_v55 = vrot.slane %v3565_v15, 2 }
 0x2fa   : > { %v3794_v27 = vrot.slane %v3564_v14, 3  ;;  %v3796_v4 = vrot.slane %v3565_v15, 3  ;;  %v3882_v2 = vrot.slane %v3564_v14, 4  ;;  %v3884_v24 = vrot.slane %v3565_v15, 4 }
 0x2fb   : > { %v3619_v59 = vsel %vm1192_vm1, %v3617_v45, %v3618_v28  ;;  %v3621_v29 = vsel %vm1192_vm1, %v3618_v28, %v3620_v19  ;;  %v3707_v62 = vsel %vm1433_vm2, %v3705_v53, %v3706_v10  ;;  %v3709_v36 = vsel %vm1433_vm2, %v3706_v10, %v3708_v55 }
 0x2fc   : > { %v3675_v25 = vmax.f32 %v3563_v20, %v3619_v59  ;;  %v3676_v17 = vmax.f32 %v3564_v14, %v3621_v29  ;;  %v3795_v8 = vsel %vm1674_vm4, %v3793_v50, %v3794_v27  ;;  %v3797_v11 = vsel %vm1674_vm4, %v3794_v27, %v3796_v4 }
 0x2fd   : > { %v3883_v6 = vsel %vm416_vm0, %v3881_v22, %v3882_v2  ;;  %v3885_v23 = vsel %vm416_vm0, %v3882_v2, %v3884_v24  ;;  %v3677_v38 = vmax.f32 %v3565_v15, %v3620_v19  ;;  %v1279_v61 = vsel %vm1192_vm1, %v1277_v54, %v1278_v43 }
 0x2fe   : > { %v3763_v45 = vmax.f32 %v3675_v25, %v3707_v62  ;;  %v3764_v52 = vmax.f32 %v3676_v17, %v3709_v36  ;;  %v1280_v28 = vrot.slane %v6735_v33, 1  ;;  %v1282_v53 = vrot.slane %v6749_v30, 1 }
 0x2ff   : > { %v3765_v10 = vmax.f32 %v3677_v38, %v3708_v55  ;;  %v1417_v20 = vmax.f32 %v7987_v0, %v1279_v61  ;;  %v1518_v14 = vrot.slane %v7987_v0, 2  ;;  %v1519_v50 = vrot.slane %v7988_v12, 2 }
 0x300   : > { %v3851_v27 = vmax.f32 %v3763_v45, %v3795_v8  ;;  %v3852_v22 = vmax.f32 %v3764_v52, %v3797_v11  ;;  %4405 = vmatmul.msk.f32.gmra.mxu3 %vm677_vm3, %v3354_v9  ;;  %v1281_v15 = vsel %vm1192_vm1, %v1278_v43, %v1280_v28  ;;  %v1283_v54 = vsel %vm1192_vm1, %v1280_v28, %v1282_v53 }
 0x301   : > { %v3853_v19 = vmax.f32 %v3765_v10, %v3796_v4  ;;  %v1418_v2 = vmax.f32 %v7988_v12, %v1281_v15  ;;  %v1419_v59 = vmax.f32 %v6735_v33, %v1283_v54  ;;  %v1420_v38 = vmax.f32 %v6749_v30, %v1282_v53 }
 0x302   : > { %v3939_v61 = vmax.f32 %v3851_v27, %v3883_v6  ;;  %v3940_v55 = vmax.f32 %v3852_v22, %v3885_v23  ;;  %v1520_v29 = vsel %vm1433_vm2, %v1518_v14, %v1519_v50  ;;  %v1521_v62 = vrot.slane %v6735_v33, 2 }
 0x303   : > { %v3941_v52 = vmax.f32 %v3853_v19, %v3884_v24  ;;  %v1523_v11 = vrot.slane %v6749_v30, 2  ;;  %v1658_v9 = vmax.f32 %v1417_v20, %v1520_v29  ;;  %v1759_v43 = vrot.slane %v7987_v0, 3  ;;  %v6788_v20 = vld [vmem:[#allocation2 + $0x1f0] sm:$0xff] }
 0x304   : > { %v3993_v36 = vrot.slane %v3939_v61, 2  ;;  %v3994_v4 = vrot.slane %v3940_v55, 2  ;;  %v1522_v25 = vsel %vm1433_vm2, %v1519_v50, %v1521_v62  ;;  %v1760_v17 = vrot.slane %v7988_v12, 3 }
 0x305   : > { %v3996_v8 = vrot.slane %v3941_v52, 2  ;;  %v1524_v6 = vsel %vm1433_vm2, %v1521_v62, %v1523_v11  ;;  %v1659_v23 = vmax.f32 %v1418_v2, %v1522_v25  ;;  %v1661_v45 = vmax.f32 %v1420_v38, %v1523_v11 }
 0x306   : > { %v3995_v28 = vsel %vm1433_vm2, %v3993_v36, %v3994_v4  ;;  %v1660_v53 = vmax.f32 %v1419_v59, %v1524_v6  ;;  %v1761_v24 = vsel %vm1674_vm4, %v1759_v43, %v1760_v17  ;;  %v1762_v10 = vrot.slane %v6735_v33, 3 }
 0x307   : > { %4417 = vmatmul.msk.f32.gmra.mxu1 %vm677_vm3, %v3995_v28  ;;  %v1764_v50 = vrot.slane %v6749_v30, 3  ;;  %v1899_v27 = vmax.f32 %v1658_v9, %v1761_v24  ;;  %v1999_v22 = vrot.slane %v7987_v0, 4  ;;  %v2000_v54 = vrot.slane %v7988_v12, 4 }
 0x308   : > { %v1763_v15 = vsel %vm1674_vm4, %v1760_v17, %v1762_v10  ;;  %v2002_v19 = vrot.slane %v6735_v33, 4  ;;  %v2004_v2 = vrot.slane %v6749_v30, 4  ;;  %v2469_v55 = vmax.f32 %v6332_v13, %v7952_v42 }
 0x309   : > { %v1765_v59 = vsel %vm1674_vm4, %v1762_v10, %v1764_v50  ;;  %v1900_v38 = vmax.f32 %v1659_v23, %v1763_v15  ;;  %v1902_v61 = vmax.f32 %v1661_v45, %v1764_v50  ;;  %v3997_v29 = vsel %vm1433_vm2, %v3994_v4, %v3996_v8  ;;  %v6831_v23 = vld [vmem:[#allocation2 + $0x1d8] sm:$0xff] }
 0x30a   : > { %v1901_v62 = vmax.f32 %v1660_v53, %v1765_v59  ;;  %v2001_v0 = vsel %vm416_vm0, %v1999_v22, %v2000_v54  ;;  %v2003_v52 = vsel %vm416_vm0, %v2000_v54, %v2002_v19  ;;  %v2005_v12 = vsel %vm416_vm0, %v2002_v19, %v2004_v2  ;;  %v4509_v10 = vld [vmem:[#allocation2 + $0x1b8] sm:$0xff] }
 0x30b   : > { %v6806_v11 = vmax.f32 %v1899_v27, %v2001_v0  ;;  %v6808_v33 = vmax.f32 %v1900_v38, %v2003_v52  ;;  %v2470_v30 = vmax.f32 %v6334_v7, %v7953_v40  ;;  %v6812_v9 = vmax.f32 %v1902_v61, %v2004_v2 }
 0x30c   : > { %v2471_v13 = vmax.f32 %v6436_v41, %v7954_v58  ;;  %v2472_v43 = vmax.f32 %v6431_v47, %v7955_v26  ;;  %v2517_v36 = vmax.f32 %v2469_v55, %v7966_v48  ;;  %v3494_v25 = vmax.f32 %v6476_v49, %v6560_v35  ;;  %v860_v35 = vld [vmem:[#allocation2 + $0x220] sm:$0xff] }
 0x30d   : > { %v2518_v4 = vmax.f32 %v2470_v30, %v7967_v32  ;;  %v3495_v17 = vmax.f32 %v6483_v5, %v6562_v21  ;;  %v3496_v7 = vmax.f32 %v6493_v44, %v6565_v56  ;;  %v6826_v8 = vmax.f32 %v1901_v62, %v2005_v12 }
 0x30e   : > { %v2519_v41 = vmax.f32 %v2471_v13, %v7968_v63  ;;  %v2520_v6 = vmax.f32 %v2472_v43, %v7969_v57  ;;  %v2565_v47 = vmax.f32 %v2517_v36, %v7974_v1  ;;  %v3518_v5 = vmax.f32 %v3494_v25, %v6628_v18  ;;  %v862_v18 = vld [vmem:[#allocation2 + $0x230] sm:$0xff] }
 0x30f   : > { %4418 = vmatmul.msk.f32.gmra.mxu1 %vm677_vm3, %v3997_v29  ;;  %v2566_v49 = vmax.f32 %v2518_v4, %v7975_v46  ;;  %v6839_v44 = vmax.f32 %v3495_v17, %v6638_v60  ;;  %v927_v50 = vmax.f32 %v4509_v10, %v6831_v23  ;;  %v3520_v22 = vmax.f32 %v3496_v7, %v6640_v39 }
 0x310   : > { %v2567_v28 = vmax.f32 %v2519_v41, %v7976_v37  ;;  %v2568_v53 = vmax.f32 %v2520_v6, %v7977_v31  ;;  %v2613_v24 = vmax.f32 %v2565_v47, %v6806_v11  ;;  %v3542_v15 = vmax.f32 %v3518_v5, %v6714_v34 }
 0x311   : > { %v2614_v27 = vmax.f32 %v2566_v49, %v6808_v33  ;;  %v3543_v54 = vmax.f32 %v6839_v44, %v6717_v51 }
 0x312   : > { %v2615_v19 = vmax.f32 %v2567_v28, %v6826_v8  ;;  %v2616_v2 = vmax.f32 %v2568_v53, %v6812_v9  ;;  %v2733_v59 = vrot.slane %v2613_v24, 1  ;;  %v2889_v38 = vrot.slane %v2613_v24, 2 }
 0x313   : > { %v2734_v61 = vrot.slane %v2614_v27, 1  ;;  %v2890_v55 = vrot.slane %v2614_v27, 2  ;;  %v3045_v29 = vrot.slane %v2613_v24, 3  ;;  %v3046_v62 = vrot.slane %v2614_v27, 3 }
 0x314   : > { %v2736_v0 = vrot.slane %v2615_v19, 1  ;;  %v2738_v52 = vrot.slane %v2616_v2, 1  ;;  %v2892_v12 = vrot.slane %v2615_v19, 2  ;;  %v2894_v30 = vrot.slane %v2616_v2, 2 }
 0x315   : > { %v2735_v13 = vsel %vm1192_vm1, %v2733_v59, %v2734_v61  ;;  %v2891_v43 = vsel %vm1433_vm2, %v2889_v38, %v2890_v55  ;;  %v3047_v36 = vsel %vm1674_vm4, %v3045_v29, %v3046_v62  ;;  %v3048_v4 = vrot.slane %v2615_v19, 3 }
 0x316   : > { %v2737_v25 = vsel %vm1192_vm1, %v2734_v61, %v2736_v0  ;;  %v2739_v17 = vsel %vm1192_vm1, %v2736_v0, %v2738_v52  ;;  %v2821_v7 = vmax.f32 %v2613_v24, %v2735_v13  ;;  %v2893_v41 = vsel %vm1433_vm2, %v2890_v55, %v2892_v12  ;;  %v7989_v55 = vld [vmem:[#allocation31_spill] sm:$0xff] }
 0x317   : > { %v2822_v6 = vmax.f32 %v2614_v27, %v2737_v25  ;;  %v2823_v47 = vmax.f32 %v2615_v19, %v2739_v17  ;;  %v2895_v49 = vsel %vm1433_vm2, %v2892_v12, %v2894_v30  ;;  %v3049_v5 = vsel %vm1674_vm4, %v3046_v62, %v3048_v4 }
 0x318   : > { %v2977_v44 = vmax.f32 %v2821_v7, %v2891_v43  ;;  %v3050_v28 = vrot.slane %v2616_v2, 3  ;;  %v3201_v53 = vrot.slane %v2613_v24, 4  ;;  %v3202_v10 = vrot.slane %v2614_v27, 4  ;;  %v7991_v24 = vld [vmem:[#allocation46_spill] sm:$0xff]  ;;  %v7993_v43 = vld [vmem:[#allocation49_spill] sm:$0xff] }
 0x319   : > { %v2978_v59 = vmax.f32 %v2822_v6, %v2893_v41  ;;  %v2979_v38 = vmax.f32 %v2823_v47, %v2895_v49  ;;  %v3204_v29 = vrot.slane %v2615_v19, 4  ;;  %v3206_v14 = vrot.slane %v2616_v2, 4  ;;  %v4510_v19 = vld [vmem:[#allocation2 + $0x1e0] sm:$0xff]  ;;  %v7992_v2 = vld [vmem:[#allocation32_spill] sm:$0xff]  ;;  %v7995_v7 = vld [vmem:[#allocation21_spill] sm:$0xff] }
 0x31a   : > { %v3051_v61 = vsel %vm1674_vm4, %v3048_v4, %v3050_v28  ;;  %v3133_v0 = vmax.f32 %v2977_v44, %v3047_v36  ;;  %v3203_v52 = vsel %vm416_vm0, %v3201_v53, %v3202_v10  ;;  %v3544_v13 = vmax.f32 %v3520_v22, %v7989_v55  ;;  %v7996_v41 = vld [vmem:[#allocation33_spill] sm:$0xff]  ;;  %v7997_v22 = vld [vmem:[#allocation50_spill] sm:$0xff]  ;;  %v8002_v44 = vld [vmem:[#allocation51_spill] sm:$0xff] }
 0x31b   : > { %v3134_v25 = vmax.f32 %v2978_v59, %v3049_v5  ;;  %v3135_v17 = vmax.f32 %v2979_v38, %v3051_v61  ;;  %v3205_v12 = vsel %vm416_vm0, %v3202_v10, %v3204_v29  ;;  %v3207_v62 = vsel %vm416_vm0, %v3204_v29, %v3206_v14  ;;  %v8001_v5 = vld [vmem:[#allocation34_spill] sm:$0xff]  ;;  %v6895_v29 = vld [vmem:[#allocation2 + $0x200] sm:$0xff] }
 0x31c   : > { %v6865_v30 = vmax.f32 %v3133_v0, %v3203_v52  ;;  %v935_v27 = vmax.f32 %v6634_v16, %v7991_v24  ;;  %v7994_v4 = vmax.f32 %v7992_v2, %v7993_v43  ;;  %v7998_v6 = vmax.f32 %v7996_v41, %v7997_v22  ;;  %v8004_v61 = vld [vmem:[#allocation7_spill] sm:$0xff] }
 0x31d   : > { %v6880_v49 = vmax.f32 %v3134_v25, %v3205_v12  ;;  %v6882_v14 = vmax.f32 %v3135_v17, %v3207_v62  ;;  %v8003_v28 = vmax.f32 %v8001_v5, %v8002_v44  ;;  %v6891_v10 = vmax.f32 %v927_v50, %v6634_v16  ;;  %v8006_v25 = vld [vmem:[#allocation22_spill] sm:$0xff]  ;;  %v8007_v17 = vld [vmem:[#allocation8_spill] sm:$0xff] }
 0x31e   : > { %7990 = vst [vmem:[#allocation25_spill] sm:$0xff] %v6865_v30  ;;  %v6872_v36 = vmax.f32 %v7994_v4, %v4510_v19  ;;  %v6878_v47 = vmax.f32 %v7998_v6, %v7995_v7  ;;  %v3355_v59 = vrot.slane %v6865_v30, 4  ;;  %v3566_v38 = vmax.f32 %v3542_v15, %v6865_v30 }
 0x31f   : > { %7999 = vst [vmem:[#allocation41_spill] sm:$0xff] %v6880_v49  ;;  %v6888_v53 = vmax.f32 %v8003_v28, %v6788_v20  ;;  %v8005_v0 = vmax.f32 %v7993_v43, %v8004_v61  ;;  %v8008_v12 = vmax.f32 %v7997_v22, %v8007_v17  ;;  %v3356_v50 = vrot.slane %v6880_v49, 4 }
 0x320   : > { %8000 = vst [vmem:[#allocation26_spill] sm:$0xff] %v6882_v14  ;;  %v3567_v19 = vmax.f32 %v3543_v54, %v6880_v49  ;;  %v3568_v15 = vmax.f32 %v3544_v13, %v6882_v14  ;;  %v3358_v2 = vrot.slane %v6882_v14, 4  ;;  %v3622_v4 = vrot.slane %v3566_v38, 1 }
 0x321   : > { %v6901_v52 = vmax.f32 %v8005_v0, %v6895_v29  ;;  %v6907_v62 = vmax.f32 %v8008_v12, %v8006_v25  ;;  %v3710_v41 = vrot.slane %v3566_v38, 2  ;;  %v3798_v6 = vrot.slane %v3566_v38, 3 }
 0x322   : > { %v3886_v43 = vrot.slane %v3566_v38, 4  ;;  %v3357_v5 = vsel %vm416_vm0, %v3355_v59, %v3356_v50  ;;  %v3623_v28 = vrot.slane %v3567_v19, 1  ;;  %v3625_v0 = vrot.slane %v3568_v15, 1 }
 0x323   : > { %v3711_v45 = vrot.slane %v3567_v19, 2  ;;  %4406 = vmatmul.msk.f32.gmra.mxu3 %vm677_vm3, %v3357_v5  ;;  %v3713_v22 = vrot.slane %v3568_v15, 2  ;;  %v3799_v17 = vrot.slane %v3567_v19, 3  ;;  %v3801_v12 = vrot.slane %v3568_v15, 3 }
 0x324   : > { %v3887_v55 = vrot.slane %v3567_v19, 4  ;;  %v3624_v54 = vsel %vm1192_vm1, %v3622_v4, %v3623_v28  ;;  %v3626_v13 = vsel %vm1192_vm1, %v3623_v28, %v3625_v0  ;;  %v3889_v56 = vrot.slane %v3568_v15, 4 }
 0x325   : > { %v3712_v14 = vsel %vm1433_vm2, %v3710_v41, %v3711_v45  ;;  %v3678_v39 = vmax.f32 %v3566_v38, %v3624_v54  ;;  %v3679_v49 = vmax.f32 %v3567_v19, %v3626_v13  ;;  %v3714_v59 = vsel %vm1433_vm2, %v3711_v45, %v3713_v22  ;;  %v861_v41 = vld [vmem:[#allocation2 + $0x228] sm:$0xff] }
 0x326   : > { %v3800_v30 = vsel %vm1674_vm4, %v3798_v6, %v3799_v17  ;;  %v3802_v51 = vsel %vm1674_vm4, %v3799_v17, %v3801_v12  ;;  %v3888_v5 = vsel %vm416_vm0, %v3886_v43, %v3887_v55  ;;  %v3890_v34 = vsel %vm416_vm0, %v3887_v55, %v3889_v56  ;;  %v8009_v38 = vld [vmem:[#allocation52_spill] sm:$0xff]  ;;  %v863_v6 = vld [vmem:[#allocation2 + $0x238] sm:$0xff]  ;;  %v8012_v55 = vld [vmem:[#allocation53_spill] sm:$0xff] }
 0x327   : > { %v3359_v21 = vsel %vm416_vm0, %v3356_v50, %v3358_v2  ;;  %v3766_v4 = vmax.f32 %v3678_v39, %v3712_v14  ;;  %v3767_v60 = vmax.f32 %v3679_v49, %v3714_v59  ;;  %v3680_v28 = vmax.f32 %v3568_v15, %v3625_v0 }
 0x328   : > { %v8010_v45 = vmax.f32 %v8002_v44, %v8009_v38  ;;  %v8011_v43 = vmax.f32 %v6831_v23, %v6634_v16  ;;  %v8013_v50 = vmax.f32 %v8004_v61, %v8012_v55  ;;  %v8014_v49 = vmax.f32 %v7995_v7, %v8006_v25 }
 0x329   : > { %v8015_v15 = vmax.f32 %v6788_v20, %v6705_v3  ;;  %v3854_v44 = vmax.f32 %v3766_v4, %v3800_v30  ;;  %v3855_v0 = vmax.f32 %v3767_v60, %v3802_v51  ;;  %v3768_v54 = vmax.f32 %v3680_v28, %v3713_v22  ;;  %v864_v60 = vld [vmem:[#allocation2 + $0x240] sm:$0xff]  ;;  %v865_v30 = vld [vmem:[#allocation2 + $0x248] sm:$0xff]  ;;  %v867_v4 = vld [vmem:[#allocation2 + $0x258] sm:$0xff] }
 0x32a   : > { %v994_v19 = vmax.f32 %v8010_v45, %v6705_v3  ;;  %v995_v17 = vmax.f32 %v8011_v43, %v7991_v24  ;;  %v996_v39 = vmax.f32 %v8013_v50, %v860_v35  ;;  %v997_v14 = vmax.f32 %v8014_v49, %v861_v41 }
 0x32b   : > { %v998_v2 = vmax.f32 %v8015_v15, %v862_v18  ;;  %v999_v13 = vmax.f32 %v935_v27, %v863_v6  ;;  %v1052_v16 = vmax.f32 %v6872_v36, %v6895_v29  ;;  %v1053_v23 = vmax.f32 %v6878_v47, %v8006_v25  ;;  %4407 = vmatmul.msk.f32.gmra.mxu3 %vm677_vm3, %v3359_v21 }
 0x32c   : > { %v1054_v61 = vmax.f32 %v6888_v53, %v6705_v3  ;;  %v1055_v7 = vmax.f32 %v6891_v10, %v7991_v24  ;;  %v3942_v59 = vmax.f32 %v3854_v44, %v3888_v5  ;;  %v3943_v38 = vmax.f32 %v3855_v0, %v3890_v34  ;;  %v866_v53 = vld [vmem:[#allocation2 + $0x250] sm:$0xff]  ;;  %v868_v10 = vld [vmem:[#allocation2 + $0x260] sm:$0xff]  ;;  %v869_v34 = vld [vmem:[#allocation2 + $0x268] sm:$0xff] }
 0x32d   : > { %v3856_v20 = vmax.f32 %v3768_v54, %v3801_v12  ;;  %v1056_v51 = vmax.f32 %v6901_v52, %v860_v35  ;;  %v1057_v27 = vmax.f32 %v6907_v62, %v861_v41  ;;  %v1058_v36 = vmax.f32 %v994_v19, %v862_v18  ;;  %v870_v5 = vld [vmem:[#allocation2 + $0x270] sm:$0xff]  ;;  %v871_v19 = vld [vmem:[#allocation2 + $0x278] sm:$0xff] }
 0x32e   : > { %v1059_v29 = vmax.f32 %v995_v17, %v863_v6  ;;  %v1060_v47 = vmax.f32 %v996_v39, %v864_v60  ;;  %v3998_v25 = vrot.slane %v3942_v59, 2  ;;  %v3999_v22 = vrot.slane %v3943_v38, 2 }
 0x32f   : > { %v3944_v3 = vmax.f32 %v3856_v20, %v3889_v56  ;;  %v1061_v24 = vmax.f32 %v997_v14, %v865_v30  ;;  %v1062_v21 = vmax.f32 %v998_v2, %v866_v53  ;;  %v1063_v12 = vmax.f32 %v999_v13, %v867_v4 }
 0x330   : > { %v6952_v28 = vmax.f32 %v1052_v16, %v860_v35  ;;  %v6954_v52 = vmax.f32 %v1053_v23, %v861_v41  ;;  %v4000_v62 = vsel %vm1433_vm2, %v3998_v25, %v3999_v22  ;;  %v6957_v43 = vmax.f32 %v1054_v61, %v862_v18 }
 0x331   : > { %v4001_v45 = vrot.slane %v3944_v3, 2  ;;  %v6959_v17 = vmax.f32 %v1055_v7, %v863_v6  ;;  %4419 = vmatmul.msk.f32.gmra.mxu1 %vm677_vm3, %v4000_v62  ;;  %v6962_v56 = vmax.f32 %v1056_v51, %v864_v60  ;;  %v6964_v55 = vmax.f32 %v1057_v27, %v865_v30 }
 0x332   : > { %v6966_v50 = vmax.f32 %v1058_v36, %v866_v53  ;;  %v6968_v35 = vmax.f32 %v1059_v29, %v867_v4  ;;  %v6971_v39 = vmax.f32 %v1060_v47, %v868_v10  ;;  %v6973_v49 = vmax.f32 %v1061_v24, %v869_v34  ;;  %v7000_v29 = vpop.f32.mrf.mxu1 }
 0x333   : > { %v4002_v41 = vsel %vm1433_vm2, %v3999_v22, %v4001_v45  ;;  %v6975_v18 = vmax.f32 %v1062_v21, %v870_v5  ;;  %v6977_v6 = vmax.f32 %v1063_v12, %v871_v19  ;;  %v1284_v14 = vrot.slane %v6952_v28, 1 }
 0x334   : > { %v1285_v15 = vrot.slane %v6954_v52, 1  ;;  %v1287_v2 = vrot.slane %v6957_v43, 1  ;;  %v1289_v44 = vrot.slane %v6959_v17, 1  ;;  %v1291_v0 = vrot.slane %v6962_v56, 1 }
 0x335   : > { %v1292_v54 = vrot.slane %v6964_v55, 1  ;;  %v1294_v13 = vrot.slane %v6966_v50, 1  ;;  %v7769_v61 = vrot.slane %v6968_v35, 1  ;;  %v1298_v7 = vrot.slane %v6971_v39, 1 }
 0x336   : > { %v1286_v16 = vsel %vm1192_vm1, %v1284_v14, %v1285_v15  ;;  %v1288_v23 = vsel %vm1192_vm1, %v1285_v15, %v1287_v2  ;;  %v1290_v59 = vsel %vm1192_vm1, %v1287_v2, %v1289_v44  ;;  %v1299_v60 = vrot.slane %v6973_v49, 1 }
 0x337   : > { %v1293_v38 = vsel %vm1192_vm1, %v1291_v0, %v1292_v54  ;;  %v1295_v20 = vsel %vm1192_vm1, %v1292_v54, %v1294_v13  ;;  %v1297_v51 = vsel %vm1192_vm1, %v1294_v13, %v7769_v61  ;;  %v1301_v30 = vrot.slane %v6975_v18, 1 }
 0x338   : > { %v7767_v27 = vrot.slane %v6977_v6, 1  ;;  %v1421_v36 = vmax.f32 %v6952_v28, %v1286_v16  ;;  %v1422_v47 = vmax.f32 %v6954_v52, %v1288_v23  ;;  %v1423_v25 = vmax.f32 %v6957_v43, %v1290_v59 }
 0x339   : > { %4420 = vmatmul.msk.f32.gmra.mxu1 %vm677_vm3, %v4002_v41  ;;  %v1425_v22 = vmax.f32 %v6962_v56, %v1293_v38  ;;  %v1426_v3 = vmax.f32 %v6964_v55, %v1295_v20  ;;  %v1300_v53 = vsel %vm1192_vm1, %v1298_v7, %v1299_v60  ;;  %v1302_v4 = vsel %vm1192_vm1, %v1299_v60, %v1301_v30 }
 0x33a   : > { %v1304_v24 = vsel %vm1192_vm1, %v1301_v30, %v7767_v27  ;;  %v1427_v10 = vmax.f32 %v6966_v50, %v1297_v51  ;;  %v1525_v34 = vrot.slane %v6952_v28, 2  ;;  %v1526_v5 = vrot.slane %v6954_v52, 2 }
 0x33b   : > { %v1528_v21 = vrot.slane %v6957_v43, 2  ;;  %v1530_v12 = vrot.slane %v6959_v17, 2  ;;  %v1532_v62 = vrot.slane %v6962_v56, 2  ;;  %v1533_v45 = vrot.slane %v6964_v55, 2 }
 0x33c   : > { %v1535_v19 = vrot.slane %v6966_v50, 2  ;;  %v7768_v41 = vrot.slane %v6968_v35, 2  ;;  %v1527_v14 = vsel %vm1433_vm2, %v1525_v34, %v1526_v5  ;;  %v1539_v0 = vrot.slane %v6971_v39, 2 }
 0x33d   : > { %v1529_v15 = vsel %vm1433_vm2, %v1526_v5, %v1528_v21  ;;  %v1531_v2 = vsel %vm1433_vm2, %v1528_v21, %v1530_v12  ;;  %v1534_v54 = vsel %vm1433_vm2, %v1532_v62, %v1533_v45  ;;  %v1540_v23 = vrot.slane %v6973_v49, 2 }
 0x33e   : > { %v1536_v13 = vsel %vm1433_vm2, %v1533_v45, %v1535_v19  ;;  %v1538_v16 = vsel %vm1433_vm2, %v1535_v19, %v7768_v41  ;;  %v1542_v7 = vrot.slane %v6975_v18, 2  ;;  %v7766_v59 = vrot.slane %v6977_v6, 2 }
 0x33f   : > { %v7033_v38 = vmax.f32 %v1421_v36, %v1527_v14  ;;  %v7035_v20 = vmax.f32 %v1422_v47, %v1529_v15  ;;  %v1424_v60 = vmax.f32 %v6959_v17, %v1289_v44  ;;  %v1429_v51 = vmax.f32 %v6971_v39, %v1300_v53  ;;  %v7049_v36 = vpop.f32.mrf.mxu1 }
 0x340   : > { %v7039_v30 = vmax.f32 %v1423_v25, %v1531_v2  ;;  %v7041_v34 = vmax.f32 %v1425_v22, %v1534_v54  ;;  %v1430_v5 = vmax.f32 %v6973_v49, %v1302_v4  ;;  %v1431_v21 = vmax.f32 %v6975_v18, %v1304_v24  ;;  %8016 = vst [vmem:[#allocation27_spill] sm:$0xff] %v7049_v36 }
 0x341   : > { %v7045_v62 = vmax.f32 %v1426_v3, %v1536_v13  ;;  %v7047_v45 = vmax.f32 %v1427_v10, %v1538_v16  ;;  %v1541_v47 = vsel %vm1433_vm2, %v1539_v0, %v1540_v23  ;;  %v1543_v44 = vsel %vm1433_vm2, %v1540_v23, %v1542_v7  ;;  %v7069_v16 = vpop.f32.mrf.mxu3 }
 0x342   : > { %v1545_v25 = vsel %vm1433_vm2, %v1542_v7, %v7766_v59  ;;  %v1766_v22 = vrot.slane %v6952_v28, 3  ;;  %v1767_v53 = vrot.slane %v6954_v52, 3  ;;  %v1769_v4 = vrot.slane %v6957_v43, 3  ;;  %8017 = vst [vmem:[#allocation28_spill] sm:$0xff] %v7069_v16 }
 0x343   : > { %v1771_v3 = vrot.slane %v6959_v17, 3  ;;  %v1773_v24 = vrot.slane %v6962_v56, 3  ;;  %v1774_v10 = vrot.slane %v6964_v55, 3  ;;  %v1776_v19 = vrot.slane %v6966_v50, 3 }
 0x344   : > { %v1778_v14 = vrot.slane %v6968_v35, 3  ;;  %v1780_v15 = vrot.slane %v6971_v39, 3  ;;  %v1768_v2 = vsel %vm1674_vm4, %v1766_v22, %v1767_v53  ;;  %v1770_v0 = vsel %vm1674_vm4, %v1767_v53, %v1769_v4 }
 0x345   : > { %v1772_v54 = vsel %vm1674_vm4, %v1769_v4, %v1771_v3  ;;  %v1781_v13 = vrot.slane %v6973_v49, 3  ;;  %v1775_v23 = vsel %vm1674_vm4, %v1773_v24, %v1774_v10  ;;  %v1777_v7 = vsel %vm1674_vm4, %v1774_v10, %v1776_v19 }
 0x346   : > { %v1779_v59 = vsel %vm1674_vm4, %v1776_v19, %v1778_v14  ;;  %v1783_v27 = vrot.slane %v6975_v18, 3  ;;  %v1665_v41 = vmax.f32 %v1424_v60, %v1530_v12  ;;  %v1903_v22 = vmax.f32 %v7033_v38, %v1768_v2 }
 0x347   : > { %v1904_v53 = vmax.f32 %v7035_v20, %v1770_v0  ;;  %v7079_v4 = vmax.f32 %v1429_v51, %v1541_v47  ;;  %v7081_v61 = vmax.f32 %v1430_v5, %v1543_v44  ;;  %v1905_v16 = vmax.f32 %v7039_v30, %v1772_v54 }
 0x348   : > { %v1907_v24 = vmax.f32 %v7041_v34, %v1775_v23  ;;  %v7085_v10 = vmax.f32 %v1431_v21, %v1545_v25  ;;  %v1782_v36 = vsel %vm1674_vm4, %v1780_v15, %v1781_v13  ;;  %v1908_v19 = vmax.f32 %v7045_v62, %v1777_v7  ;;  %v7100_v62 = vpop.f32.mrf.mxu1 }
 0x349   : > { %v1909_v12 = vmax.f32 %v7047_v45, %v1779_v59  ;;  %v7091_v38 = vsel %vm1674_vm4, %v1781_v13, %v1783_v27  ;;  %v7771_v20 = vrot.slane %v6977_v6, 3  ;;  %v2006_v60 = vrot.slane %v6952_v28, 4  ;;  %v7118_v54 = vpop.f32.mrf.mxu3 }
 0x34a   : > { %v2007_v51 = vrot.slane %v6954_v52, 4  ;;  %v2009_v30 = vrot.slane %v6957_v43, 4  ;;  %v2011_v34 = vrot.slane %v6959_v17, 4  ;;  %v2013_v5 = vrot.slane %v6962_v56, 4 }
 0x34b   : > { %v2014_v21 = vrot.slane %v6964_v55, 4  ;;  %v2016_v45 = vrot.slane %v6966_v50, 4  ;;  %v2018_v47 = vrot.slane %v6968_v35, 4  ;;  %v2020_v28 = vrot.slane %v6971_v39, 4 }
 0x34c   : > { %v2008_v59 = vsel %vm416_vm0, %v2006_v60, %v2007_v51  ;;  %v2010_v52 = vsel %vm416_vm0, %v2007_v51, %v2009_v30  ;;  %v2012_v43 = vsel %vm416_vm0, %v2009_v30, %v2011_v34  ;;  %v2021_v56 = vrot.slane %v6973_v49, 4 }
 0x34d   : > { %v2015_v17 = vsel %vm416_vm0, %v2013_v5, %v2014_v21  ;;  %v1786_v55 = vsel %vm1674_vm4, %v1783_v27, %v7771_v20  ;;  %v2017_v44 = vsel %vm416_vm0, %v2014_v21, %v2016_v45  ;;  %v2019_v50 = vsel %vm416_vm0, %v2016_v45, %v2018_v47 }
 0x34e   : > { %v2023_v39 = vrot.slane %v6975_v18, 4  ;;  %v1906_v25 = vmax.f32 %v1665_v41, %v1771_v3  ;;  %v2143_v15 = vmax.f32 %v1903_v22, %v2008_v59  ;;  %v2144_v2 = vmax.f32 %v1904_v53, %v2010_v52 }
 0x34f   : > { %v2145_v0 = vmax.f32 %v1905_v16, %v2012_v43  ;;  %v1911_v49 = vmax.f32 %v7079_v4, %v1782_v36  ;;  %v1912_v13 = vmax.f32 %v7081_v61, %v7091_v38  ;;  %v7770_v27 = vrot.slane %v6977_v6, 4 }
 0x350   : > { %v7124_v23 = vmax.f32 %v1907_v24, %v2015_v17  ;;  %v1913_v7 = vmax.f32 %v7085_v10, %v1786_v55  ;;  %v2022_v60 = vsel %vm416_vm0, %v2020_v28, %v2021_v56  ;;  %v7128_v18 = vmax.f32 %v1908_v19, %v2017_v44  ;;  %v7159_v19 = vpop.f32.mrf.mxu1 }
 0x351   : > { %v2149_v41 = vmax.f32 %v1909_v12, %v2019_v50  ;;  %v2024_v3 = vsel %vm416_vm0, %v2021_v56, %v2023_v39  ;;  %v2473_v16 = vmax.f32 %v7952_v42, %v7966_v48  ;;  %v2474_v36 = vmax.f32 %v7953_v40, %v7967_v32  ;;  %v7175_v56 = vpop.f32.mrf.mxu3 }
 0x352   : > { %v2475_v61 = vmax.f32 %v7954_v58, %v7968_v63  ;;  %v2476_v22 = vmax.f32 %v7955_v26, %v7969_v57  ;;  %v2477_v53 = vmax.f32 %v7966_v48, %v7974_v1  ;;  %v2478_v4 = vmax.f32 %v7967_v32, %v7975_v46 }
 0x353   : > { %v2479_v24 = vmax.f32 %v7968_v63, %v7976_v37  ;;  %v2026_v42 = vsel %vm416_vm0, %v2023_v39, %v7770_v27  ;;  %v2481_v40 = vmax.f32 %v7974_v1, %v6806_v11  ;;  %v2482_v58 = vmax.f32 %v7975_v46, %v6808_v33 }
 0x354   : > { %v2483_v26 = vmax.f32 %v7976_v37, %v6826_v8  ;;  %v7154_v48 = vmax.f32 %v1906_v25, %v2011_v34  ;;  %v2521_v32 = vmax.f32 %v2473_v16, %v7974_v1  ;;  %v2522_v10 = vmax.f32 %v2474_v36, %v7975_v46 }
 0x355   : > { %v2523_v63 = vmax.f32 %v2475_v61, %v7976_v37  ;;  %v2524_v12 = vmax.f32 %v2476_v22, %v7977_v31  ;;  %v2525_v38 = vmax.f32 %v2477_v53, %v6806_v11  ;;  %v2526_v51 = vmax.f32 %v2478_v4, %v6808_v33 }
 0x356   : > { %v2527_v30 = vmax.f32 %v2479_v24, %v6826_v8  ;;  %v7165_v5 = vmax.f32 %v1911_v49, %v2022_v60  ;;  %v7167_v34 = vmax.f32 %v2481_v40, %v2143_v15  ;;  %v7169_v21 = vmax.f32 %v2482_v58, %v2144_v2 }
 0x357   : > { %v2531_v1 = vmax.f32 %v2483_v26, %v2145_v0  ;;  %v2153_v46 = vmax.f32 %v1913_v7, %v2026_v42  ;;  %v2569_v37 = vmax.f32 %v2521_v32, %v6806_v11  ;;  %v2570_v59 = vmax.f32 %v2522_v10, %v6808_v33 }
 0x358   : > { %v2571_v45 = vmax.f32 %v2523_v63, %v6826_v8  ;;  %v2572_v28 = vmax.f32 %v2524_v12, %v6812_v9  ;;  %v2573_v52 = vmax.f32 %v2525_v38, %v2143_v15  ;;  %v2574_v43 = vmax.f32 %v2526_v51, %v2144_v2  ;;  %v7216_v42 = vpop.f32.mrf.mxu1 }
 0x359   : > { %v2575_v17 = vmax.f32 %v2527_v30, %v2145_v0  ;;  %v7177_v55 = vmax.f32 %v1912_v13, %v2024_v3  ;;  %v2577_v44 = vmax.f32 %v7167_v34, %v7124_v23  ;;  %v2579_v11 = vmax.f32 %v2531_v1, %v2149_v41 }
 0x35a   : > { %v7183_v39 = vmax.f32 %v2569_v37, %v2143_v15  ;;  %v7185_v33 = vmax.f32 %v2570_v59, %v2144_v2  ;;  %v7187_v8 = vmax.f32 %v2571_v45, %v2145_v0  ;;  %v7190_v25 = vmax.f32 %v2572_v28, %v7154_v48 }
 0x35b   : > { %v2480_v49 = vmax.f32 %v7969_v57, %v7977_v31  ;;  %v7195_v13 = vmax.f32 %v2573_v52, %v7124_v23  ;;  %v7198_v7 = vmax.f32 %v2574_v43, %v7128_v18  ;;  %v7200_v60 = vmax.f32 %v2575_v17, %v2149_v41  ;;  %v7235_v52 = vpop.f32.mrf.mxu3 }
 0x35c   : > { %v2484_v15 = vmax.f32 %v7977_v31, %v6812_v9  ;;  %v7204_v2 = vmax.f32 %v2579_v11, %v2153_v46  ;;  %v2740_v0 = vrot.slane %v7183_v39, 1  ;;  %v2741_v3 = vrot.slane %v7185_v33, 1 }
 0x35d   : > { %v2743_v16 = vrot.slane %v7187_v8, 1  ;;  %v2745_v36 = vrot.slane %v7190_v25, 1  ;;  %v2747_v61 = vrot.slane %v7195_v13, 1  ;;  %v2748_v22 = vrot.slane %v7198_v7, 1 }
 0x35e   : > { %v2742_v41 = vsel %vm1192_vm1, %v2740_v0, %v2741_v3  ;;  %v2750_v53 = vrot.slane %v7200_v60, 1  ;;  %v2896_v4 = vrot.slane %v7183_v39, 2  ;;  %v2897_v24 = vrot.slane %v7185_v33, 2 }
 0x35f   : > { %v2744_v40 = vsel %vm1192_vm1, %v2741_v3, %v2743_v16  ;;  %v2746_v58 = vsel %vm1192_vm1, %v2743_v16, %v2745_v36  ;;  %v2749_v26 = vsel %vm1192_vm1, %v2747_v61, %v2748_v22  ;;  %v2824_v32 = vmax.f32 %v7183_v39, %v2742_v41 }
 0x360   : > { %v2751_v10 = vsel %vm1192_vm1, %v2748_v22, %v2750_v53  ;;  %v2825_v63 = vmax.f32 %v7185_v33, %v2744_v40  ;;  %v2826_v12 = vmax.f32 %v7187_v8, %v2746_v58  ;;  %v2827_v38 = vmax.f32 %v7195_v13, %v2749_v26 }
 0x361   : > { %v2828_v51 = vmax.f32 %v7198_v7, %v2751_v10  ;;  %v2898_v30 = vsel %vm1433_vm2, %v2896_v4, %v2897_v24  ;;  %v2899_v1 = vrot.slane %v7187_v8, 2  ;;  %v2901_v46 = vrot.slane %v7190_v25, 2 }
 0x362   : > { %v2903_v37 = vrot.slane %v7195_v13, 2  ;;  %v2904_v59 = vrot.slane %v7198_v7, 2  ;;  %v2906_v45 = vrot.slane %v7200_v60, 2  ;;  %v2980_v28 = vmax.f32 %v2824_v32, %v2898_v30 }
 0x363   : > { %v2900_v43 = vsel %vm1433_vm2, %v2897_v24, %v2899_v1  ;;  %v2902_v17 = vsel %vm1433_vm2, %v2899_v1, %v2901_v46  ;;  %v3052_v11 = vrot.slane %v7183_v39, 3  ;;  %v3053_v0 = vrot.slane %v7185_v33, 3 }
 0x364   : > { %v2905_v3 = vsel %vm1433_vm2, %v2903_v37, %v2904_v59  ;;  %v2907_v16 = vsel %vm1433_vm2, %v2904_v59, %v2906_v45  ;;  %v2981_v36 = vmax.f32 %v2825_v63, %v2900_v43  ;;  %v2982_v61 = vmax.f32 %v2826_v12, %v2902_v17 }
 0x365   : > { %v2983_v22 = vmax.f32 %v2827_v38, %v2905_v3  ;;  %v2984_v41 = vmax.f32 %v2828_v51, %v2907_v16  ;;  %v3054_v4 = vsel %vm1674_vm4, %v3052_v11, %v3053_v0  ;;  %v3055_v24 = vrot.slane %v7187_v8, 3  ;;  %v7260_v11 = vpop.f32.mrf.mxu1 }
 0x366   : > { %v3057_v40 = vrot.slane %v7190_v25, 3  ;;  %v3059_v58 = vrot.slane %v7195_v13, 3  ;;  %v3060_v26 = vrot.slane %v7198_v7, 3  ;;  %v3062_v32 = vrot.slane %v7200_v60, 3 }
 0x367   : > { %v3056_v10 = vsel %vm1674_vm4, %v3053_v0, %v3055_v24  ;;  %v3136_v30 = vmax.f32 %v2980_v28, %v3054_v4  ;;  %v3208_v63 = vrot.slane %v7183_v39, 4  ;;  %v3209_v12 = vrot.slane %v7185_v33, 4  ;;  %v8018_v4 = vld [vmem:[#allocation19_spill] sm:$0xff] }
 0x368   : > { %v3058_v38 = vsel %vm1674_vm4, %v3055_v24, %v3057_v40  ;;  %v3061_v51 = vsel %vm1674_vm4, %v3059_v58, %v3060_v26  ;;  %v3063_v1 = vsel %vm1674_vm4, %v3060_v26, %v3062_v32  ;;  %v3137_v46 = vmax.f32 %v2981_v36, %v3056_v10  ;;  %v8019_v36 = vld [vmem:[#allocation38_spill] sm:$0xff] }
 0x369   : > { %v3138_v37 = vmax.f32 %v2982_v61, %v3058_v38  ;;  %v3139_v59 = vmax.f32 %v2983_v22, %v3061_v51  ;;  %v3140_v43 = vmax.f32 %v2984_v41, %v3063_v1  ;;  %v3210_v17 = vsel %vm416_vm0, %v3208_v63, %v3209_v12  ;;  %v8020_v22 = vld [vmem:[#allocation3_spill] sm:$0xff]  ;;  %v8021_v41 = vld [vmem:[#allocation20_spill] sm:$0xff]  ;;  %v7283_v63 = vpop.f32.mrf.mxu3 }
 0x36a   : > { %v3211_v39 = vrot.slane %v7187_v8, 4  ;;  %v3213_v33 = vrot.slane %v7190_v25, 4  ;;  %v3215_v28 = vrot.slane %v7195_v13, 4  ;;  %v3216_v0 = vrot.slane %v7198_v7, 4  ;;  %v8022_v25 = vld [vmem:[#allocation23_spill] sm:$0xff]  ;;  %v8023_v51 = vld [vmem:[#allocation24_spill] sm:$0xff] }
 0x36b   : > { %v3218_v3 = vrot.slane %v7200_v60, 4  ;;  %v3292_v16 = vmax.f32 %v3136_v30, %v3210_v17  ;;  %v3497_v61 = vmax.f32 %v8019_v36, %v8018_v4  ;;  %v3498_v24 = vmax.f32 %v8021_v41, %v8020_v22  ;;  %v8024_v17 = vld [vmem:[#allocation25_spill] sm:$0xff] }
 0x36c   : > { %v3212_v40 = vsel %vm416_vm0, %v3209_v12, %v3211_v39  ;;  %v3214_v58 = vsel %vm416_vm0, %v3211_v39, %v3213_v33  ;;  %v3217_v8 = vsel %vm416_vm0, %v3215_v28, %v3216_v0  ;;  %v3500_v13 = vmax.f32 %v8018_v4, %v8022_v25 }
 0x36d   : > { %v3219_v7 = vsel %vm416_vm0, %v3216_v0, %v3218_v3  ;;  %v3293_v26 = vmax.f32 %v3137_v46, %v3212_v40  ;;  %v7279_v10 = vmax.f32 %v3138_v37, %v3214_v58  ;;  %v7281_v30 = vmax.f32 %v3139_v59, %v3217_v8  ;;  %v8025_v59 = vld [vmem:[#allocation41_spill] sm:$0xff]  ;;  %v8026_v8 = vld [vmem:[#allocation4_spill] sm:$0xff] }
 0x36e   : > { %v7285_v38 = vmax.f32 %v3140_v43, %v3219_v7  ;;  %v3360_v12 = vrot.slane %v3292_v16, 4  ;;  %v3501_v1 = vmax.f32 %v8020_v22, %v8023_v51  ;;  %v3503_v39 = vmax.f32 %v8022_v25, %v8024_v17  ;;  %v7325_v7 = vpop.f32.mrf.mxu1 }
 0x36f   : > { %v7295_v46 = vmax.f32 %v2480_v49, %v6812_v9  ;;  %v3361_v37 = vrot.slane %v3293_v26, 4  ;;  %v3504_v33 = vmax.f32 %v8023_v51, %v8025_v59  ;;  %v3521_v43 = vmax.f32 %v3497_v61, %v8022_v25  ;;  %v8027_v25 = vld [vmem:[#allocation11_spill] sm:$0xff] }
 0x370   : > { %v3522_v28 = vmax.f32 %v3498_v24, %v8023_v51  ;;  %v3524_v0 = vmax.f32 %v3500_v13, %v8024_v17  ;;  %v3525_v4 = vmax.f32 %v3501_v1, %v8025_v59  ;;  %v7303_v36 = vmax.f32 %v3503_v39, %v3292_v16  ;;  %v8028_v39 = vld [vmem:[#allocation31_spill] sm:$0xff] }
 0x371   : > { %v7309_v57 = vmax.f32 %v2484_v15, %v7154_v48  ;;  %v3362_v49 = vsel %vm416_vm0, %v3360_v12, %v3361_v37  ;;  %v7312_v22 = vmax.f32 %v3504_v33, %v3293_v26  ;;  %v3545_v61 = vmax.f32 %v3521_v43, %v8024_v17 }
 0x372   : > { %4408 = vmatmul.msk.f32.gmra.mxu3 %vm677_vm3, %v3362_v49  ;;  %v3546_v41 = vmax.f32 %v3522_v28, %v8025_v59  ;;  %v3548_v24 = vmax.f32 %v3524_v0, %v3292_v16  ;;  %v3549_v40 = vmax.f32 %v3525_v4, %v3293_v26  ;;  %v2576_v31 = vmax.f32 %v7295_v46, %v7154_v48  ;;  %v8029_v4 = vld [vmem:[#allocation26_spill] sm:$0xff] }
 0x373   : > { %v3569_v15 = vmax.f32 %v3545_v61, %v3292_v16  ;;  %v3499_v13 = vmax.f32 %v8027_v25, %v8026_v8  ;;  %v3363_v17 = vrot.slane %v7279_v10, 4  ;;  %v8030_v9 = vrot.slane %v6968_v35, 1 }
 0x374   : > { %v3570_v12 = vmax.f32 %v3546_v41, %v3293_v26  ;;  %v7328_v51 = vmax.f32 %v3548_v24, %v7281_v30  ;;  %v7331_v1 = vmax.f32 %v3549_v40, %v7285_v38  ;;  %v7339_v26 = vmax.f32 %v2577_v44, %v7165_v5  ;;  %v7343_v24 = vpop.f32.mrf.mxu3 }
 0x375   : > { %v3523_v48 = vmax.f32 %v3499_v13, %v8028_v39  ;;  %v3627_v46 = vrot.slane %v3569_v15, 1  ;;  %v3715_v59 = vrot.slane %v3569_v15, 2  ;;  %v3803_v33 = vrot.slane %v3569_v15, 3 }
 0x376   : > { %v3628_v16 = vrot.slane %v3570_v12, 1  ;;  %v3716_v43 = vrot.slane %v3570_v12, 2  ;;  %v3804_v28 = vrot.slane %v3570_v12, 3  ;;  %v3891_v0 = vrot.slane %v3569_v15, 4 }
 0x377   : > { %v3547_v49 = vmax.f32 %v3523_v48, %v8029_v4  ;;  %v3892_v61 = vrot.slane %v3570_v12, 4  ;;  %v3364_v41 = vsel %vm416_vm0, %v3361_v37, %v3363_v17  ;;  %v1428_v58 = vmax.f32 %v6968_v35, %v8030_v9 }
 0x378   : > { %v3629_v40 = vsel %vm1192_vm1, %v3627_v46, %v3628_v16  ;;  %v3717_v25 = vsel %vm1433_vm2, %v3715_v59, %v3716_v43  ;;  %v3805_v13 = vsel %vm1674_vm4, %v3803_v33, %v3804_v28  ;;  %v3505_v23 = vmax.f32 %v8028_v39, %v8029_v4 }
 0x379   : > { %v3571_v5 = vmax.f32 %v3547_v49, %v7279_v10  ;;  %v3681_v34 = vmax.f32 %v3569_v15, %v3629_v40  ;;  %v3893_v44 = vsel %vm416_vm0, %v3891_v0, %v3892_v61  ;;  %v8031_v37 = vrot.slane %v6968_v35, 2 }
 0x37a   : > { %4409 = vmatmul.msk.f32.gmra.mxu3 %vm677_vm3, %v3364_v41  ;;  %v3502_v48 = vmax.f32 %v8026_v8, %v8028_v39  ;;  %v3632_v46 = vrot.slane %v7328_v51, 1  ;;  %v7772_v9 = vrot.slane %v7331_v1, 1 }
 0x37b   : > { %v1669_v17 = vmax.f32 %v1428_v58, %v8031_v37  ;;  %v3630_v59 = vrot.slane %v3571_v5, 1  ;;  %v3718_v33 = vrot.slane %v3571_v5, 2  ;;  %v3769_v27 = vmax.f32 %v3681_v34, %v3717_v25  ;;  %v7371_v37 = vpop.f32.mrf.mxu1 }
 0x37c   : > { %v3806_v20 = vrot.slane %v3571_v5, 3  ;;  %v3894_v49 = vrot.slane %v3571_v5, 4  ;;  %v3634_v0 = vsel %vm1192_vm1, %v3632_v46, %v7772_v9  ;;  %v3720_v58 = vrot.slane %v7328_v51, 2  ;;  %v2389_v9 = vpop.f32.mrf.mxu2 }
 0x37d   : > { %v1910_v15 = vmax.f32 %v1669_v17, %v1778_v14  ;;  %v3631_v8 = vsel %vm1192_vm1, %v3628_v16, %v3630_v59  ;;  %v3719_v39 = vsel %vm1433_vm2, %v3716_v43, %v3718_v33  ;;  %v3857_v40 = vmax.f32 %v3769_v27, %v3805_v13 }
 0x37e   : > { %v3807_v41 = vsel %vm1674_vm4, %v3804_v28, %v3806_v20  ;;  %v3682_v25 = vmax.f32 %v3570_v12, %v3631_v8  ;;  %v3895_v34 = vsel %vm416_vm0, %v3892_v61, %v3894_v49  ;;  %v3683_v50 = vmax.f32 %v3571_v5, %v3630_v59  ;;  %v7388_v5 = vpop.f32.mrf.mxu3 }
 0x37f   : > { %v7376_v14 = vmax.f32 %v1910_v15, %v2018_v47  ;;  %v3945_v17 = vmax.f32 %v3857_v40, %v3893_v44  ;;  %v3526_v46 = vmax.f32 %v3502_v48, %v8029_v4  ;;  %v3684_v16 = vmax.f32 %v7328_v51, %v3634_v0 }
 0x380   : > { %v3721_v43 = vrot.slane %v7331_v1, 2  ;;  %v3770_v28 = vmax.f32 %v3682_v25, %v3719_v39  ;;  %v3771_v27 = vmax.f32 %v3683_v50, %v3718_v33  ;;  %v3808_v12 = vrot.slane %v7328_v51, 3 }
 0x381   : > { %v2624_v13 = vmax.f32 %v2576_v31, %v7376_v14  ;;  %v4003_v61 = vrot.slane %v3945_v17, 2  ;;  %v3809_v47 = vrot.slane %v7331_v1, 3  ;;  %v3896_v4 = vrot.slane %v7328_v51, 4 }
 0x382   : > { %v3722_v35 = vsel %vm1433_vm2, %v3720_v58, %v3721_v43  ;;  %v3858_v44 = vmax.f32 %v3770_v28, %v3807_v41  ;;  %v3859_v48 = vmax.f32 %v3771_v27, %v3806_v20  ;;  %v7416_v28 = vadd.f32 %v2389_v9, %v7000_v29 }
 0x383   : > { %v2752_v59 = vrot.slane %v2624_v13, 1  ;;  %v2908_v15 = vrot.slane %v2624_v13, 2  ;;  %v3064_v50 = vrot.slane %v2624_v13, 3  ;;  %v3220_v33 = vrot.slane %v2624_v13, 4 }
 0x384   : > { %v3772_v31 = vmax.f32 %v3684_v16, %v3722_v35  ;;  %v3810_v0 = vsel %vm1674_vm4, %v3808_v12, %v3809_v47  ;;  %v3946_v8 = vmax.f32 %v3858_v44, %v3895_v34  ;;  %v3947_v39 = vmax.f32 %v3859_v48, %v3894_v49  ;;  %v7406_v49 = vpop.f32.mrf.mxu1  ;;  %v7433_v12 = vpop.f32.mrf.mxu2 }
 0x385   : > { %v2753_v58 = vsel %vm1192_vm1, %v2750_v53, %v2752_v59  ;;  %v2909_v51 = vsel %vm1433_vm2, %v2906_v45, %v2908_v15  ;;  %v3065_v41 = vsel %vm1674_vm4, %v3062_v32, %v3064_v50  ;;  %v3221_v40 = vsel %vm416_vm0, %v3218_v3, %v3220_v33 }
 0x386   : > { %v2829_v20 = vmax.f32 %v7200_v60, %v2753_v58  ;;  %v3860_v25 = vmax.f32 %v3772_v31, %v3810_v0  ;;  %v8032_v53 = vmax.f32 %v7169_v21, %v7128_v18  ;;  %v4004_v45 = vrot.slane %v3946_v8, 2  ;;  %v7442_v48 = vpop.f32.mrf.mxu3 }
 0x387   : > { %v4006_v17 = vrot.slane %v3947_v39, 2  ;;  %v3897_v16 = vrot.slane %v7331_v1, 4  ;;  %v7419_v60 = vmax.f32 %v3505_v23, %v7279_v10  ;;  %v3550_v13 = vmax.f32 %v3526_v46, %v7279_v10 }
 0x388   : > { %v7412_v34 = vmax.f32 %v8032_v53, %v7177_v55  ;;  %v2985_v32 = vmax.f32 %v2829_v20, %v2909_v51  ;;  %v4005_v3 = vsel %vm1433_vm2, %v4003_v61, %v4004_v45  ;;  %v8033_v29 = vrot.slane %v6977_v6, 1 }
 0x389   : > { %v4007_v27 = vsel %vm1433_vm2, %v4004_v45, %v4006_v17  ;;  %v3898_v18 = vsel %vm416_vm0, %v3896_v4, %v3897_v16  ;;  %4421 = vmatmul.msk.f32.gmra.mxu1 %vm677_vm3, %v4005_v3  ;;  %v2580_v23 = vmax.f32 %v7309_v57, %v7376_v14  ;;  %v2754_v61 = vrot.slane %v7339_v26, 1 }
 0x38a   : > { %v3141_v21 = vmax.f32 %v2985_v32, %v3065_v41  ;;  %v7426_v55 = vmax.f32 %v3860_v25, %v3898_v18  ;;  %v1432_v9 = vmax.f32 %v6977_v6, %v8033_v29  ;;  %v2755_v10 = vrot.slane %v7412_v34, 1 }
 0x38b   : > { %v2757_v46 = vrot.slane %v7204_v2, 1  ;;  %v2910_v35 = vrot.slane %v7339_v26, 2  ;;  %v8034_v59 = vrot.slane %v6977_v6, 2  ;;  %v2911_v57 = vrot.slane %v7412_v34, 2 }
 0x38c   : > { %v7439_v4 = vmax.f32 %v3141_v21, %v3221_v40  ;;  %v4008_v44 = vrot.slane %v7426_v55, 2  ;;  %v2756_v14 = vsel %vm1192_vm1, %v2754_v61, %v2755_v10  ;;  %v2913_v33 = vrot.slane %v7204_v2, 2  ;;  %v7460_v3 = vpop.f32.mrf.mxu1 }
 0x38d   : > { %v1673_v15 = vmax.f32 %v1432_v9, %v8034_v59  ;;  %v2758_v50 = vsel %vm1192_vm1, %v2755_v10, %v2757_v46  ;;  %v3066_v31 = vrot.slane %v7339_v26, 3  ;;  %v8035_v8 = vrot.slane %v6977_v6, 3 }
 0x38e   : > { %v3574_v0 = vmax.f32 %v3550_v13, %v7439_v4  ;;  %v2830_v58 = vmax.f32 %v7339_v26, %v2756_v14  ;;  %v2831_v51 = vmax.f32 %v7412_v34, %v2758_v50  ;;  %v2912_v20 = vsel %vm1433_vm2, %v2910_v35, %v2911_v57 }
 0x38f   : > { %v1914_v39 = vmax.f32 %v1673_v15, %v8035_v8  ;;  %v2914_v41 = vsel %vm1433_vm2, %v2911_v57, %v2913_v33  ;;  %v3067_v40 = vrot.slane %v7412_v34, 3  ;;  %v3069_v25 = vrot.slane %v7204_v2, 3 }
 0x390   : > { %v3635_v53 = vrot.slane %v3574_v0, 1  ;;  %v3723_v45 = vrot.slane %v3574_v0, 2  ;;  %v3811_v17 = vrot.slane %v3574_v0, 3  ;;  %v3899_v32 = vrot.slane %v3574_v0, 4 }
 0x391   : > { %v8036_v13 = vrot.slane %v6977_v6, 4  ;;  %v2986_v21 = vmax.f32 %v2830_v58, %v2912_v20  ;;  %v2987_v29 = vmax.f32 %v2831_v51, %v2914_v41  ;;  %v3068_v9 = vsel %vm1674_vm4, %v3066_v31, %v3067_v40  ;;  %4422 = vmatmul.msk.f32.gmra.mxu1 %vm677_vm3, %v4007_v27  ;;  %v2395_v58 = vpop.f32.mrf.mxu2 }
 0x392   : > { %v8037_v61 = vrot.slane %v7331_v1, 1  ;;  %v3724_v35 = vsel %vm1433_vm2, %v3721_v43, %v3723_v45  ;;  %v3812_v59 = vsel %vm1674_vm4, %v3809_v47, %v3811_v17  ;;  %v3900_v6 = vsel %vm416_vm0, %v3897_v16, %v3899_v32 }
 0x393   : > { %v2154_v18 = vmax.f32 %v1914_v39, %v8036_v13  ;;  %v3686_v57 = vmax.f32 %v3574_v0, %v3635_v53  ;;  %v3070_v27 = vsel %vm1674_vm4, %v3067_v40, %v3069_v25  ;;  %v3142_v50 = vmax.f32 %v2986_v21, %v3068_v9 }
 0x394   : > { %v3636_v10 = vsel %vm1192_vm1, %v8037_v61, %v3635_v53  ;;  %v3143_v31 = vmax.f32 %v2987_v29, %v3070_v27  ;;  %v3222_v8 = vrot.slane %v7339_v26, 4  ;;  %v3223_v39 = vrot.slane %v7412_v34, 4  ;;  %v4071_v29 = vpop.f32.mrf.mxu1 }
 0x395   : > { %v3685_v15 = vmax.f32 %v7331_v1, %v3636_v10  ;;  %v2628_v14 = vmax.f32 %v2580_v23, %v2154_v18  ;;  %v3774_v51 = vmax.f32 %v3686_v57, %v3723_v45  ;;  %v3225_v1 = vrot.slane %v7204_v2, 4  ;;  %v7482_v23 = vpop.f32.mrf.mxu3 }
 0x396   : > { %v3224_v16 = vsel %vm416_vm0, %v3222_v8, %v3223_v39  ;;  %v8039_v57 = vmax.f32 %v7312_v22, %v7285_v38 }
 0x397   : > { %v3773_v43 = vmax.f32 %v3685_v15, %v3724_v35  ;;  %v2759_v20 = vrot.slane %v2628_v14, 1  ;;  %v2915_v41 = vrot.slane %v2628_v14, 2  ;;  %v3071_v47 = vrot.slane %v2628_v14, 3 }
 0x398   : > { %v3227_v0 = vrot.slane %v2628_v14, 4  ;;  %v3862_v53 = vmax.f32 %v3774_v51, %v3811_v17  ;;  %v3226_v18 = vsel %vm416_vm0, %v3223_v39, %v3225_v1  ;;  %v3298_v10 = vmax.f32 %v3142_v50, %v3224_v16 }
 0x399   : > { %v3861_v40 = vmax.f32 %v3773_v43, %v3812_v59  ;;  %v2760_v13 = vsel %vm1192_vm1, %v2757_v46, %v2759_v20  ;;  %v2916_v26 = vsel %vm1433_vm2, %v2913_v33, %v2915_v41  ;;  %v3072_v45 = vsel %vm1674_vm4, %v3069_v25, %v3071_v47 }
 0x39a   : > { %v2832_v34 = vmax.f32 %v7204_v2, %v2760_v13  ;;  %v3228_v21 = vsel %vm416_vm0, %v3225_v1, %v3227_v0  ;;  %v3950_v61 = vmax.f32 %v3862_v53, %v3899_v32  ;;  %v3299_v35 = vmax.f32 %v3143_v31, %v3226_v18  ;;  %v8040_v32 = vld [vmem:[#allocation27_spill] sm:$0xff]  ;;  %v2398_v31 = vpop.f32.mrf.mxu2 }
 0x39b   : > { %v3949_v9 = vmax.f32 %v3861_v40, %v3900_v6  ;;  %v3466_v17 = vadd.f32 %v7388_v5, %v7416_v28  ;;  %v3553_v46 = vmax.f32 %v7419_v60, %v7439_v4  ;;  %v8038_v25 = vmax.f32 %v7303_v36, %v7281_v30  ;;  %v7505_v5 = vld [vmem:[%s7608_s4] ss:$0 sm:$0xff] }
 0x39c   : > { %v2988_v59 = vmax.f32 %v2832_v34, %v2916_v26  ;;  %v4011_v2 = vrot.slane %v3950_v61, 2  ;;  %v3576_v6 = vmax.f32 %v8039_v57, %v3299_v35  ;;  %v2393_v14 = vadd.f32 %v7433_v12, %v8040_v32  ;;  %v4074_v16 = vpop.f32.mrf.mxu1 }
 0x39d   : > { %v4009_v33 = vrot.slane %v3949_v9, 2  ;;  %v3575_v15 = vmax.f32 %v8038_v25, %v3298_v10  ;;  %v4119_v50 = vadd.f32 %v4071_v29, %v3466_v17  ;;  %v3427_v41 = vpop.f32.mrf.mxu3  ;;  %v2396_v1 = vadd.f32 %v2395_v58, %v7100_v62 }
 0x39e   : > { %v3144_v27 = vmax.f32 %v2988_v59, %v3072_v45  ;;  %v3638_v60 = vrot.slane %v3576_v6, 1  ;;  %v3726_v12 = vrot.slane %v3576_v6, 2  ;;  %v3814_v39 = vrot.slane %v3576_v6, 3 }
 0x39f   : > { %v4010_v28 = vsel %vm1433_vm2, %v4008_v44, %v4009_v33  ;;  %v4012_v30 = vsel %vm1433_vm2, %v4009_v33, %v4011_v2  ;;  %v3637_v36 = vrot.slane %v3575_v15, 1  ;;  %v3725_v22 = vrot.slane %v3575_v15, 2 }
 0x3a0   : > { %4423 = vmatmul.msk.f32.gmra.mxu1 %vm677_vm3, %v4010_v28  ;;  %v3300_v38 = vmax.f32 %v3144_v27, %v3228_v21  ;;  %v3813_v4 = vrot.slane %v3575_v15, 3  ;;  %v3901_v43 = vrot.slane %v3575_v15, 4  ;;  %v3902_v51 = vrot.slane %v3576_v6, 4 }
 0x3a1   : > { %v3639_v8 = vsel %vm1192_vm1, %v3637_v36, %v3638_v60  ;;  %v3727_v44 = vsel %vm1433_vm2, %v3725_v22, %v3726_v12  ;;  %v4139_v47 = vadd.f32 %v7505_v5, %v4119_v50  ;;  %v3467_v0 = vadd.f32 %v7442_v48, %v2393_v14 }
 0x3a2   : > { %v3577_v20 = vmax.f32 %v3553_v46, %v3300_v38  ;;  %v3687_v55 = vmax.f32 %v3575_v15, %v3639_v8  ;;  %v3815_v40 = vsel %vm1674_vm4, %v3813_v4, %v3814_v39  ;;  %v3903_v53 = vsel %vm416_vm0, %v3901_v43, %v3902_v51  ;;  %v2401_v57 = vpop.f32.mrf.mxu2 }
 0x3a3   : > { %vm4155_vm5 = vcmp.ge.f32.partialorder %v4139_v47, 0.0  ;;  %v4171_v21 = vmul.f32 0.1, %v4139_v47  ;;  %v4120_v59 = vadd.f32 %v4074_v16, %v3467_v0  ;;  %v3468_v33 = vadd.f32 %v7482_v23, %v2396_v1 }
 0x3a4   : > { %v3640_v13 = vrot.slane %v3577_v20, 1  ;;  %v3728_v26 = vrot.slane %v3577_v20, 2  ;;  %v3775_v34 = vmax.f32 %v3687_v55, %v3727_v44  ;;  %v3816_v45 = vrot.slane %v3577_v20, 3  ;;  %v4077_v15 = vpop.f32.mrf.mxu1 }
 0x3a5   : > { %v3904_v18 = vrot.slane %v3577_v20, 4  ;;  %v4187_v35 = vsel %vm4155_vm5, %v4139_v47, %v4171_v21  ;;  %v4140_v25 = vadd.f32 %v7505_v5, %v4120_v59  ;;  %v4121_v14 = vadd.f32 %v4077_v15, %v3468_v33  ;;  %v3430_v27 = vpop.f32.mrf.mxu3 }
 0x3a6   : > { %v3641_v29 = vsel %vm1192_vm1, %v3638_v60, %v3640_v13  ;;  %v3729_v9 = vsel %vm1433_vm2, %v3726_v12, %v3728_v26  ;;  %v3817_v62 = vsel %vm1674_vm4, %v3814_v39, %v3816_v45  ;;  %v3863_v48 = vmax.f32 %v3775_v34, %v3815_v40  ;;  %4204 = vst.msk [vmem:[%s4631_s13] sm:$0xff] %vm4203_vm6, %v4187_v35 }
 0x3a7   : > { %v3688_v58 = vmax.f32 %v3576_v6, %v3641_v29  ;;  %v3905_v61 = vsel %vm416_vm0, %v3902_v51, %v3904_v18  ;;  %v3689_v10 = vmax.f32 %v3577_v20, %v3640_v13  ;;  %vm4156_vm0 = vcmp.ge.f32.partialorder %v4140_v25, 0.0 }
 0x3a8   : > { %4424 = vmatmul.msk.f32.gmra.mxu1 %vm677_vm3, %v4012_v30  ;;  %v3951_v17 = vmax.f32 %v3863_v48, %v3903_v53  ;;  %v4172_v50 = vmul.f32 0.1, %v4140_v25  ;;  %v4141_v60 = vadd.f32 %v7505_v5, %v4121_v14  ;;  %v2399_v23 = vadd.f32 %v2398_v31, %v7159_v19 }
 0x3a9   : > { %v3776_v46 = vmax.f32 %v3688_v58, %v3729_v9  ;;  %v3777_v2 = vmax.f32 %v3689_v10, %v3728_v26  ;;  %v2402_v47 = vadd.f32 %v2401_v57, %v7216_v42 }
 0x3aa   : > { %v4013_v30 = vrot.slane %v3951_v17, 2  ;;  %v4188_v38 = vsel %vm4156_vm0, %v4140_v25, %v4172_v50  ;;  %vm4157_vm7 = vcmp.ge.f32.partialorder %v4141_v60, 0.0  ;;  %v4173_v4 = vmul.f32 0.1, %v4141_v60  ;;  %v2404_v31 = vpop.f32.mrf.mxu2 }
 0x3ab   : > { %v3864_v6 = vmax.f32 %v3776_v46, %v3817_v62  ;;  %v3865_v32 = vmax.f32 %v3777_v2, %v3816_v45  ;;  %4205 = vst.msk [vmem:[%s4631_s13 + $0x8] sm:$0xff] %vm4203_vm6, %v4188_v38  ;;  %v3469_v43 = vadd.f32 %v3427_v41, %v2399_v23  ;;  %v3470_v1 = vadd.f32 %v3430_v27, %v2402_v47 }
 0x3ac   : > { %v4189_v51 = vsel %vm4157_vm7, %v4141_v60, %v4173_v4  ;;  %v4080_v20 = vpop.f32.mrf.mxu1  ;;  %v2405_v26 = vadd.f32 %v2404_v31, %v7260_v11  ;;  %v8041_v31 = vld [vmem:[#allocation28_spill] sm:$0xff] }
 0x3ad   : > { %v3952_v28 = vmax.f32 %v3864_v6, %v3905_v61  ;;  %v3953_v36 = vmax.f32 %v3865_v32, %v3904_v18  ;;  %4206 = vst.msk [vmem:[%s4631_s13 + $0x10] sm:$0xff] %vm4203_vm6, %v4189_v51  ;;  %v4122_v19 = vadd.f32 %v4080_v20, %v3469_v43  ;;  %v3433_v44 = vpop.f32.mrf.mxu3 }
 0x3ae   : > { %v3471_v45 = vadd.f32 %v3433_v44, %v2405_v26 }
 0x3af   : > { %v4014_v22 = vrot.slane %v3952_v28, 2  ;;  %v4016_v12 = vrot.slane %v3953_v36, 2  ;;  %v4142_v55 = vadd.f32 %v7505_v5, %v4122_v19 }
 0x3b1   : > { %v4015_v8 = vsel %vm1433_vm2, %v4013_v30, %v4014_v22  ;;  %v4017_v39 = vsel %vm1433_vm2, %v4014_v22, %v4016_v12  ;;  %vm4158_vm8 = vcmp.ge.f32.partialorder %v4142_v55, 0.0  ;;  %v4174_v16 = vmul.f32 0.1, %v4142_v55 }
 0x3b2   : > { %4425 = vmatmul.msk.f32.gmra.mxu1 %vm677_vm3, %v4015_v8  ;;  %v2407_v13 = vpop.f32.mrf.mxu2 }
 0x3b3   : > { %v4190_v0 = vsel %vm4158_vm8, %v4142_v55, %v4174_v16  ;;  %v2408_v62 = vadd.f32 %v2407_v13, %v7325_v7 }
 0x3b4   : > { %4207 = vst.msk [vmem:[%s4631_s13 + $0x18] sm:$0xff] %vm4203_vm6, %v4190_v0  ;;  %v4083_v41 = vpop.f32.mrf.mxu1 }
 0x3b5   : > { %v4123_v40 = vadd.f32 %v4083_v41, %v3470_v1  ;;  %v3436_v42 = vpop.f32.mrf.mxu3 }
 0x3b6   : > { %v3472_v61 = vadd.f32 %v3436_v42, %v2408_v62 }
 0x3b7   : > { %v4143_v53 = vadd.f32 %v7505_v5, %v4123_v40 }
 0x3b9   : > { %vm4159_vm9 = vcmp.ge.f32.partialorder %v4143_v53, 0.0  ;;  %v4175_v34 = vmul.f32 0.1, %v4143_v53 }
 0x3ba   : > { %4426 = vmatmul.msk.f32.gmra.mxu1 %vm677_vm3, %v4017_v39  ;;  %v2410_v58 = vpop.f32.mrf.mxu2 }
 0x3bb   : > { %v4191_v18 = vsel %vm4159_vm9, %v4143_v53, %v4175_v34  ;;  %v2411_v46 = vadd.f32 %v2410_v58, %v7371_v37 }
 0x3bc   : > { %4208 = vst.msk [vmem:[%s4631_s13 + $0x20] sm:$0xff] %vm4203_vm6, %v4191_v18  ;;  %v4086_v21 = vpop.f32.mrf.mxu1 }
 0x3bd   : > { %v4124_v29 = vadd.f32 %v4086_v21, %v3471_v45  ;;  %v3439_v10 = vpop.f32.mrf.mxu3 }
 0x3be   : > { %v3473_v2 = vadd.f32 %v3439_v10, %v2411_v46 }
 0x3bf   : > { %v4144_v9 = vadd.f32 %v7505_v5, %v4124_v29 }
 0x3c1   : > { %vm4160_vm3 = vcmp.ge.f32.partialorder %v4144_v9, 0.0  ;;  %v4176_v48 = vmul.f32 0.1, %v4144_v9 }
 0x3c2   : > { %v2413_v57 = vpop.f32.mrf.mxu2 }
 0x3c3   : > { %v4192_v11 = vsel %vm4160_vm3, %v4144_v9, %v4176_v48  ;;  %v2414_v14 = vadd.f32 %v2413_v57, %v7406_v49 }
 0x3c4   : > { %4209 = vst.msk [vmem:[%s4631_s13 + $0x28] sm:$0xff] %vm4203_vm6, %v4192_v11  ;;  %v4089_v35 = vpop.f32.mrf.mxu1 }
 0x3c5   : > { %v4125_v17 = vadd.f32 %v4089_v35, %v3472_v61  ;;  %v3442_v6 = vpop.f32.mrf.mxu3 }
 0x3c6   : > { %v3474_v50 = vadd.f32 %v3442_v6, %v2414_v14 }
 0x3c7   : > { %v4145_v59 = vadd.f32 %v7505_v5, %v4125_v17 }
 0x3c9   : > { %vm4161_vm10 = vcmp.ge.f32.partialorder %v4145_v59, 0.0  ;;  %v4177_v33 = vmul.f32 0.1, %v4145_v59 }
 0x3ca   : > { %v2416_v60 = vpop.f32.mrf.mxu2 }
 0x3cb   : > { %v4193_v7 = vsel %vm4161_vm10, %v4145_v59, %v4177_v33  ;;  %v2417_v38 = vadd.f32 %v2416_v60, %v7460_v3 }
 0x3cc   : > { %4210 = vst.msk [vmem:[%s4631_s13 + $0x30] sm:$0xff] %vm4203_vm6, %v4193_v7  ;;  %v4092_v25 = vpop.f32.mrf.mxu1 }
 0x3cd   : > { %v4126_v15 = vadd.f32 %v4092_v25, %v3473_v2  ;;  %v3445_v23 = vpop.f32.mrf.mxu3 }
 0x3ce   : > { %v3475_v12 = vadd.f32 %v3445_v23, %v2417_v38 }
 0x3cf   : > { %v4146_v32 = vadd.f32 %v7505_v5, %v4126_v15 }
 0x3d1   : > { %vm4162_vm11 = vcmp.ge.f32.partialorder %v4146_v32, 0.0  ;;  %v4178_v27 = vmul.f32 0.1, %v4146_v32 }
 0x3d2   : > { %v2419_v20 = vpop.f32.mrf.mxu2 }
 0x3d3   : > { %v4194_v37 = vsel %vm4162_vm11, %v4146_v32, %v4178_v27  ;;  %v2420_v3 = vadd.f32 %v2419_v20, %v8041_v31 }
 0x3d4   : > { %4211 = vst.msk [vmem:[%s4631_s13 + $0x38] sm:$0xff] %vm4203_vm6, %v4194_v37  ;;  %v4095_v28 = vpop.f32.mrf.mxu1 }
 0x3d5   : > { %v4127_v30 = vadd.f32 %v4095_v28, %v3474_v50  ;;  %v3448_v19 = vpop.f32.mrf.mxu3 }
 0x3d6   : > { %v3476_v55 = vadd.f32 %v3448_v19, %v2420_v3 }
 0x3d7   : > { %v4147_v36 = vadd.f32 %v7505_v5, %v4127_v30 }
 0x3d9   : > { %vm4163_vm12 = vcmp.ge.f32.partialorder %v4147_v36, 0.0  ;;  %v4179_v22 = vmul.f32 0.1, %v4147_v36 }
 0x3da   : > { %v2422_v44 = vpop.f32.mrf.mxu2 }
 0x3db   : > { %v4195_v49 = vsel %vm4163_vm12, %v4147_v36, %v4179_v22  ;;  %v2423_v41 = vadd.f32 %v2422_v44, %v7118_v54 }
 0x3dc   : > { %4212 = vst.msk [vmem:[%s4631_s13 + $0x40] sm:$0xff] %vm4203_vm6, %v4195_v49  ;;  %v4098_v4 = vpop.f32.mrf.mxu1 }
 0x3dd   : > { %v4128_v8 = vadd.f32 %v4098_v4, %v3475_v12  ;;  %v3451_v1 = vpop.f32.mrf.mxu3 }
 0x3de   : > { %v3477_v53 = vadd.f32 %v3451_v1, %v2423_v41 }
 0x3df   : > { %v4148_v39 = vadd.f32 %v7505_v5, %v4128_v8 }
 0x3e1   : > { %vm4164_vm13 = vcmp.ge.f32.partialorder %v4148_v39, 0.0  ;;  %v4180_v43 = vmul.f32 0.1, %v4148_v39 }
 0x3e2   : > { %v2425_v42 = vpop.f32.mrf.mxu2 }
 0x3e3   : > { %v4196_v51 = vsel %vm4164_vm13, %v4148_v39, %v4180_v43  ;;  %v2426_v54 = vadd.f32 %v2425_v42, %v7175_v56 }
 0x3e4   : > { %4213 = vst.msk [vmem:[%s4631_s13 + $0x48] sm:$0xff] %vm4203_vm6, %v4196_v51 }
 0x3e5   : > { %v3454_v18 = vpop.f32.mrf.mxu3 }
 0x3e6   : > { %v3478_v9 = vadd.f32 %v3454_v18, %v2426_v54 }
 0x3ea   : > { %v2428_v62 = vpop.f32.mrf.mxu2 }
 0x3eb   : > { %v2429_v10 = vadd.f32 %v2428_v62, %v7235_v52 }
 0x3ed   : > { %v3457_v61 = vpop.f32.mrf.mxu3 }
 0x3ee   : > { %v3479_v17 = vadd.f32 %v3457_v61, %v2429_v10 }
 0x3f2   : > { %v2431_v2 = vpop.f32.mrf.mxu2 }
 0x3f3   : > { %v2432_v15 = vadd.f32 %v2431_v2, %v7283_v63 }
 0x3f5   : > { %v3460_v7 = vpop.f32.mrf.mxu3 }
 0x3f6   : > { %v3480_v52 = vadd.f32 %v3460_v7, %v2432_v15 }
 0x3fa   : > { %v2434_v14 = vpop.f32.mrf.mxu2 }
 0x3fb   : > { %v2435_v37 = vadd.f32 %v2434_v14, %v7343_v24 }
 0x3fd   : > { %v3463_v50 = vpop.f32.mrf.mxu3 }
 0x3fe   : > { %v3481_v30 = vadd.f32 %v3463_v50, %v2435_v37 }
 0x406   : > { %v4101_v47 = vpop.f32.mrf.mxu1 }
 0x407   : > { %v4129_v16 = vadd.f32 %v4101_v47, %v3476_v55 }
 0x409   : > { %v4149_v0 = vadd.f32 %v7505_v5, %v4129_v16 }
 0x40b   : > { %vm4165_vm14 = vcmp.ge.f32.partialorder %v4149_v0, 0.0  ;;  %v4181_v40 = vmul.f32 0.1, %v4149_v0 }
 0x40d   : > { %v4197_v13 = vsel %vm4165_vm14, %v4149_v0, %v4181_v40 }
 0x40e   : > { %4214 = vst.msk [vmem:[%s4631_s13 + $0x50] sm:$0xff] %vm4203_vm6, %v4197_v13  ;;  %v4104_v26 = vpop.f32.mrf.mxu1 }
 0x40f   : > { %v4130_v34 = vadd.f32 %v4104_v26, %v3477_v53 }
 0x411   : > { %v4150_v45 = vadd.f32 %v7505_v5, %v4130_v34 }
 0x413   : > { %vm4166_vm15 = vcmp.ge.f32.partialorder %v4150_v45, 0.0  ;;  %v4182_v21 = vmul.f32 0.1, %v4150_v45 }
 0x415   : > { %v4198_v29 = vsel %vm4166_vm15, %v4150_v45, %v4182_v21 }
 0x416   : > { %4215 = vst.msk [vmem:[%s4631_s13 + $0x58] sm:$0xff] %vm4203_vm6, %v4198_v29 }
 0x41d   : > { %v4107_v48 = vpop.f32.mrf.mxu1 }
 0x41e   : > { %v4131_v58 = vadd.f32 %v4107_v48, %v3478_v9 }
 0x420   : > { %v4151_v11 = vadd.f32 %v7505_v5, %v4131_v58 }
 0x422   : > { %vm4167_vm1 = vcmp.ge.f32.partialorder %v4151_v11, 0.0  ;;  %v4183_v35 = vmul.f32 0.1, %v4151_v11 }
 0x424   : > { %v4199_v59 = vsel %vm4167_vm1, %v4151_v11, %v4183_v35 }
 0x425   : > { %4216 = vst.msk [vmem:[%s4631_s13 + $0x60] sm:$0xff] %vm4203_vm6, %v4199_v59  ;;  %v4110_v46 = vpop.f32.mrf.mxu1 }
 0x426   : > { %v4132_v33 = vadd.f32 %v4110_v46, %v3479_v17 }
 0x428   : > { %v4152_v56 = vadd.f32 %v7505_v5, %v4132_v33 }
 0x42a   : > { %vm4168_vm2 = vcmp.ge.f32.partialorder %v4152_v56, 0.0  ;;  %v4184_v25 = vmul.f32 0.1, %v4152_v56 }
 0x42c   : > { %v4200_v57 = vsel %vm4168_vm2, %v4152_v56, %v4184_v25 }
 0x42d   : > { %4217 = vst.msk [vmem:[%s4631_s13 + $0x68] sm:$0xff] %vm4203_vm6, %v4200_v57 }
 0x42f   : > { %v4113_v6 = vpop.f32.mrf.mxu1 }
 0x430   : > { %v4133_v32 = vadd.f32 %v4113_v6, %v3480_v52 }
 0x432   : > { %v4153_v27 = vadd.f32 %v7505_v5, %v4133_v32 }
 0x434   : > { %vm4169_vm4 = vcmp.ge.f32.partialorder %v4153_v27, 0.0  ;;  %v4185_v28 = vmul.f32 0.1, %v4153_v27 }
 0x436   : > { %v4201_v36 = vsel %vm4169_vm4, %v4153_v27, %v4185_v28 }
 0x437   : > { %4218 = vst.msk [vmem:[%s4631_s13 + $0x70] sm:$0xff] %vm4203_vm6, %v4201_v36  ;;  %v4116_v63 = vpop.f32.mrf.mxu1 }
 0x438   : > { %v4134_v60 = vadd.f32 %v4116_v63, %v3481_v30 }
 0x43a   : > { %v4154_v23 = vadd.f32 %v7505_v5, %v4134_v60 }
 0x43c   : > { %vm4170_vm5 = vcmp.ge.f32.partialorder %v4154_v23, 0.0  ;;  %v4186_v38 = vmul.f32 0.1, %v4154_v23 }
 0x43e   : > { %v4202_v22 = vsel %vm4170_vm5, %v4154_v23, %v4186_v38 }
 0x43f   : > { %4219 = vst.msk [vmem:[%s4631_s13 + $0x78] sm:$0xff] %vm4203_vm6, %v4202_v22 }
 0x440 PF: > { %s15_s22 = sadd.s32 1, %s4550_s22   ;;  %s8042_s18 = smov %s4542_s20 }
 0x441   : > { %p12_p9 = scmp.ge.s32.totalorder %s15_s22, 6   ;;  %s8043_s19 = smov %s4546_s21 }
 0x442   : > { %s8044_s20 = smov %s8047_s23  ;;  %s8045_s21 = smov %s8051_s24 }
 0x443   :  { %14 = sbr.rel (!%p12_p9) target bundleno = 3 (0x3), region = 80 }

</bundles_post_ra>
